<compile_context>
chip_gen: v7x
topology: tpu7x:2x2x1
jax: 0.10.0
libtpu: 0.0.40
codegen_flags: <defaults>
</compile_context>

<pallas_src>
import jax
import jax.numpy as jnp
from jax.experimental import pallas as pl
from jax.experimental.pallas import tpu as pltpu


ALIGN = 16        # bf16 sublane packing: keep every channel group 16-aligned
BIAS_ROWS = 16    # row 0 == 1.0 (bias), rows 1..15 zero (alignment filler)


def _round_up(v, m):
    return (v + m - 1) // m * m


# -----------------------------------------------------------------------------
# Fused RDB kernel
# -----------------------------------------------------------------------------
def _make_rdb_kernel(H, W, BHW, groups_true, groups_pad, col_dtype):
    taps = [(ky - 1, kx - 1) for ky in range(3) for kx in range(3)]
    # start row of each channel group inside the shared im2col buffer
    group_off = []
    off = BIAS_ROWS
    for cp in groups_pad:
        group_off.append(off)
        off += 9 * cp

    def kernel(mask_ref, x_ref, w1, w2, w3, w4, w5, w6, o_ref, col_ref):
        # ---- per-step init: bias rows + channel-padding rows only ----------
        r = jax.lax.broadcasted_iota(jnp.int32, (BIAS_ROWS, BHW), 0)
        col_ref[pl.ds(0, BIAS_ROWS), :] = (r == 0).astype(col_dtype)
        for g, (ct, cp) in enumerate(zip(groups_true, groups_pad)):
            if cp > ct:
                zpad = jnp.zeros((cp - ct, BHW), col_dtype)
                for t in range(9):
                    col_ref[pl.ds(group_off[g] + t * cp + ct, cp - ct), :] = zpad

        def scatter(act, g):
            # Write the 9 spatially shifted (SAME zero-padded) copies of `act`
            # into group g's slots: row = group_off[g] + tap*cp + channel.
            ct = act.shape[0]
            cp = groups_pad[g]
            base = group_off[g]
            for t, (dy, dx) in enumerate(taps):
                row = base + t * cp
                if dy == 0 and dx == 0:
                    col_ref[pl.ds(row, ct), :] = act.astype(col_dtype)
                else:
                    s = dy * W + dx
                    # rolled[:, p] == act[:, p + s]; wrap / cross-image reads
                    # only land on positions the boundary mask zeroes.
                    rolled = pltpu.roll(act, (-s) % BHW, 1)
                    m = mask_ref[pl.ds(t, 1), :]
                    col_ref[pl.ds(row, ct), :] = (rolled * m).astype(col_dtype)

        def conv(w_ref):
            # One lane-dense MXU matmul over this conv's true fan-in prefix
            # (bias is folded in via the constant-1 row).
            k = w_ref.shape[1]
            return jnp.dot(w_ref[...], col_ref[pl.ds(0, k), :],
                           preferred_element_type=jnp.float32)

        def lrelu(v):
            return jnp.where(v > 0, v, 0.2 * v)

        x0 = x_ref[...]                           # (nf, BHW) f32
        scatter(x0, 0)
        x1 = lrelu(conv(w1)); scatter(x1, 1)
        x2 = lrelu(conv(w2)); scatter(x2, 2)
        x3 = lrelu(conv(w3)); scatter(x3, 3)
        x4 = lrelu(conv(w4)); scatter(x4, 4)
        x5 = conv(w5)                             # (nf, BHW), no activation
        x6 = x5 * 0.2 + x0                        # residual (f32)
        scatter(x6, 0)                            # reuse x's group for conv6
        x7 = lrelu(conv(w6))
        o_ref[...] = x7.astype(o_ref.dtype)

    return kernel


# -----------------------------------------------------------------------------
# Host-side packing helpers
# -----------------------------------------------------------------------------
def _pack_weight(w_hwio, b, groups_true, groups_pad, dtype):
    """(3,3,Cin,Cout) HWIO + (Cout,) bias -> (Cout, BIAS_ROWS + 9*sum(pad)),
    group-major / tap-major / channel-minor, bias folded into column 0."""
    kh, kw, cin, cout = w_hwio.shape
    assert sum(groups_true) == cin
    wt = jnp.transpose(w_hwio, (3, 0, 1, 2)).reshape(cout, kh * kw, cin)
    pieces = [jnp.zeros((cout, BIAS_ROWS), jnp.float32).at[:, 0].set(b)]
    start = 0
    for ct, cp in zip(groups_true, groups_pad):
        p = wt[:, :, start:start + ct]
        p = jnp.pad(p, ((0, 0), (0, 0), (0, cp - ct)))
        pieces.append(p.reshape(cout, kh * kw * cp))
        start += ct
    return jnp.concatenate(pieces, axis=1).astype(dtype)


def _boundary_masks(H, W, B):
    """(9, B*H*W) f32 validity masks for SAME zero padding, per-image tiled."""
    taps = [(ky - 1, kx - 1) for ky in range(3) for kx in range(3)]
    yy, xx = jnp.meshgrid(jnp.arange(H), jnp.arange(W), indexing="ij")
    rows = []
    for dy, dx in taps:
        valid = ((yy + dy >= 0) & (yy + dy < H) &
                 (xx + dx >= 0) & (xx + dx < W))
        rows.append(jnp.tile(valid.astype(jnp.float32).reshape(-1), B))
    return jnp.stack(rows)


def _pick_batch_block(N, HW, k_rows, bytes_per=2, budget=24 << 20):
    """Largest divisor B of N whose (k_rows, B*HW) col buffer fits the budget."""
    best = 1
    for b in range(1, N + 1):
        if N % b == 0 and k_rows * b * HW * bytes_per <= budget:
            best = b
    return best


# -----------------------------------------------------------------------------
# Public forward
# -----------------------------------------------------------------------------
@jax.jit
def rdb5v2_forward_pallas(x, params):
    """x: (N, nf, H, W) float32 (NCHW, same as the PyTorch module).
    params: list of 6 (w_hwio (3,3,Cin,Cout), b (Cout,)) tuples."""
    N, nf, H, W = x.shape
    HW = H * W
    gc = params[0][0].shape[-1]
    out_chn = params[5][0].shape[-1]

    groups_true = [nf, gc, gc, gc, gc]
    groups_pad = [_round_up(c, ALIGN) for c in groups_true]
    k_total = BIAS_ROWS + 9 * sum(groups_pad)

    B = _pick_batch_block(N, HW, k_total)
    BHW = B * HW
    col_dtype = jnp.bfloat16

    # Lane-dense layout: activations live as (C, N*HW), blocked along lanes.
    x_flat = jnp.transpose(x, (1, 0, 2, 3)).reshape(nf, N * HW)
    mask = _boundary_masks(H, W, B)

    # conv_i consumes channel groups 0..i-1; conv6 consumes only x's group.
    fan_true = [groups_true[:1], groups_true[:2], groups_true[:3],
                groups_true[:4], groups_true[:5], groups_true[:1]]
    fan_pad = [groups_pad[:1], groups_pad[:2], groups_pad[:3],
               groups_pad[:4], groups_pad[:5], groups_pad[:1]]
    packed = [_pack_weight(w, b, gt, gp, col_dtype)
              for (w, b), gt, gp in zip(params, fan_true, fan_pad)]

    in_specs = [pl.BlockSpec((9, BHW), lambda n: (0, 0)),
                pl.BlockSpec((nf, BHW), lambda n: (0, n))]
    in_specs += [pl.BlockSpec(wm.shape, lambda n: (0, 0)) for wm in packed]

    # Advisory cost estimate (whole call).
    flops = 0
    bytes_accessed = x.size * x.dtype.itemsize + mask.size * 4
    for (w, b), wm in zip(params, packed):
        kh, kw, cin, cout = w.shape
        flops += 2 * cout * kh * kw * cin * HW * N
        bytes_accessed += wm.size * 2
    bytes_accessed += out_chn * N * HW * x.dtype.itemsize
    cost = pl.CostEstimate(flops=int(flops), transcendentals=0,
                           bytes_accessed=int(bytes_accessed))

    # VMEM budget: col buffer + (double-buffered) operands + f32 temporaries.
    est = (k_total * BHW * 2
           + 2 * sum(wm.size * 2 for wm in packed)
           + 2 * mask.size * 4
           + 2 * (nf + out_chn) * BHW * 4
           + 6 * max(gc, nf, out_chn) * BHW * 4
           + (4 << 20))
    vmem_limit = int(min(max(est, 32 << 20), 100 << 20))

    out_flat = pl.pallas_call(
        _make_rdb_kernel(H, W, BHW, groups_true, groups_pad, col_dtype),
        out_shape=jax.ShapeDtypeStruct((out_chn, N * HW), x.dtype),
        grid=(N // B,),
        in_specs=in_specs,
        out_specs=pl.BlockSpec((out_chn, BHW), lambda n: (0, n)),
        scratch_shapes=[pltpu.VMEM((k_total, BHW), col_dtype)],
        compiler_params=pltpu.CompilerParams(
            dimension_semantics=("parallel",),
            vmem_limit_bytes=vmem_limit),
        cost_estimate=cost,
    )(mask, x_flat, *packed)

    return jnp.transpose(out_flat.reshape(out_chn, N, H, W), (1, 0, 2, 3))


# -----------------------------------------------------------------------------
# Synthetic deterministic params (kaiming_normal fan_in * 0.1 for conv1..5,
# plain kaiming_normal for conv6), weights generated directly in HWIO.
# -----------------------------------------------------------------------------
def init_params(key, nf, out_chn, gc):
    cfg = [(nf, gc, 0.1), (nf + gc, gc, 0.1), (nf + 2 * gc, gc, 0.1),
           (nf + 3 * gc, gc, 0.1), (nf + 4 * gc, nf, 0.1), (nf, out_chn, 1.0)]
    params = []
    for cin, cout, scale in cfg:
        key, kw, kb = jax.random.split(key, 3)
        std = (2.0 / (cin * 9)) ** 0.5
        w = (std * scale) * jax.random.normal(kw, (3, 3, cin, cout), jnp.float32)
        b = 0.05 * jax.random.normal(kb, (cout,), jnp.float32)
        params.append((w, b))
    return params


# -----------------------------------------------------------------------------
# Pure-JAX reference for validation (NCHW, HWIO)
# -----------------------------------------------------------------------------
def _conv_ref(x, w, b):
    y = jax.lax.conv_general_dilated(
        x, w, (1, 1), "SAME",
        dimension_numbers=("NCHW", "HWIO", "NCHW"))
    return y + b[None, :, None, None]


def _lrelu_ref(v):
    return jnp.where(v > 0, v, 0.2 * v)


def rdb5v2_forward_ref(x, params):
    (w1, b1), (w2, b2), (w3, b3), (w4, b4), (w5, b5), (w6, b6) = params
    x1 = _lrelu_ref(_conv_ref(x, w1, b1))
    x2 = _lrelu_ref(_conv_ref(jnp.concatenate([x, x1], 1), w2, b2))
    x3 = _lrelu_ref(_conv_ref(jnp.concatenate([x, x1, x2], 1), w3, b3))
    x4 = _lrelu_ref(_conv_ref(jnp.concatenate([x, x1, x2, x3], 1), w4, b4))
    x5 = _conv_ref(jnp.concatenate([x, x1, x2, x3, x4], 1), w5, b5)
    x6 = x5 * 0.2 + x
    x7 = _lrelu_ref(_conv_ref(x6, w6, b6))
    return x7


if __name__ == "__main__":
    # Small, module-consistent shapes: N=2, nf=4, out_chn=4, gc=8, H=W=16 (NCHW).
    N, H, W = 2, 16, 16
    nf, out_chn, gc = 4, 4, 8

    key = jax.random.PRNGKey(0)
    kx, kp = jax.random.split(key)
    x = jax.random.normal(kx, (N, nf, H, W), jnp.float32)
    params = init_params(kp, nf, out_chn, gc)

    out = jax.block_until_ready(rdb5v2_forward_pallas(x, params))
    ref = rdb5v2_forward_ref(x, params)

    assert out.shape == (N, out_chn, H, W)
    max_err = float(jnp.max(jnp.abs(out - ref)))
    # bf16 MXU operands with f32 accumulation -> loosened tolerance vs f32 ref.
    assert jnp.allclose(out, ref, rtol=3e-2, atol=3e-2), max_err
    print("KERNEL_OK")
</pallas_src>

<mosaic_0001>
module attributes {stable_mosaic.version = 11 : i64} {
  func.func @kernel(%arg0: i32, %arg1: memref<9x512xf32, #tpu.memory_space<vmem>>, %arg2: memref<4x512xf32, #tpu.memory_space<vmem>>, %arg3: memref<8x160xbf16, #tpu.memory_space<vmem>>, %arg4: memref<8x304xbf16, #tpu.memory_space<vmem>>, %arg5: memref<8x448xbf16, #tpu.memory_space<vmem>>, %arg6: memref<8x592xbf16, #tpu.memory_space<vmem>>, %arg7: memref<4x736xbf16, #tpu.memory_space<vmem>>, %arg8: memref<4x160xbf16, #tpu.memory_space<vmem>>, %arg9: memref<4x512xf32, #tpu.memory_space<vmem>>, %arg10: memref<736x512xbf16, #tpu.memory_space<vmem>>) attributes {dimension_semantics = [#tpu.dimension_semantics<parallel>], iteration_bounds = array<i64: 1>, scalar_prefetch = 0 : i64, scratch_operands = 1 : i64, tpu.core_type = #tpu.core_type<tc>, window_params = [{pipeline_mode = #tpu.pipeline_mode<synchronous>, transform_indices = @transform_0, window_bounds = array<i64: 9, 512>}, {transform_indices = @transform_1, window_bounds = array<i64: 4, 512>}, {pipeline_mode = #tpu.pipeline_mode<synchronous>, transform_indices = @transform_2, window_bounds = array<i64: 8, 160>}, {pipeline_mode = #tpu.pipeline_mode<synchronous>, transform_indices = @transform_3, window_bounds = array<i64: 8, 304>}, {pipeline_mode = #tpu.pipeline_mode<synchronous>, transform_indices = @transform_4, window_bounds = array<i64: 8, 448>}, {pipeline_mode = #tpu.pipeline_mode<synchronous>, transform_indices = @transform_5, window_bounds = array<i64: 8, 592>}, {pipeline_mode = #tpu.pipeline_mode<synchronous>, transform_indices = @transform_6, window_bounds = array<i64: 4, 736>}, {pipeline_mode = #tpu.pipeline_mode<synchronous>, transform_indices = @transform_7, window_bounds = array<i64: 4, 160>}, {transform_indices = @transform_8, window_bounds = array<i64: 4, 512>}]} {
    %0 = tpu.iota {dimensions = array<i32: 0>} : vector<16x512xi32>
    %c0_i32 = arith.constant 0 : i32
    %1 = vector.broadcast %c0_i32 : i32 to vector<16x512xi32>
    %2 = arith.cmpi eq, %0, %1 : vector<16x512xi32>
    %3 = arith.extui %2 : vector<16x512xi1> to vector<16x512xi32>
    %4 = arith.sitofp %3 : vector<16x512xi32> to vector<16x512xf32>
    %5 = arith.truncf %4 : vector<16x512xf32> to vector<16x512xbf16>
    %c0 = arith.constant 0 : index
    %c0_0 = arith.constant 0 : index
    %6 = vector.load %arg10[%c0, %c0_0] : memref<736x512xbf16, #tpu.memory_space<vmem>>, vector<16x512xbf16>
    tpu.vector_store %arg10[%c0, %c0_0], %5 {strides = array<i32>} : memref<736x512xbf16, #tpu.memory_space<vmem>>, vector<16x512xbf16>,
    %cst = arith.constant 0.000000e+00 : bf16
    %7 = vector.broadcast %cst : bf16 to vector<12x512xbf16>
    %c20 = arith.constant 20 : index
    %c0_1 = arith.constant 0 : index
    %8 = vector.load %arg10[%c20, %c0_1] : memref<736x512xbf16, #tpu.memory_space<vmem>>, vector<12x512xbf16>
    tpu.vector_store %arg10[%c20, %c0_1], %7 {strides = array<i32>} : memref<736x512xbf16, #tpu.memory_space<vmem>>, vector<12x512xbf16>,
    %c36 = arith.constant 36 : index
    %c0_2 = arith.constant 0 : index
    %9 = vector.load %arg10[%c36, %c0_2] : memref<736x512xbf16, #tpu.memory_space<vmem>>, vector<12x512xbf16>
    tpu.vector_store %arg10[%c36, %c0_2], %7 {strides = array<i32>} : memref<736x512xbf16, #tpu.memory_space<vmem>>, vector<12x512xbf16>,
    %c52 = arith.constant 52 : index
    %c0_3 = arith.constant 0 : index
    %10 = vector.load %arg10[%c52, %c0_3] : memref<736x512xbf16, #tpu.memory_space<vmem>>, vector<12x512xbf16>
    tpu.vector_store %arg10[%c52, %c0_3], %7 {strides = array<i32>} : memref<736x512xbf16, #tpu.memory_space<vmem>>, vector<12x512xbf16>,
    %c68 = arith.constant 68 : index
    %c0_4 = arith.constant 0 : index
    %11 = vector.load %arg10[%c68, %c0_4] : memref<736x512xbf16, #tpu.memory_space<vmem>>, vector<12x512xbf16>
    tpu.vector_store %arg10[%c68, %c0_4], %7 {strides = array<i32>} : memref<736x512xbf16, #tpu.memory_space<vmem>>, vector<12x512xbf16>,
    %c84 = arith.constant 84 : index
    %c0_5 = arith.constant 0 : index
    %12 = vector.load %arg10[%c84, %c0_5] : memref<736x512xbf16, #tpu.memory_space<vmem>>, vector<12x512xbf16>
    tpu.vector_store %arg10[%c84, %c0_5], %7 {strides = array<i32>} : memref<736x512xbf16, #tpu.memory_space<vmem>>, vector<12x512xbf16>,
    %c100 = arith.constant 100 : index
    %c0_6 = arith.constant 0 : index
    %13 = vector.load %arg10[%c100, %c0_6] : memref<736x512xbf16, #tpu.memory_space<vmem>>, vector<12x512xbf16>
    tpu.vector_store %arg10[%c100, %c0_6], %7 {strides = array<i32>} : memref<736x512xbf16, #tpu.memory_space<vmem>>, vector<12x512xbf16>,
    %c116 = arith.constant 116 : index
    %c0_7 = arith.constant 0 : index
    %14 = vector.load %arg10[%c116, %c0_7] : memref<736x512xbf16, #tpu.memory_space<vmem>>, vector<12x512xbf16>
    tpu.vector_store %arg10[%c116, %c0_7], %7 {strides = array<i32>} : memref<736x512xbf16, #tpu.memory_space<vmem>>, vector<12x512xbf16>,
    %c132 = arith.constant 132 : index
    %c0_8 = arith.constant 0 : index
    %15 = vector.load %arg10[%c132, %c0_8] : memref<736x512xbf16, #tpu.memory_space<vmem>>, vector<12x512xbf16>
    tpu.vector_store %arg10[%c132, %c0_8], %7 {strides = array<i32>} : memref<736x512xbf16, #tpu.memory_space<vmem>>, vector<12x512xbf16>,
    %c148 = arith.constant 148 : index
    %c0_9 = arith.constant 0 : index
    %16 = vector.load %arg10[%c148, %c0_9] : memref<736x512xbf16, #tpu.memory_space<vmem>>, vector<12x512xbf16>
    tpu.vector_store %arg10[%c148, %c0_9], %7 {strides = array<i32>} : memref<736x512xbf16, #tpu.memory_space<vmem>>, vector<12x512xbf16>,
    %cst_10 = arith.constant 0.000000e+00 : bf16
    %17 = vector.broadcast %cst_10 : bf16 to vector<8x512xbf16>
    %c168 = arith.constant 168 : index
    %c0_11 = arith.constant 0 : index
    %18 = vector.load %arg10[%c168, %c0_11] : memref<736x512xbf16, #tpu.memory_space<vmem>>, vector<8x512xbf16>
    tpu.vector_store %arg10[%c168, %c0_11], %17 {strides = array<i32>} : memref<736x512xbf16, #tpu.memory_space<vmem>>, vector<8x512xbf16>,
    %c184 = arith.constant 184 : index
    %c0_12 = arith.constant 0 : index
    %19 = vector.load %arg10[%c184, %c0_12] : memref<736x512xbf16, #tpu.memory_space<vmem>>, vector<8x512xbf16>
    tpu.vector_store %arg10[%c184, %c0_12], %17 {strides = array<i32>} : memref<736x512xbf16, #tpu.memory_space<vmem>>, vector<8x512xbf16>,
    %c200 = arith.constant 200 : index
    %c0_13 = arith.constant 0 : index
    %20 = vector.load %arg10[%c200, %c0_13] : memref<736x512xbf16, #tpu.memory_space<vmem>>, vector<8x512xbf16>
    tpu.vector_store %arg10[%c200, %c0_13], %17 {strides = array<i32>} : memref<736x512xbf16, #tpu.memory_space<vmem>>, vector<8x512xbf16>,
    %c216 = arith.constant 216 : index
    %c0_14 = arith.constant 0 : index
    %21 = vector.load %arg10[%c216, %c0_14] : memref<736x512xbf16, #tpu.memory_space<vmem>>, vector<8x512xbf16>
    tpu.vector_store %arg10[%c216, %c0_14], %17 {strides = array<i32>} : memref<736x512xbf16, #tpu.memory_space<vmem>>, vector<8x512xbf16>,
    %c232 = arith.constant 232 : index
    %c0_15 = arith.constant 0 : index
    %22 = vector.load %arg10[%c232, %c0_15] : memref<736x512xbf16, #tpu.memory_space<vmem>>, vector<8x512xbf16>
    tpu.vector_store %arg10[%c232, %c0_15], %17 {strides = array<i32>} : memref<736x512xbf16, #tpu.memory_space<vmem>>, vector<8x512xbf16>,
    %c248 = arith.constant 248 : index
    %c0_16 = arith.constant 0 : index
    %23 = vector.load %arg10[%c248, %c0_16] : memref<736x512xbf16, #tpu.memory_space<vmem>>, vector<8x512xbf16>
    tpu.vector_store %arg10[%c248, %c0_16], %17 {strides = array<i32>} : memref<736x512xbf16, #tpu.memory_space<vmem>>, vector<8x512xbf16>,
    %c264 = arith.constant 264 : index
    %c0_17 = arith.constant 0 : index
    %24 = vector.load %arg10[%c264, %c0_17] : memref<736x512xbf16, #tpu.memory_space<vmem>>, vector<8x512xbf16>
    tpu.vector_store %arg10[%c264, %c0_17], %17 {strides = array<i32>} : memref<736x512xbf16, #tpu.memory_space<vmem>>, vector<8x512xbf16>,
    %c280 = arith.constant 280 : index
    %c0_18 = arith.constant 0 : index
    %25 = vector.load %arg10[%c280, %c0_18] : memref<736x512xbf16, #tpu.memory_space<vmem>>, vector<8x512xbf16>
    tpu.vector_store %arg10[%c280, %c0_18], %17 {strides = array<i32>} : memref<736x512xbf16, #tpu.memory_space<vmem>>, vector<8x512xbf16>,
    %c296 = arith.constant 296 : index
    %c0_19 = arith.constant 0 : index
    %26 = vector.load %arg10[%c296, %c0_19] : memref<736x512xbf16, #tpu.memory_space<vmem>>, vector<8x512xbf16>
    tpu.vector_store %arg10[%c296, %c0_19], %17 {strides = array<i32>} : memref<736x512xbf16, #tpu.memory_space<vmem>>, vector<8x512xbf16>,
    %cst_20 = arith.constant 0.000000e+00 : bf16
    %27 = vector.broadcast %cst_20 : bf16 to vector<8x512xbf16>
    %c312 = arith.constant 312 : index
    %c0_21 = arith.constant 0 : index
    %28 = vector.load %arg10[%c312, %c0_21] : memref<736x512xbf16, #tpu.memory_space<vmem>>, vector<8x512xbf16>
    tpu.vector_store %arg10[%c312, %c0_21], %27 {strides = array<i32>} : memref<736x512xbf16, #tpu.memory_space<vmem>>, vector<8x512xbf16>,
    %c328 = arith.constant 328 : index
    %c0_22 = arith.constant 0 : index
    %29 = vector.load %arg10[%c328, %c0_22] : memref<736x512xbf16, #tpu.memory_space<vmem>>, vector<8x512xbf16>
    tpu.vector_store %arg10[%c328, %c0_22], %27 {strides = array<i32>} : memref<736x512xbf16, #tpu.memory_space<vmem>>, vector<8x512xbf16>,
    %c344 = arith.constant 344 : index
    %c0_23 = arith.constant 0 : index
    %30 = vector.load %arg10[%c344, %c0_23] : memref<736x512xbf16, #tpu.memory_space<vmem>>, vector<8x512xbf16>
    tpu.vector_store %arg10[%c344, %c0_23], %27 {strides = array<i32>} : memref<736x512xbf16, #tpu.memory_space<vmem>>, vector<8x512xbf16>,
    %c360 = arith.constant 360 : index
    %c0_24 = arith.constant 0 : index
    %31 = vector.load %arg10[%c360, %c0_24] : memref<736x512xbf16, #tpu.memory_space<vmem>>, vector<8x512xbf16>
    tpu.vector_store %arg10[%c360, %c0_24], %27 {strides = array<i32>} : memref<736x512xbf16, #tpu.memory_space<vmem>>, vector<8x512xbf16>,
    %c376 = arith.constant 376 : index
    %c0_25 = arith.constant 0 : index
    %32 = vector.load %arg10[%c376, %c0_25] : memref<736x512xbf16, #tpu.memory_space<vmem>>, vector<8x512xbf16>
    tpu.vector_store %arg10[%c376, %c0_25], %27 {strides = array<i32>} : memref<736x512xbf16, #tpu.memory_space<vmem>>, vector<8x512xbf16>,
    %c392 = arith.constant 392 : index
    %c0_26 = arith.constant 0 : index
    %33 = vector.load %arg10[%c392, %c0_26] : memref<736x512xbf16, #tpu.memory_space<vmem>>, vector<8x512xbf16>
    tpu.vector_store %arg10[%c392, %c0_26], %27 {strides = array<i32>} : memref<736x512xbf16, #tpu.memory_space<vmem>>, vector<8x512xbf16>,
    %c408 = arith.constant 408 : index
    %c0_27 = arith.constant 0 : index
    %34 = vector.load %arg10[%c408, %c0_27] : memref<736x512xbf16, #tpu.memory_space<vmem>>, vector<8x512xbf16>
    tpu.vector_store %arg10[%c408, %c0_27], %27 {strides = array<i32>} : memref<736x512xbf16, #tpu.memory_space<vmem>>, vector<8x512xbf16>,
    %c424 = arith.constant 424 : index
    %c0_28 = arith.constant 0 : index
    %35 = vector.load %arg10[%c424, %c0_28] : memref<736x512xbf16, #tpu.memory_space<vmem>>, vector<8x512xbf16>
    tpu.vector_store %arg10[%c424, %c0_28], %27 {strides = array<i32>} : memref<736x512xbf16, #tpu.memory_space<vmem>>, vector<8x512xbf16>,
    %c440 = arith.constant 440 : index
    %c0_29 = arith.constant 0 : index
    %36 = vector.load %arg10[%c440, %c0_29] : memref<736x512xbf16, #tpu.memory_space<vmem>>, vector<8x512xbf16>
    tpu.vector_store %arg10[%c440, %c0_29], %27 {strides = array<i32>} : memref<736x512xbf16, #tpu.memory_space<vmem>>, vector<8x512xbf16>,
    %cst_30 = arith.constant 0.000000e+00 : bf16
    %37 = vector.broadcast %cst_30 : bf16 to vector<8x512xbf16>
    %c456 = arith.constant 456 : index
    %c0_31 = arith.constant 0 : index
    %38 = vector.load %arg10[%c456, %c0_31] : memref<736x512xbf16, #tpu.memory_space<vmem>>, vector<8x512xbf16>
    tpu.vector_store %arg10[%c456, %c0_31], %37 {strides = array<i32>} : memref<736x512xbf16, #tpu.memory_space<vmem>>, vector<8x512xbf16>,
    %c472 = arith.constant 472 : index
    %c0_32 = arith.constant 0 : index
    %39 = vector.load %arg10[%c472, %c0_32] : memref<736x512xbf16, #tpu.memory_space<vmem>>, vector<8x512xbf16>
    tpu.vector_store %arg10[%c472, %c0_32], %37 {strides = array<i32>} : memref<736x512xbf16, #tpu.memory_space<vmem>>, vector<8x512xbf16>,
    %c488 = arith.constant 488 : index
    %c0_33 = arith.constant 0 : index
    %40 = vector.load %arg10[%c488, %c0_33] : memref<736x512xbf16, #tpu.memory_space<vmem>>, vector<8x512xbf16>
    tpu.vector_store %arg10[%c488, %c0_33], %37 {strides = array<i32>} : memref<736x512xbf16, #tpu.memory_space<vmem>>, vector<8x512xbf16>,
    %c504 = arith.constant 504 : index
    %c0_34 = arith.constant 0 : index
    %41 = vector.load %arg10[%c504, %c0_34] : memref<736x512xbf16, #tpu.memory_space<vmem>>, vector<8x512xbf16>
    tpu.vector_store %arg10[%c504, %c0_34], %37 {strides = array<i32>} : memref<736x512xbf16, #tpu.memory_space<vmem>>, vector<8x512xbf16>,
    %c520 = arith.constant 520 : index
    %c0_35 = arith.constant 0 : index
    %42 = vector.load %arg10[%c520, %c0_35] : memref<736x512xbf16, #tpu.memory_space<vmem>>, vector<8x512xbf16>
    tpu.vector_store %arg10[%c520, %c0_35], %37 {strides = array<i32>} : memref<736x512xbf16, #tpu.memory_space<vmem>>, vector<8x512xbf16>,
    %c536 = arith.constant 536 : index
    %c0_36 = arith.constant 0 : index
    %43 = vector.load %arg10[%c536, %c0_36] : memref<736x512xbf16, #tpu.memory_space<vmem>>, vector<8x512xbf16>
    tpu.vector_store %arg10[%c536, %c0_36], %37 {strides = array<i32>} : memref<736x512xbf16, #tpu.memory_space<vmem>>, vector<8x512xbf16>,
    %c552 = arith.constant 552 : index
    %c0_37 = arith.constant 0 : index
    %44 = vector.load %arg10[%c552, %c0_37] : memref<736x512xbf16, #tpu.memory_space<vmem>>, vector<8x512xbf16>
    tpu.vector_store %arg10[%c552, %c0_37], %37 {strides = array<i32>} : memref<736x512xbf16, #tpu.memory_space<vmem>>, vector<8x512xbf16>,
    %c568 = arith.constant 568 : index
    %c0_38 = arith.constant 0 : index
    %45 = vector.load %arg10[%c568, %c0_38] : memref<736x512xbf16, #tpu.memory_space<vmem>>, vector<8x512xbf16>
    tpu.vector_store %arg10[%c568, %c0_38], %37 {strides = array<i32>} : memref<736x512xbf16, #tpu.memory_space<vmem>>, vector<8x512xbf16>,
    %c584 = arith.constant 584 : index
    %c0_39 = arith.constant 0 : index
    %46 = vector.load %arg10[%c584, %c0_39] : memref<736x512xbf16, #tpu.memory_space<vmem>>, vector<8x512xbf16>
    tpu.vector_store %arg10[%c584, %c0_39], %37 {strides = array<i32>} : memref<736x512xbf16, #tpu.memory_space<vmem>>, vector<8x512xbf16>,
    %cst_40 = arith.constant 0.000000e+00 : bf16
    %47 = vector.broadcast %cst_40 : bf16 to vector<8x512xbf16>
    %c600 = arith.constant 600 : index
    %c0_41 = arith.constant 0 : index
    %48 = vector.load %arg10[%c600, %c0_41] : memref<736x512xbf16, #tpu.memory_space<vmem>>, vector<8x512xbf16>
    tpu.vector_store %arg10[%c600, %c0_41], %47 {strides = array<i32>} : memref<736x512xbf16, #tpu.memory_space<vmem>>, vector<8x512xbf16>,
    %c616 = arith.constant 616 : index
    %c0_42 = arith.constant 0 : index
    %49 = vector.load %arg10[%c616, %c0_42] : memref<736x512xbf16, #tpu.memory_space<vmem>>, vector<8x512xbf16>
    tpu.vector_store %arg10[%c616, %c0_42], %47 {strides = array<i32>} : memref<736x512xbf16, #tpu.memory_space<vmem>>, vector<8x512xbf16>,
    %c632 = arith.constant 632 : index
    %c0_43 = arith.constant 0 : index
    %50 = vector.load %arg10[%c632, %c0_43] : memref<736x512xbf16, #tpu.memory_space<vmem>>, vector<8x512xbf16>
    tpu.vector_store %arg10[%c632, %c0_43], %47 {strides = array<i32>} : memref<736x512xbf16, #tpu.memory_space<vmem>>, vector<8x512xbf16>,
    %c648 = arith.constant 648 : index
    %c0_44 = arith.constant 0 : index
    %51 = vector.load %arg10[%c648, %c0_44] : memref<736x512xbf16, #tpu.memory_space<vmem>>, vector<8x512xbf16>
    tpu.vector_store %arg10[%c648, %c0_44], %47 {strides = array<i32>} : memref<736x512xbf16, #tpu.memory_space<vmem>>, vector<8x512xbf16>,
    %c664 = arith.constant 664 : index
    %c0_45 = arith.constant 0 : index
    %52 = vector.load %arg10[%c664, %c0_45] : memref<736x512xbf16, #tpu.memory_space<vmem>>, vector<8x512xbf16>
    tpu.vector_store %arg10[%c664, %c0_45], %47 {strides = array<i32>} : memref<736x512xbf16, #tpu.memory_space<vmem>>, vector<8x512xbf16>,
    %c680 = arith.constant 680 : index
    %c0_46 = arith.constant 0 : index
    %53 = vector.load %arg10[%c680, %c0_46] : memref<736x512xbf16, #tpu.memory_space<vmem>>, vector<8x512xbf16>
    tpu.vector_store %arg10[%c680, %c0_46], %47 {strides = array<i32>} : memref<736x512xbf16, #tpu.memory_space<vmem>>, vector<8x512xbf16>,
    %c696 = arith.constant 696 : index
    %c0_47 = arith.constant 0 : index
    %54 = vector.load %arg10[%c696, %c0_47] : memref<736x512xbf16, #tpu.memory_space<vmem>>, vector<8x512xbf16>
    tpu.vector_store %arg10[%c696, %c0_47], %47 {strides = array<i32>} : memref<736x512xbf16, #tpu.memory_space<vmem>>, vector<8x512xbf16>,
    %c712 = arith.constant 712 : index
    %c0_48 = arith.constant 0 : index
    %55 = vector.load %arg10[%c712, %c0_48] : memref<736x512xbf16, #tpu.memory_space<vmem>>, vector<8x512xbf16>
    tpu.vector_store %arg10[%c712, %c0_48], %47 {strides = array<i32>} : memref<736x512xbf16, #tpu.memory_space<vmem>>, vector<8x512xbf16>,
    %c728 = arith.constant 728 : index
    %c0_49 = arith.constant 0 : index
    %56 = vector.load %arg10[%c728, %c0_49] : memref<736x512xbf16, #tpu.memory_space<vmem>>, vector<8x512xbf16>
    tpu.vector_store %arg10[%c728, %c0_49], %47 {strides = array<i32>} : memref<736x512xbf16, #tpu.memory_space<vmem>>, vector<8x512xbf16>,
    %c0_50 = arith.constant 0 : index
    %c0_51 = arith.constant 0 : index
    %57 = vector.load %arg2[%c0_50, %c0_51] : memref<4x512xf32, #tpu.memory_space<vmem>>, vector<4x512xf32>
    %c17_i32 = arith.constant 17 : i32
    %58 = tpu.dynamic_rotate %57 by %c17_i32 dim 1 : vector<4x512xf32>, i32 -> vector<4x512xf32>
    %c0_52 = arith.constant 0 : index
    %c0_53 = arith.constant 0 : index
    %59 = vector.load %arg1[%c0_52, %c0_53] : memref<9x512xf32, #tpu.memory_space<vmem>>, vector<1x512xf32>
    %60 = vector.broadcast %59 : vector<1x512xf32> to vector<4x512xf32>
    %61 = arith.mulf %58, %60 : vector<4x512xf32>
    %62 = arith.truncf %61 : vector<4x512xf32> to vector<4x512xbf16>
    %c16 = arith.constant 16 : index
    %c0_54 = arith.constant 0 : index
    %63 = vector.load %arg10[%c16, %c0_54] : memref<736x512xbf16, #tpu.memory_space<vmem>>, vector<4x512xbf16>
    tpu.vector_store %arg10[%c16, %c0_54], %62 {strides = array<i32>} : memref<736x512xbf16, #tpu.memory_space<vmem>>, vector<4x512xbf16>,
    %c16_i32 = arith.constant 16 : i32
    %64 = tpu.dynamic_rotate %57 by %c16_i32 dim 1 : vector<4x512xf32>, i32 -> vector<4x512xf32>
    %c1 = arith.constant 1 : index
    %c0_55 = arith.constant 0 : index
    %65 = vector.load %arg1[%c1, %c0_55] : memref<9x512xf32, #tpu.memory_space<vmem>>, vector<1x512xf32>
    %66 = vector.broadcast %65 : vector<1x512xf32> to vector<4x512xf32>
    %67 = arith.mulf %64, %66 : vector<4x512xf32>
    %68 = arith.truncf %67 : vector<4x512xf32> to vector<4x512xbf16>
    %c32 = arith.constant 32 : index
    %c0_56 = arith.constant 0 : index
    %69 = vector.load %arg10[%c32, %c0_56] : memref<736x512xbf16, #tpu.memory_space<vmem>>, vector<4x512xbf16>
    tpu.vector_store %arg10[%c32, %c0_56], %68 {strides = array<i32>} : memref<736x512xbf16, #tpu.memory_space<vmem>>, vector<4x512xbf16>,
    %c15_i32 = arith.constant 15 : i32
    %70 = tpu.dynamic_rotate %57 by %c15_i32 dim 1 : vector<4x512xf32>, i32 -> vector<4x512xf32>
    %c2 = arith.constant 2 : index
    %c0_57 = arith.constant 0 : index
    %71 = vector.load %arg1[%c2, %c0_57] : memref<9x512xf32, #tpu.memory_space<vmem>>, vector<1x512xf32>
    %72 = vector.broadcast %71 : vector<1x512xf32> to vector<4x512xf32>
    %73 = arith.mulf %70, %72 : vector<4x512xf32>
    %74 = arith.truncf %73 : vector<4x512xf32> to vector<4x512xbf16>
    %c48 = arith.constant 48 : index
    %c0_58 = arith.constant 0 : index
    %75 = vector.load %arg10[%c48, %c0_58] : memref<736x512xbf16, #tpu.memory_space<vmem>>, vector<4x512xbf16>
    tpu.vector_store %arg10[%c48, %c0_58], %74 {strides = array<i32>} : memref<736x512xbf16, #tpu.memory_space<vmem>>, vector<4x512xbf16>,
    %c1_i32 = arith.constant 1 : i32
    %76 = tpu.dynamic_rotate %57 by %c1_i32 dim 1 : vector<4x512xf32>, i32 -> vector<4x512xf32>
    %c3 = arith.constant 3 : index
    %c0_59 = arith.constant 0 : index
    %77 = vector.load %arg1[%c3, %c0_59] : memref<9x512xf32, #tpu.memory_space<vmem>>, vector<1x512xf32>
    %78 = vector.broadcast %77 : vector<1x512xf32> to vector<4x512xf32>
    %79 = arith.mulf %76, %78 : vector<4x512xf32>
    %80 = arith.truncf %79 : vector<4x512xf32> to vector<4x512xbf16>
    %c64 = arith.constant 64 : index
    %c0_60 = arith.constant 0 : index
    %81 = vector.load %arg10[%c64, %c0_60] : memref<736x512xbf16, #tpu.memory_space<vmem>>, vector<4x512xbf16>
    tpu.vector_store %arg10[%c64, %c0_60], %80 {strides = array<i32>} : memref<736x512xbf16, #tpu.memory_space<vmem>>, vector<4x512xbf16>,
    %82 = arith.truncf %57 : vector<4x512xf32> to vector<4x512xbf16>
    %c80 = arith.constant 80 : index
    %c0_61 = arith.constant 0 : index
    %83 = vector.load %arg10[%c80, %c0_61] : memref<736x512xbf16, #tpu.memory_space<vmem>>, vector<4x512xbf16>
    tpu.vector_store %arg10[%c80, %c0_61], %82 {strides = array<i32>} : memref<736x512xbf16, #tpu.memory_space<vmem>>, vector<4x512xbf16>,
    %c511_i32 = arith.constant 511 : i32
    %84 = tpu.dynamic_rotate %57 by %c511_i32 dim 1 : vector<4x512xf32>, i32 -> vector<4x512xf32>
    %c5 = arith.constant 5 : index
    %c0_62 = arith.constant 0 : index
    %85 = vector.load %arg1[%c5, %c0_62] : memref<9x512xf32, #tpu.memory_space<vmem>>, vector<1x512xf32>
    %86 = vector.broadcast %85 : vector<1x512xf32> to vector<4x512xf32>
    %87 = arith.mulf %84, %86 : vector<4x512xf32>
    %88 = arith.truncf %87 : vector<4x512xf32> to vector<4x512xbf16>
    %c96 = arith.constant 96 : index
    %c0_63 = arith.constant 0 : index
    %89 = vector.load %arg10[%c96, %c0_63] : memref<736x512xbf16, #tpu.memory_space<vmem>>, vector<4x512xbf16>
    tpu.vector_store %arg10[%c96, %c0_63], %88 {strides = array<i32>} : memref<736x512xbf16, #tpu.memory_space<vmem>>, vector<4x512xbf16>,
    %c497_i32 = arith.constant 497 : i32
    %90 = tpu.dynamic_rotate %57 by %c497_i32 dim 1 : vector<4x512xf32>, i32 -> vector<4x512xf32>
    %c6 = arith.constant 6 : index
    %c0_64 = arith.constant 0 : index
    %91 = vector.load %arg1[%c6, %c0_64] : memref<9x512xf32, #tpu.memory_space<vmem>>, vector<1x512xf32>
    %92 = vector.broadcast %91 : vector<1x512xf32> to vector<4x512xf32>
    %93 = arith.mulf %90, %92 : vector<4x512xf32>
    %94 = arith.truncf %93 : vector<4x512xf32> to vector<4x512xbf16>
    %c112 = arith.constant 112 : index
    %c0_65 = arith.constant 0 : index
    %95 = vector.load %arg10[%c112, %c0_65] : memref<736x512xbf16, #tpu.memory_space<vmem>>, vector<4x512xbf16>
    tpu.vector_store %arg10[%c112, %c0_65], %94 {strides = array<i32>} : memref<736x512xbf16, #tpu.memory_space<vmem>>, vector<4x512xbf16>,
    %c496_i32 = arith.constant 496 : i32
    %96 = tpu.dynamic_rotate %57 by %c496_i32 dim 1 : vector<4x512xf32>, i32 -> vector<4x512xf32>
    %c7 = arith.constant 7 : index
    %c0_66 = arith.constant 0 : index
    %97 = vector.load %arg1[%c7, %c0_66] : memref<9x512xf32, #tpu.memory_space<vmem>>, vector<1x512xf32>
    %98 = vector.broadcast %97 : vector<1x512xf32> to vector<4x512xf32>
    %99 = arith.mulf %96, %98 : vector<4x512xf32>
    %100 = arith.truncf %99 : vector<4x512xf32> to vector<4x512xbf16>
    %c128 = arith.constant 128 : index
    %c0_67 = arith.constant 0 : index
    %101 = vector.load %arg10[%c128, %c0_67] : memref<736x512xbf16, #tpu.memory_space<vmem>>, vector<4x512xbf16>
    tpu.vector_store %arg10[%c128, %c0_67], %100 {strides = array<i32>} : memref<736x512xbf16, #tpu.memory_space<vmem>>, vector<4x512xbf16>,
    %c495_i32 = arith.constant 495 : i32
    %102 = tpu.dynamic_rotate %57 by %c495_i32 dim 1 : vector<4x512xf32>, i32 -> vector<4x512xf32>
    %c8 = arith.constant 8 : index
    %c0_68 = arith.constant 0 : index
    %103 = vector.load %arg1[%c8, %c0_68] : memref<9x512xf32, #tpu.memory_space<vmem>>, vector<1x512xf32>
    %104 = vector.broadcast %103 : vector<1x512xf32> to vector<4x512xf32>
    %105 = arith.mulf %102, %104 : vector<4x512xf32>
    %106 = arith.truncf %105 : vector<4x512xf32> to vector<4x512xbf16>
    %c144 = arith.constant 144 : index
    %c0_69 = arith.constant 0 : index
    %107 = vector.load %arg10[%c144, %c0_69] : memref<736x512xbf16, #tpu.memory_space<vmem>>, vector<4x512xbf16>
    tpu.vector_store %arg10[%c144, %c0_69], %106 {strides = array<i32>} : memref<736x512xbf16, #tpu.memory_space<vmem>>, vector<4x512xbf16>,
    %c0_70 = arith.constant 0 : index
    %c0_71 = arith.constant 0 : index
    %108 = vector.load %arg3[%c0_70, %c0_71] : memref<8x160xbf16, #tpu.memory_space<vmem>>, vector<8x160xbf16>
    %c0_72 = arith.constant 0 : index
    %c0_73 = arith.constant 0 : index
    %109 = vector.load %arg10[%c0_72, %c0_73] : memref<736x512xbf16, #tpu.memory_space<vmem>>, vector<160x512xbf16>
    %cst_74 = arith.constant dense<0.000000e+00> : vector<8x512xf32>
    %110 = tpu.matmul %108, %109, %cst_74 {dimension_numbers = #tpu.dot_dimension_numbers<[1], [0], [0], [1], [0, 0, 1, 1], [], []>} : vector<8x160xbf16>, vector<160x512xbf16>, vector<8x512xf32> -> vector<8x512xf32>
    %cst_75 = arith.constant 0.000000e+00 : f32
    %111 = vector.broadcast %cst_75 : f32 to vector<8x512xf32>
    %112 = arith.cmpf ogt, %110, %111 : vector<8x512xf32>
    %cst_76 = arith.constant 2.000000e-01 : f32
    %113 = vector.broadcast %cst_76 : f32 to vector<8x512xf32>
    %114 = arith.mulf %113, %110 : vector<8x512xf32>
    %115 = arith.select %112, %110, %114 : vector<8x512xi1>, vector<8x512xf32>
    %c17_i32_77 = arith.constant 17 : i32
    %116 = tpu.dynamic_rotate %115 by %c17_i32_77 dim 1 : vector<8x512xf32>, i32 -> vector<8x512xf32>
    %c0_78 = arith.constant 0 : index
    %c0_79 = arith.constant 0 : index
    %117 = vector.load %arg1[%c0_78, %c0_79] : memref<9x512xf32, #tpu.memory_space<vmem>>, vector<1x512xf32>
    %118 = vector.broadcast %117 : vector<1x512xf32> to vector<8x512xf32>
    %119 = arith.mulf %116, %118 : vector<8x512xf32>
    %120 = arith.truncf %119 : vector<8x512xf32> to vector<8x512xbf16>
    %c160 = arith.constant 160 : index
    %c0_80 = arith.constant 0 : index
    %121 = vector.load %arg10[%c160, %c0_80] : memref<736x512xbf16, #tpu.memory_space<vmem>>, vector<8x512xbf16>
    tpu.vector_store %arg10[%c160, %c0_80], %120 {strides = array<i32>} : memref<736x512xbf16, #tpu.memory_space<vmem>>, vector<8x512xbf16>,
    %c16_i32_81 = arith.constant 16 : i32
    %122 = tpu.dynamic_rotate %115 by %c16_i32_81 dim 1 : vector<8x512xf32>, i32 -> vector<8x512xf32>
    %c1_82 = arith.constant 1 : index
    %c0_83 = arith.constant 0 : index
    %123 = vector.load %arg1[%c1_82, %c0_83] : memref<9x512xf32, #tpu.memory_space<vmem>>, vector<1x512xf32>
    %124 = vector.broadcast %123 : vector<1x512xf32> to vector<8x512xf32>
    %125 = arith.mulf %122, %124 : vector<8x512xf32>
    %126 = arith.truncf %125 : vector<8x512xf32> to vector<8x512xbf16>
    %c176 = arith.constant 176 : index
    %c0_84 = arith.constant 0 : index
    %127 = vector.load %arg10[%c176, %c0_84] : memref<736x512xbf16, #tpu.memory_space<vmem>>, vector<8x512xbf16>
    tpu.vector_store %arg10[%c176, %c0_84], %126 {strides = array<i32>} : memref<736x512xbf16, #tpu.memory_space<vmem>>, vector<8x512xbf16>,
    %c15_i32_85 = arith.constant 15 : i32
    %128 = tpu.dynamic_rotate %115 by %c15_i32_85 dim 1 : vector<8x512xf32>, i32 -> vector<8x512xf32>
    %c2_86 = arith.constant 2 : index
    %c0_87 = arith.constant 0 : index
    %129 = vector.load %arg1[%c2_86, %c0_87] : memref<9x512xf32, #tpu.memory_space<vmem>>, vector<1x512xf32>
    %130 = vector.broadcast %129 : vector<1x512xf32> to vector<8x512xf32>
    %131 = arith.mulf %128, %130 : vector<8x512xf32>
    %132 = arith.truncf %131 : vector<8x512xf32> to vector<8x512xbf16>
    %c192 = arith.constant 192 : index
    %c0_88 = arith.constant 0 : index
    %133 = vector.load %arg10[%c192, %c0_88] : memref<736x512xbf16, #tpu.memory_space<vmem>>, vector<8x512xbf16>
    tpu.vector_store %arg10[%c192, %c0_88], %132 {strides = array<i32>} : memref<736x512xbf16, #tpu.memory_space<vmem>>, vector<8x512xbf16>,
    %c1_i32_89 = arith.constant 1 : i32
    %134 = tpu.dynamic_rotate %115 by %c1_i32_89 dim 1 : vector<8x512xf32>, i32 -> vector<8x512xf32>
    %c3_90 = arith.constant 3 : index
    %c0_91 = arith.constant 0 : index
    %135 = vector.load %arg1[%c3_90, %c0_91] : memref<9x512xf32, #tpu.memory_space<vmem>>, vector<1x512xf32>
    %136 = vector.broadcast %135 : vector<1x512xf32> to vector<8x512xf32>
    %137 = arith.mulf %134, %136 : vector<8x512xf32>
    %138 = arith.truncf %137 : vector<8x512xf32> to vector<8x512xbf16>
    %c208 = arith.constant 208 : index
    %c0_92 = arith.constant 0 : index
    %139 = vector.load %arg10[%c208, %c0_92] : memref<736x512xbf16, #tpu.memory_space<vmem>>, vector<8x512xbf16>
    tpu.vector_store %arg10[%c208, %c0_92], %138 {strides = array<i32>} : memref<736x512xbf16, #tpu.memory_space<vmem>>, vector<8x512xbf16>,
    %140 = arith.truncf %115 : vector<8x512xf32> to vector<8x512xbf16>
    %c224 = arith.constant 224 : index
    %c0_93 = arith.constant 0 : index
    %141 = vector.load %arg10[%c224, %c0_93] : memref<736x512xbf16, #tpu.memory_space<vmem>>, vector<8x512xbf16>
    tpu.vector_store %arg10[%c224, %c0_93], %140 {strides = array<i32>} : memref<736x512xbf16, #tpu.memory_space<vmem>>, vector<8x512xbf16>,
    %c511_i32_94 = arith.constant 511 : i32
    %142 = tpu.dynamic_rotate %115 by %c511_i32_94 dim 1 : vector<8x512xf32>, i32 -> vector<8x512xf32>
    %c5_95 = arith.constant 5 : index
    %c0_96 = arith.constant 0 : index
    %143 = vector.load %arg1[%c5_95, %c0_96] : memref<9x512xf32, #tpu.memory_space<vmem>>, vector<1x512xf32>
    %144 = vector.broadcast %143 : vector<1x512xf32> to vector<8x512xf32>
    %145 = arith.mulf %142, %144 : vector<8x512xf32>
    %146 = arith.truncf %145 : vector<8x512xf32> to vector<8x512xbf16>
    %c240 = arith.constant 240 : index
    %c0_97 = arith.constant 0 : index
    %147 = vector.load %arg10[%c240, %c0_97] : memref<736x512xbf16, #tpu.memory_space<vmem>>, vector<8x512xbf16>
    tpu.vector_store %arg10[%c240, %c0_97], %146 {strides = array<i32>} : memref<736x512xbf16, #tpu.memory_space<vmem>>, vector<8x512xbf16>,
    %c497_i32_98 = arith.constant 497 : i32
    %148 = tpu.dynamic_rotate %115 by %c497_i32_98 dim 1 : vector<8x512xf32>, i32 -> vector<8x512xf32>
    %c6_99 = arith.constant 6 : index
    %c0_100 = arith.constant 0 : index
    %149 = vector.load %arg1[%c6_99, %c0_100] : memref<9x512xf32, #tpu.memory_space<vmem>>, vector<1x512xf32>
    %150 = vector.broadcast %149 : vector<1x512xf32> to vector<8x512xf32>
    %151 = arith.mulf %148, %150 : vector<8x512xf32>
    %152 = arith.truncf %151 : vector<8x512xf32> to vector<8x512xbf16>
    %c256 = arith.constant 256 : index
    %c0_101 = arith.constant 0 : index
    %153 = vector.load %arg10[%c256, %c0_101] : memref<736x512xbf16, #tpu.memory_space<vmem>>, vector<8x512xbf16>
    tpu.vector_store %arg10[%c256, %c0_101], %152 {strides = array<i32>} : memref<736x512xbf16, #tpu.memory_space<vmem>>, vector<8x512xbf16>,
    %c496_i32_102 = arith.constant 496 : i32
    %154 = tpu.dynamic_rotate %115 by %c496_i32_102 dim 1 : vector<8x512xf32>, i32 -> vector<8x512xf32>
    %c7_103 = arith.constant 7 : index
    %c0_104 = arith.constant 0 : index
    %155 = vector.load %arg1[%c7_103, %c0_104] : memref<9x512xf32, #tpu.memory_space<vmem>>, vector<1x512xf32>
    %156 = vector.broadcast %155 : vector<1x512xf32> to vector<8x512xf32>
    %157 = arith.mulf %154, %156 : vector<8x512xf32>
    %158 = arith.truncf %157 : vector<8x512xf32> to vector<8x512xbf16>
    %c272 = arith.constant 272 : index
    %c0_105 = arith.constant 0 : index
    %159 = vector.load %arg10[%c272, %c0_105] : memref<736x512xbf16, #tpu.memory_space<vmem>>, vector<8x512xbf16>
    tpu.vector_store %arg10[%c272, %c0_105], %158 {strides = array<i32>} : memref<736x512xbf16, #tpu.memory_space<vmem>>, vector<8x512xbf16>,
    %c495_i32_106 = arith.constant 495 : i32
    %160 = tpu.dynamic_rotate %115 by %c495_i32_106 dim 1 : vector<8x512xf32>, i32 -> vector<8x512xf32>
    %c8_107 = arith.constant 8 : index
    %c0_108 = arith.constant 0 : index
    %161 = vector.load %arg1[%c8_107, %c0_108] : memref<9x512xf32, #tpu.memory_space<vmem>>, vector<1x512xf32>
    %162 = vector.broadcast %161 : vector<1x512xf32> to vector<8x512xf32>
    %163 = arith.mulf %160, %162 : vector<8x512xf32>
    %164 = arith.truncf %163 : vector<8x512xf32> to vector<8x512xbf16>
    %c288 = arith.constant 288 : index
    %c0_109 = arith.constant 0 : index
    %165 = vector.load %arg10[%c288, %c0_109] : memref<736x512xbf16, #tpu.memory_space<vmem>>, vector<8x512xbf16>
    tpu.vector_store %arg10[%c288, %c0_109], %164 {strides = array<i32>} : memref<736x512xbf16, #tpu.memory_space<vmem>>, vector<8x512xbf16>,
    %c0_110 = arith.constant 0 : index
    %c0_111 = arith.constant 0 : index
    %166 = vector.load %arg4[%c0_110, %c0_111] : memref<8x304xbf16, #tpu.memory_space<vmem>>, vector<8x304xbf16>
    %c0_112 = arith.constant 0 : index
    %c0_113 = arith.constant 0 : index
    %167 = vector.load %arg10[%c0_112, %c0_113] : memref<736x512xbf16, #tpu.memory_space<vmem>>, vector<304x512xbf16>
    %cst_114 = arith.constant dense<0.000000e+00> : vector<8x512xf32>
    %168 = tpu.matmul %166, %167, %cst_114 {dimension_numbers = #tpu.dot_dimension_numbers<[1], [0], [0], [1], [0, 0, 1, 1], [], []>} : vector<8x304xbf16>, vector<304x512xbf16>, vector<8x512xf32> -> vector<8x512xf32>
    %cst_115 = arith.constant 0.000000e+00 : f32
    %169 = vector.broadcast %cst_115 : f32 to vector<8x512xf32>
    %170 = arith.cmpf ogt, %168, %169 : vector<8x512xf32>
    %cst_116 = arith.constant 2.000000e-01 : f32
    %171 = vector.broadcast %cst_116 : f32 to vector<8x512xf32>
    %172 = arith.mulf %171, %168 : vector<8x512xf32>
    %173 = arith.select %170, %168, %172 : vector<8x512xi1>, vector<8x512xf32>
    %c17_i32_117 = arith.constant 17 : i32
    %174 = tpu.dynamic_rotate %173 by %c17_i32_117 dim 1 : vector<8x512xf32>, i32 -> vector<8x512xf32>
    %c0_118 = arith.constant 0 : index
    %c0_119 = arith.constant 0 : index
    %175 = vector.load %arg1[%c0_118, %c0_119] : memref<9x512xf32, #tpu.memory_space<vmem>>, vector<1x512xf32>
    %176 = vector.broadcast %175 : vector<1x512xf32> to vector<8x512xf32>
    %177 = arith.mulf %174, %176 : vector<8x512xf32>
    %178 = arith.truncf %177 : vector<8x512xf32> to vector<8x512xbf16>
    %c304 = arith.constant 304 : index
    %c0_120 = arith.constant 0 : index
    %179 = vector.load %arg10[%c304, %c0_120] : memref<736x512xbf16, #tpu.memory_space<vmem>>, vector<8x512xbf16>
    tpu.vector_store %arg10[%c304, %c0_120], %178 {strides = array<i32>} : memref<736x512xbf16, #tpu.memory_space<vmem>>, vector<8x512xbf16>,
    %c16_i32_121 = arith.constant 16 : i32
    %180 = tpu.dynamic_rotate %173 by %c16_i32_121 dim 1 : vector<8x512xf32>, i32 -> vector<8x512xf32>
    %c1_122 = arith.constant 1 : index
    %c0_123 = arith.constant 0 : index
    %181 = vector.load %arg1[%c1_122, %c0_123] : memref<9x512xf32, #tpu.memory_space<vmem>>, vector<1x512xf32>
    %182 = vector.broadcast %181 : vector<1x512xf32> to vector<8x512xf32>
    %183 = arith.mulf %180, %182 : vector<8x512xf32>
    %184 = arith.truncf %183 : vector<8x512xf32> to vector<8x512xbf16>
    %c320 = arith.constant 320 : index
    %c0_124 = arith.constant 0 : index
    %185 = vector.load %arg10[%c320, %c0_124] : memref<736x512xbf16, #tpu.memory_space<vmem>>, vector<8x512xbf16>
    tpu.vector_store %arg10[%c320, %c0_124], %184 {strides = array<i32>} : memref<736x512xbf16, #tpu.memory_space<vmem>>, vector<8x512xbf16>,
    %c15_i32_125 = arith.constant 15 : i32
    %186 = tpu.dynamic_rotate %173 by %c15_i32_125 dim 1 : vector<8x512xf32>, i32 -> vector<8x512xf32>
    %c2_126 = arith.constant 2 : index
    %c0_127 = arith.constant 0 : index
    %187 = vector.load %arg1[%c2_126, %c0_127] : memref<9x512xf32, #tpu.memory_space<vmem>>, vector<1x512xf32>
    %188 = vector.broadcast %187 : vector<1x512xf32> to vector<8x512xf32>
    %189 = arith.mulf %186, %188 : vector<8x512xf32>
    %190 = arith.truncf %189 : vector<8x512xf32> to vector<8x512xbf16>
    %c336 = arith.constant 336 : index
    %c0_128 = arith.constant 0 : index
    %191 = vector.load %arg10[%c336, %c0_128] : memref<736x512xbf16, #tpu.memory_space<vmem>>, vector<8x512xbf16>
    tpu.vector_store %arg10[%c336, %c0_128], %190 {strides = array<i32>} : memref<736x512xbf16, #tpu.memory_space<vmem>>, vector<8x512xbf16>,
    %c1_i32_129 = arith.constant 1 : i32
    %192 = tpu.dynamic_rotate %173 by %c1_i32_129 dim 1 : vector<8x512xf32>, i32 -> vector<8x512xf32>
    %c3_130 = arith.constant 3 : index
    %c0_131 = arith.constant 0 : index
    %193 = vector.load %arg1[%c3_130, %c0_131] : memref<9x512xf32, #tpu.memory_space<vmem>>, vector<1x512xf32>
    %194 = vector.broadcast %193 : vector<1x512xf32> to vector<8x512xf32>
    %195 = arith.mulf %192, %194 : vector<8x512xf32>
    %196 = arith.truncf %195 : vector<8x512xf32> to vector<8x512xbf16>
    %c352 = arith.constant 352 : index
    %c0_132 = arith.constant 0 : index
    %197 = vector.load %arg10[%c352, %c0_132] : memref<736x512xbf16, #tpu.memory_space<vmem>>, vector<8x512xbf16>
    tpu.vector_store %arg10[%c352, %c0_132], %196 {strides = array<i32>} : memref<736x512xbf16, #tpu.memory_space<vmem>>, vector<8x512xbf16>,
    %198 = arith.truncf %173 : vector<8x512xf32> to vector<8x512xbf16>
    %c368 = arith.constant 368 : index
    %c0_133 = arith.constant 0 : index
    %199 = vector.load %arg10[%c368, %c0_133] : memref<736x512xbf16, #tpu.memory_space<vmem>>, vector<8x512xbf16>
    tpu.vector_store %arg10[%c368, %c0_133], %198 {strides = array<i32>} : memref<736x512xbf16, #tpu.memory_space<vmem>>, vector<8x512xbf16>,
    %c511_i32_134 = arith.constant 511 : i32
    %200 = tpu.dynamic_rotate %173 by %c511_i32_134 dim 1 : vector<8x512xf32>, i32 -> vector<8x512xf32>
    %c5_135 = arith.constant 5 : index
    %c0_136 = arith.constant 0 : index
    %201 = vector.load %arg1[%c5_135, %c0_136] : memref<9x512xf32, #tpu.memory_space<vmem>>, vector<1x512xf32>
    %202 = vector.broadcast %201 : vector<1x512xf32> to vector<8x512xf32>
    %203 = arith.mulf %200, %202 : vector<8x512xf32>
    %204 = arith.truncf %203 : vector<8x512xf32> to vector<8x512xbf16>
    %c384 = arith.constant 384 : index
    %c0_137 = arith.constant 0 : index
    %205 = vector.load %arg10[%c384, %c0_137] : memref<736x512xbf16, #tpu.memory_space<vmem>>, vector<8x512xbf16>
    tpu.vector_store %arg10[%c384, %c0_137], %204 {strides = array<i32>} : memref<736x512xbf16, #tpu.memory_space<vmem>>, vector<8x512xbf16>,
    %c497_i32_138 = arith.constant 497 : i32
    %206 = tpu.dynamic_rotate %173 by %c497_i32_138 dim 1 : vector<8x512xf32>, i32 -> vector<8x512xf32>
    %c6_139 = arith.constant 6 : index
    %c0_140 = arith.constant 0 : index
    %207 = vector.load %arg1[%c6_139, %c0_140] : memref<9x512xf32, #tpu.memory_space<vmem>>, vector<1x512xf32>
    %208 = vector.broadcast %207 : vector<1x512xf32> to vector<8x512xf32>
    %209 = arith.mulf %206, %208 : vector<8x512xf32>
    %210 = arith.truncf %209 : vector<8x512xf32> to vector<8x512xbf16>
    %c400 = arith.constant 400 : index
    %c0_141 = arith.constant 0 : index
    %211 = vector.load %arg10[%c400, %c0_141] : memref<736x512xbf16, #tpu.memory_space<vmem>>, vector<8x512xbf16>
    tpu.vector_store %arg10[%c400, %c0_141], %210 {strides = array<i32>} : memref<736x512xbf16, #tpu.memory_space<vmem>>, vector<8x512xbf16>,
    %c496_i32_142 = arith.constant 496 : i32
    %212 = tpu.dynamic_rotate %173 by %c496_i32_142 dim 1 : vector<8x512xf32>, i32 -> vector<8x512xf32>
    %c7_143 = arith.constant 7 : index
    %c0_144 = arith.constant 0 : index
    %213 = vector.load %arg1[%c7_143, %c0_144] : memref<9x512xf32, #tpu.memory_space<vmem>>, vector<1x512xf32>
    %214 = vector.broadcast %213 : vector<1x512xf32> to vector<8x512xf32>
    %215 = arith.mulf %212, %214 : vector<8x512xf32>
    %216 = arith.truncf %215 : vector<8x512xf32> to vector<8x512xbf16>
    %c416 = arith.constant 416 : index
    %c0_145 = arith.constant 0 : index
    %217 = vector.load %arg10[%c416, %c0_145] : memref<736x512xbf16, #tpu.memory_space<vmem>>, vector<8x512xbf16>
    tpu.vector_store %arg10[%c416, %c0_145], %216 {strides = array<i32>} : memref<736x512xbf16, #tpu.memory_space<vmem>>, vector<8x512xbf16>,
    %c495_i32_146 = arith.constant 495 : i32
    %218 = tpu.dynamic_rotate %173 by %c495_i32_146 dim 1 : vector<8x512xf32>, i32 -> vector<8x512xf32>
    %c8_147 = arith.constant 8 : index
    %c0_148 = arith.constant 0 : index
    %219 = vector.load %arg1[%c8_147, %c0_148] : memref<9x512xf32, #tpu.memory_space<vmem>>, vector<1x512xf32>
    %220 = vector.broadcast %219 : vector<1x512xf32> to vector<8x512xf32>
    %221 = arith.mulf %218, %220 : vector<8x512xf32>
    %222 = arith.truncf %221 : vector<8x512xf32> to vector<8x512xbf16>
    %c432 = arith.constant 432 : index
    %c0_149 = arith.constant 0 : index
    %223 = vector.load %arg10[%c432, %c0_149] : memref<736x512xbf16, #tpu.memory_space<vmem>>, vector<8x512xbf16>
    tpu.vector_store %arg10[%c432, %c0_149], %222 {strides = array<i32>} : memref<736x512xbf16, #tpu.memory_space<vmem>>, vector<8x512xbf16>,
    %c0_150 = arith.constant 0 : index
    %c0_151 = arith.constant 0 : index
    %224 = vector.load %arg5[%c0_150, %c0_151] : memref<8x448xbf16, #tpu.memory_space<vmem>>, vector<8x448xbf16>
    %c0_152 = arith.constant 0 : index
    %c0_153 = arith.constant 0 : index
    %225 = vector.load %arg10[%c0_152, %c0_153] : memref<736x512xbf16, #tpu.memory_space<vmem>>, vector<448x512xbf16>
    %cst_154 = arith.constant dense<0.000000e+00> : vector<8x512xf32>
    %226 = tpu.matmul %224, %225, %cst_154 {dimension_numbers = #tpu.dot_dimension_numbers<[1], [0], [0], [1], [0, 0, 1, 1], [], []>} : vector<8x448xbf16>, vector<448x512xbf16>, vector<8x512xf32> -> vector<8x512xf32>
    %cst_155 = arith.constant 0.000000e+00 : f32
    %227 = vector.broadcast %cst_155 : f32 to vector<8x512xf32>
    %228 = arith.cmpf ogt, %226, %227 : vector<8x512xf32>
    %cst_156 = arith.constant 2.000000e-01 : f32
    %229 = vector.broadcast %cst_156 : f32 to vector<8x512xf32>
    %230 = arith.mulf %229, %226 : vector<8x512xf32>
    %231 = arith.select %228, %226, %230 : vector<8x512xi1>, vector<8x512xf32>
    %c17_i32_157 = arith.constant 17 : i32
    %232 = tpu.dynamic_rotate %231 by %c17_i32_157 dim 1 : vector<8x512xf32>, i32 -> vector<8x512xf32>
    %c0_158 = arith.constant 0 : index
    %c0_159 = arith.constant 0 : index
    %233 = vector.load %arg1[%c0_158, %c0_159] : memref<9x512xf32, #tpu.memory_space<vmem>>, vector<1x512xf32>
    %234 = vector.broadcast %233 : vector<1x512xf32> to vector<8x512xf32>
    %235 = arith.mulf %232, %234 : vector<8x512xf32>
    %236 = arith.truncf %235 : vector<8x512xf32> to vector<8x512xbf16>
    %c448 = arith.constant 448 : index
    %c0_160 = arith.constant 0 : index
    %237 = vector.load %arg10[%c448, %c0_160] : memref<736x512xbf16, #tpu.memory_space<vmem>>, vector<8x512xbf16>
    tpu.vector_store %arg10[%c448, %c0_160], %236 {strides = array<i32>} : memref<736x512xbf16, #tpu.memory_space<vmem>>, vector<8x512xbf16>,
    %c16_i32_161 = arith.constant 16 : i32
    %238 = tpu.dynamic_rotate %231 by %c16_i32_161 dim 1 : vector<8x512xf32>, i32 -> vector<8x512xf32>
    %c1_162 = arith.constant 1 : index
    %c0_163 = arith.constant 0 : index
    %239 = vector.load %arg1[%c1_162, %c0_163] : memref<9x512xf32, #tpu.memory_space<vmem>>, vector<1x512xf32>
    %240 = vector.broadcast %239 : vector<1x512xf32> to vector<8x512xf32>
    %241 = arith.mulf %238, %240 : vector<8x512xf32>
    %242 = arith.truncf %241 : vector<8x512xf32> to vector<8x512xbf16>
    %c464 = arith.constant 464 : index
    %c0_164 = arith.constant 0 : index
    %243 = vector.load %arg10[%c464, %c0_164] : memref<736x512xbf16, #tpu.memory_space<vmem>>, vector<8x512xbf16>
    tpu.vector_store %arg10[%c464, %c0_164], %242 {strides = array<i32>} : memref<736x512xbf16, #tpu.memory_space<vmem>>, vector<8x512xbf16>,
    %c15_i32_165 = arith.constant 15 : i32
    %244 = tpu.dynamic_rotate %231 by %c15_i32_165 dim 1 : vector<8x512xf32>, i32 -> vector<8x512xf32>
    %c2_166 = arith.constant 2 : index
    %c0_167 = arith.constant 0 : index
    %245 = vector.load %arg1[%c2_166, %c0_167] : memref<9x512xf32, #tpu.memory_space<vmem>>, vector<1x512xf32>
    %246 = vector.broadcast %245 : vector<1x512xf32> to vector<8x512xf32>
    %247 = arith.mulf %244, %246 : vector<8x512xf32>
    %248 = arith.truncf %247 : vector<8x512xf32> to vector<8x512xbf16>
    %c480 = arith.constant 480 : index
    %c0_168 = arith.constant 0 : index
    %249 = vector.load %arg10[%c480, %c0_168] : memref<736x512xbf16, #tpu.memory_space<vmem>>, vector<8x512xbf16>
    tpu.vector_store %arg10[%c480, %c0_168], %248 {strides = array<i32>} : memref<736x512xbf16, #tpu.memory_space<vmem>>, vector<8x512xbf16>,
    %c1_i32_169 = arith.constant 1 : i32
    %250 = tpu.dynamic_rotate %231 by %c1_i32_169 dim 1 : vector<8x512xf32>, i32 -> vector<8x512xf32>
    %c3_170 = arith.constant 3 : index
    %c0_171 = arith.constant 0 : index
    %251 = vector.load %arg1[%c3_170, %c0_171] : memref<9x512xf32, #tpu.memory_space<vmem>>, vector<1x512xf32>
    %252 = vector.broadcast %251 : vector<1x512xf32> to vector<8x512xf32>
    %253 = arith.mulf %250, %252 : vector<8x512xf32>
    %254 = arith.truncf %253 : vector<8x512xf32> to vector<8x512xbf16>
    %c496 = arith.constant 496 : index
    %c0_172 = arith.constant 0 : index
    %255 = vector.load %arg10[%c496, %c0_172] : memref<736x512xbf16, #tpu.memory_space<vmem>>, vector<8x512xbf16>
    tpu.vector_store %arg10[%c496, %c0_172], %254 {strides = array<i32>} : memref<736x512xbf16, #tpu.memory_space<vmem>>, vector<8x512xbf16>,
    %256 = arith.truncf %231 : vector<8x512xf32> to vector<8x512xbf16>
    %c512 = arith.constant 512 : index
    %c0_173 = arith.constant 0 : index
    %257 = vector.load %arg10[%c512, %c0_173] : memref<736x512xbf16, #tpu.memory_space<vmem>>, vector<8x512xbf16>
    tpu.vector_store %arg10[%c512, %c0_173], %256 {strides = array<i32>} : memref<736x512xbf16, #tpu.memory_space<vmem>>, vector<8x512xbf16>,
    %c511_i32_174 = arith.constant 511 : i32
    %258 = tpu.dynamic_rotate %231 by %c511_i32_174 dim 1 : vector<8x512xf32>, i32 -> vector<8x512xf32>
    %c5_175 = arith.constant 5 : index
    %c0_176 = arith.constant 0 : index
    %259 = vector.load %arg1[%c5_175, %c0_176] : memref<9x512xf32, #tpu.memory_space<vmem>>, vector<1x512xf32>
    %260 = vector.broadcast %259 : vector<1x512xf32> to vector<8x512xf32>
    %261 = arith.mulf %258, %260 : vector<8x512xf32>
    %262 = arith.truncf %261 : vector<8x512xf32> to vector<8x512xbf16>
    %c528 = arith.constant 528 : index
    %c0_177 = arith.constant 0 : index
    %263 = vector.load %arg10[%c528, %c0_177] : memref<736x512xbf16, #tpu.memory_space<vmem>>, vector<8x512xbf16>
    tpu.vector_store %arg10[%c528, %c0_177], %262 {strides = array<i32>} : memref<736x512xbf16, #tpu.memory_space<vmem>>, vector<8x512xbf16>,
    %c497_i32_178 = arith.constant 497 : i32
    %264 = tpu.dynamic_rotate %231 by %c497_i32_178 dim 1 : vector<8x512xf32>, i32 -> vector<8x512xf32>
    %c6_179 = arith.constant 6 : index
    %c0_180 = arith.constant 0 : index
    %265 = vector.load %arg1[%c6_179, %c0_180] : memref<9x512xf32, #tpu.memory_space<vmem>>, vector<1x512xf32>
    %266 = vector.broadcast %265 : vector<1x512xf32> to vector<8x512xf32>
    %267 = arith.mulf %264, %266 : vector<8x512xf32>
    %268 = arith.truncf %267 : vector<8x512xf32> to vector<8x512xbf16>
    %c544 = arith.constant 544 : index
    %c0_181 = arith.constant 0 : index
    %269 = vector.load %arg10[%c544, %c0_181] : memref<736x512xbf16, #tpu.memory_space<vmem>>, vector<8x512xbf16>
    tpu.vector_store %arg10[%c544, %c0_181], %268 {strides = array<i32>} : memref<736x512xbf16, #tpu.memory_space<vmem>>, vector<8x512xbf16>,
    %c496_i32_182 = arith.constant 496 : i32
    %270 = tpu.dynamic_rotate %231 by %c496_i32_182 dim 1 : vector<8x512xf32>, i32 -> vector<8x512xf32>
    %c7_183 = arith.constant 7 : index
    %c0_184 = arith.constant 0 : index
    %271 = vector.load %arg1[%c7_183, %c0_184] : memref<9x512xf32, #tpu.memory_space<vmem>>, vector<1x512xf32>
    %272 = vector.broadcast %271 : vector<1x512xf32> to vector<8x512xf32>
    %273 = arith.mulf %270, %272 : vector<8x512xf32>
    %274 = arith.truncf %273 : vector<8x512xf32> to vector<8x512xbf16>
    %c560 = arith.constant 560 : index
    %c0_185 = arith.constant 0 : index
    %275 = vector.load %arg10[%c560, %c0_185] : memref<736x512xbf16, #tpu.memory_space<vmem>>, vector<8x512xbf16>
    tpu.vector_store %arg10[%c560, %c0_185], %274 {strides = array<i32>} : memref<736x512xbf16, #tpu.memory_space<vmem>>, vector<8x512xbf16>,
    %c495_i32_186 = arith.constant 495 : i32
    %276 = tpu.dynamic_rotate %231 by %c495_i32_186 dim 1 : vector<8x512xf32>, i32 -> vector<8x512xf32>
    %c8_187 = arith.constant 8 : index
    %c0_188 = arith.constant 0 : index
    %277 = vector.load %arg1[%c8_187, %c0_188] : memref<9x512xf32, #tpu.memory_space<vmem>>, vector<1x512xf32>
    %278 = vector.broadcast %277 : vector<1x512xf32> to vector<8x512xf32>
    %279 = arith.mulf %276, %278 : vector<8x512xf32>
    %280 = arith.truncf %279 : vector<8x512xf32> to vector<8x512xbf16>
    %c576 = arith.constant 576 : index
    %c0_189 = arith.constant 0 : index
    %281 = vector.load %arg10[%c576, %c0_189] : memref<736x512xbf16, #tpu.memory_space<vmem>>, vector<8x512xbf16>
    tpu.vector_store %arg10[%c576, %c0_189], %280 {strides = array<i32>} : memref<736x512xbf16, #tpu.memory_space<vmem>>, vector<8x512xbf16>,
    %c0_190 = arith.constant 0 : index
    %c0_191 = arith.constant 0 : index
    %282 = vector.load %arg6[%c0_190, %c0_191] : memref<8x592xbf16, #tpu.memory_space<vmem>>, vector<8x592xbf16>
    %c0_192 = arith.constant 0 : index
    %c0_193 = arith.constant 0 : index
    %283 = vector.load %arg10[%c0_192, %c0_193] : memref<736x512xbf16, #tpu.memory_space<vmem>>, vector<592x512xbf16>
    %cst_194 = arith.constant dense<0.000000e+00> : vector<8x512xf32>
    %284 = tpu.matmul %282, %283, %cst_194 {dimension_numbers = #tpu.dot_dimension_numbers<[1], [0], [0], [1], [0, 0, 1, 1], [], []>} : vector<8x592xbf16>, vector<592x512xbf16>, vector<8x512xf32> -> vector<8x512xf32>
    %cst_195 = arith.constant 0.000000e+00 : f32
    %285 = vector.broadcast %cst_195 : f32 to vector<8x512xf32>
    %286 = arith.cmpf ogt, %284, %285 : vector<8x512xf32>
    %cst_196 = arith.constant 2.000000e-01 : f32
    %287 = vector.broadcast %cst_196 : f32 to vector<8x512xf32>
    %288 = arith.mulf %287, %284 : vector<8x512xf32>
    %289 = arith.select %286, %284, %288 : vector<8x512xi1>, vector<8x512xf32>
    %c17_i32_197 = arith.constant 17 : i32
    %290 = tpu.dynamic_rotate %289 by %c17_i32_197 dim 1 : vector<8x512xf32>, i32 -> vector<8x512xf32>
    %c0_198 = arith.constant 0 : index
    %c0_199 = arith.constant 0 : index
    %291 = vector.load %arg1[%c0_198, %c0_199] : memref<9x512xf32, #tpu.memory_space<vmem>>, vector<1x512xf32>
    %292 = vector.broadcast %291 : vector<1x512xf32> to vector<8x512xf32>
    %293 = arith.mulf %290, %292 : vector<8x512xf32>
    %294 = arith.truncf %293 : vector<8x512xf32> to vector<8x512xbf16>
    %c592 = arith.constant 592 : index
    %c0_200 = arith.constant 0 : index
    %295 = vector.load %arg10[%c592, %c0_200] : memref<736x512xbf16, #tpu.memory_space<vmem>>, vector<8x512xbf16>
    tpu.vector_store %arg10[%c592, %c0_200], %294 {strides = array<i32>} : memref<736x512xbf16, #tpu.memory_space<vmem>>, vector<8x512xbf16>,
    %c16_i32_201 = arith.constant 16 : i32
    %296 = tpu.dynamic_rotate %289 by %c16_i32_201 dim 1 : vector<8x512xf32>, i32 -> vector<8x512xf32>
    %c1_202 = arith.constant 1 : index
    %c0_203 = arith.constant 0 : index
    %297 = vector.load %arg1[%c1_202, %c0_203] : memref<9x512xf32, #tpu.memory_space<vmem>>, vector<1x512xf32>
    %298 = vector.broadcast %297 : vector<1x512xf32> to vector<8x512xf32>
    %299 = arith.mulf %296, %298 : vector<8x512xf32>
    %300 = arith.truncf %299 : vector<8x512xf32> to vector<8x512xbf16>
    %c608 = arith.constant 608 : index
    %c0_204 = arith.constant 0 : index
    %301 = vector.load %arg10[%c608, %c0_204] : memref<736x512xbf16, #tpu.memory_space<vmem>>, vector<8x512xbf16>
    tpu.vector_store %arg10[%c608, %c0_204], %300 {strides = array<i32>} : memref<736x512xbf16, #tpu.memory_space<vmem>>, vector<8x512xbf16>,
    %c15_i32_205 = arith.constant 15 : i32
    %302 = tpu.dynamic_rotate %289 by %c15_i32_205 dim 1 : vector<8x512xf32>, i32 -> vector<8x512xf32>
    %c2_206 = arith.constant 2 : index
    %c0_207 = arith.constant 0 : index
    %303 = vector.load %arg1[%c2_206, %c0_207] : memref<9x512xf32, #tpu.memory_space<vmem>>, vector<1x512xf32>
    %304 = vector.broadcast %303 : vector<1x512xf32> to vector<8x512xf32>
    %305 = arith.mulf %302, %304 : vector<8x512xf32>
    %306 = arith.truncf %305 : vector<8x512xf32> to vector<8x512xbf16>
    %c624 = arith.constant 624 : index
    %c0_208 = arith.constant 0 : index
    %307 = vector.load %arg10[%c624, %c0_208] : memref<736x512xbf16, #tpu.memory_space<vmem>>, vector<8x512xbf16>
    tpu.vector_store %arg10[%c624, %c0_208], %306 {strides = array<i32>} : memref<736x512xbf16, #tpu.memory_space<vmem>>, vector<8x512xbf16>,
    %c1_i32_209 = arith.constant 1 : i32
    %308 = tpu.dynamic_rotate %289 by %c1_i32_209 dim 1 : vector<8x512xf32>, i32 -> vector<8x512xf32>
    %c3_210 = arith.constant 3 : index
    %c0_211 = arith.constant 0 : index
    %309 = vector.load %arg1[%c3_210, %c0_211] : memref<9x512xf32, #tpu.memory_space<vmem>>, vector<1x512xf32>
    %310 = vector.broadcast %309 : vector<1x512xf32> to vector<8x512xf32>
    %311 = arith.mulf %308, %310 : vector<8x512xf32>
    %312 = arith.truncf %311 : vector<8x512xf32> to vector<8x512xbf16>
    %c640 = arith.constant 640 : index
    %c0_212 = arith.constant 0 : index
    %313 = vector.load %arg10[%c640, %c0_212] : memref<736x512xbf16, #tpu.memory_space<vmem>>, vector<8x512xbf16>
    tpu.vector_store %arg10[%c640, %c0_212], %312 {strides = array<i32>} : memref<736x512xbf16, #tpu.memory_space<vmem>>, vector<8x512xbf16>,
    %314 = arith.truncf %289 : vector<8x512xf32> to vector<8x512xbf16>
    %c656 = arith.constant 656 : index
    %c0_213 = arith.constant 0 : index
    %315 = vector.load %arg10[%c656, %c0_213] : memref<736x512xbf16, #tpu.memory_space<vmem>>, vector<8x512xbf16>
    tpu.vector_store %arg10[%c656, %c0_213], %314 {strides = array<i32>} : memref<736x512xbf16, #tpu.memory_space<vmem>>, vector<8x512xbf16>,
    %c511_i32_214 = arith.constant 511 : i32
    %316 = tpu.dynamic_rotate %289 by %c511_i32_214 dim 1 : vector<8x512xf32>, i32 -> vector<8x512xf32>
    %c5_215 = arith.constant 5 : index
    %c0_216 = arith.constant 0 : index
    %317 = vector.load %arg1[%c5_215, %c0_216] : memref<9x512xf32, #tpu.memory_space<vmem>>, vector<1x512xf32>
    %318 = vector.broadcast %317 : vector<1x512xf32> to vector<8x512xf32>
    %319 = arith.mulf %316, %318 : vector<8x512xf32>
    %320 = arith.truncf %319 : vector<8x512xf32> to vector<8x512xbf16>
    %c672 = arith.constant 672 : index
    %c0_217 = arith.constant 0 : index
    %321 = vector.load %arg10[%c672, %c0_217] : memref<736x512xbf16, #tpu.memory_space<vmem>>, vector<8x512xbf16>
    tpu.vector_store %arg10[%c672, %c0_217], %320 {strides = array<i32>} : memref<736x512xbf16, #tpu.memory_space<vmem>>, vector<8x512xbf16>,
    %c497_i32_218 = arith.constant 497 : i32
    %322 = tpu.dynamic_rotate %289 by %c497_i32_218 dim 1 : vector<8x512xf32>, i32 -> vector<8x512xf32>
    %c6_219 = arith.constant 6 : index
    %c0_220 = arith.constant 0 : index
    %323 = vector.load %arg1[%c6_219, %c0_220] : memref<9x512xf32, #tpu.memory_space<vmem>>, vector<1x512xf32>
    %324 = vector.broadcast %323 : vector<1x512xf32> to vector<8x512xf32>
    %325 = arith.mulf %322, %324 : vector<8x512xf32>
    %326 = arith.truncf %325 : vector<8x512xf32> to vector<8x512xbf16>
    %c688 = arith.constant 688 : index
    %c0_221 = arith.constant 0 : index
    %327 = vector.load %arg10[%c688, %c0_221] : memref<736x512xbf16, #tpu.memory_space<vmem>>, vector<8x512xbf16>
    tpu.vector_store %arg10[%c688, %c0_221], %326 {strides = array<i32>} : memref<736x512xbf16, #tpu.memory_space<vmem>>, vector<8x512xbf16>,
    %c496_i32_222 = arith.constant 496 : i32
    %328 = tpu.dynamic_rotate %289 by %c496_i32_222 dim 1 : vector<8x512xf32>, i32 -> vector<8x512xf32>
    %c7_223 = arith.constant 7 : index
    %c0_224 = arith.constant 0 : index
    %329 = vector.load %arg1[%c7_223, %c0_224] : memref<9x512xf32, #tpu.memory_space<vmem>>, vector<1x512xf32>
    %330 = vector.broadcast %329 : vector<1x512xf32> to vector<8x512xf32>
    %331 = arith.mulf %328, %330 : vector<8x512xf32>
    %332 = arith.truncf %331 : vector<8x512xf32> to vector<8x512xbf16>
    %c704 = arith.constant 704 : index
    %c0_225 = arith.constant 0 : index
    %333 = vector.load %arg10[%c704, %c0_225] : memref<736x512xbf16, #tpu.memory_space<vmem>>, vector<8x512xbf16>
    tpu.vector_store %arg10[%c704, %c0_225], %332 {strides = array<i32>} : memref<736x512xbf16, #tpu.memory_space<vmem>>, vector<8x512xbf16>,
    %c495_i32_226 = arith.constant 495 : i32
    %334 = tpu.dynamic_rotate %289 by %c495_i32_226 dim 1 : vector<8x512xf32>, i32 -> vector<8x512xf32>
    %c8_227 = arith.constant 8 : index
    %c0_228 = arith.constant 0 : index
    %335 = vector.load %arg1[%c8_227, %c0_228] : memref<9x512xf32, #tpu.memory_space<vmem>>, vector<1x512xf32>
    %336 = vector.broadcast %335 : vector<1x512xf32> to vector<8x512xf32>
    %337 = arith.mulf %334, %336 : vector<8x512xf32>
    %338 = arith.truncf %337 : vector<8x512xf32> to vector<8x512xbf16>
    %c720 = arith.constant 720 : index
    %c0_229 = arith.constant 0 : index
    %339 = vector.load %arg10[%c720, %c0_229] : memref<736x512xbf16, #tpu.memory_space<vmem>>, vector<8x512xbf16>
    tpu.vector_store %arg10[%c720, %c0_229], %338 {strides = array<i32>} : memref<736x512xbf16, #tpu.memory_space<vmem>>, vector<8x512xbf16>,
    %c0_230 = arith.constant 0 : index
    %c0_231 = arith.constant 0 : index
    %340 = vector.load %arg7[%c0_230, %c0_231] : memref<4x736xbf16, #tpu.memory_space<vmem>>, vector<4x736xbf16>
    %c0_232 = arith.constant 0 : index
    %c0_233 = arith.constant 0 : index
    %341 = vector.load %arg10[%c0_232, %c0_233] : memref<736x512xbf16, #tpu.memory_space<vmem>>, vector<736x512xbf16>
    %cst_234 = arith.constant dense<0.000000e+00> : vector<4x512xf32>
    %342 = tpu.matmul %340, %341, %cst_234 {dimension_numbers = #tpu.dot_dimension_numbers<[1], [0], [0], [1], [0, 0, 1, 1], [], []>} : vector<4x736xbf16>, vector<736x512xbf16>, vector<4x512xf32> -> vector<4x512xf32>
    %cst_235 = arith.constant 2.000000e-01 : f32
    %343 = vector.broadcast %cst_235 : f32 to vector<4x512xf32>
    %344 = arith.mulf %342, %343 : vector<4x512xf32>
    %345 = arith.addf %344, %57 : vector<4x512xf32>
    %c17_i32_236 = arith.constant 17 : i32
    %346 = tpu.dynamic_rotate %345 by %c17_i32_236 dim 1 : vector<4x512xf32>, i32 -> vector<4x512xf32>
    %c0_237 = arith.constant 0 : index
    %c0_238 = arith.constant 0 : index
    %347 = vector.load %arg1[%c0_237, %c0_238] : memref<9x512xf32, #tpu.memory_space<vmem>>, vector<1x512xf32>
    %348 = vector.broadcast %347 : vector<1x512xf32> to vector<4x512xf32>
    %349 = arith.mulf %346, %348 : vector<4x512xf32>
    %350 = arith.truncf %349 : vector<4x512xf32> to vector<4x512xbf16>
    %c16_239 = arith.constant 16 : index
    %c0_240 = arith.constant 0 : index
    %351 = vector.load %arg10[%c16_239, %c0_240] : memref<736x512xbf16, #tpu.memory_space<vmem>>, vector<4x512xbf16>
    tpu.vector_store %arg10[%c16_239, %c0_240], %350 {strides = array<i32>} : memref<736x512xbf16, #tpu.memory_space<vmem>>, vector<4x512xbf16>,
    %c16_i32_241 = arith.constant 16 : i32
    %352 = tpu.dynamic_rotate %345 by %c16_i32_241 dim 1 : vector<4x512xf32>, i32 -> vector<4x512xf32>
    %c1_242 = arith.constant 1 : index
    %c0_243 = arith.constant 0 : index
    %353 = vector.load %arg1[%c1_242, %c0_243] : memref<9x512xf32, #tpu.memory_space<vmem>>, vector<1x512xf32>
    %354 = vector.broadcast %353 : vector<1x512xf32> to vector<4x512xf32>
    %355 = arith.mulf %352, %354 : vector<4x512xf32>
    %356 = arith.truncf %355 : vector<4x512xf32> to vector<4x512xbf16>
    %c32_244 = arith.constant 32 : index
    %c0_245 = arith.constant 0 : index
    %357 = vector.load %arg10[%c32_244, %c0_245] : memref<736x512xbf16, #tpu.memory_space<vmem>>, vector<4x512xbf16>
    tpu.vector_store %arg10[%c32_244, %c0_245], %356 {strides = array<i32>} : memref<736x512xbf16, #tpu.memory_space<vmem>>, vector<4x512xbf16>,
    %c15_i32_246 = arith.constant 15 : i32
    %358 = tpu.dynamic_rotate %345 by %c15_i32_246 dim 1 : vector<4x512xf32>, i32 -> vector<4x512xf32>
    %c2_247 = arith.constant 2 : index
    %c0_248 = arith.constant 0 : index
    %359 = vector.load %arg1[%c2_247, %c0_248] : memref<9x512xf32, #tpu.memory_space<vmem>>, vector<1x512xf32>
    %360 = vector.broadcast %359 : vector<1x512xf32> to vector<4x512xf32>
    %361 = arith.mulf %358, %360 : vector<4x512xf32>
    %362 = arith.truncf %361 : vector<4x512xf32> to vector<4x512xbf16>
    %c48_249 = arith.constant 48 : index
    %c0_250 = arith.constant 0 : index
    %363 = vector.load %arg10[%c48_249, %c0_250] : memref<736x512xbf16, #tpu.memory_space<vmem>>, vector<4x512xbf16>
    tpu.vector_store %arg10[%c48_249, %c0_250], %362 {strides = array<i32>} : memref<736x512xbf16, #tpu.memory_space<vmem>>, vector<4x512xbf16>,
    %c1_i32_251 = arith.constant 1 : i32
    %364 = tpu.dynamic_rotate %345 by %c1_i32_251 dim 1 : vector<4x512xf32>, i32 -> vector<4x512xf32>
    %c3_252 = arith.constant 3 : index
    %c0_253 = arith.constant 0 : index
    %365 = vector.load %arg1[%c3_252, %c0_253] : memref<9x512xf32, #tpu.memory_space<vmem>>, vector<1x512xf32>
    %366 = vector.broadcast %365 : vector<1x512xf32> to vector<4x512xf32>
    %367 = arith.mulf %364, %366 : vector<4x512xf32>
    %368 = arith.truncf %367 : vector<4x512xf32> to vector<4x512xbf16>
    %c64_254 = arith.constant 64 : index
    %c0_255 = arith.constant 0 : index
    %369 = vector.load %arg10[%c64_254, %c0_255] : memref<736x512xbf16, #tpu.memory_space<vmem>>, vector<4x512xbf16>
    tpu.vector_store %arg10[%c64_254, %c0_255], %368 {strides = array<i32>} : memref<736x512xbf16, #tpu.memory_space<vmem>>, vector<4x512xbf16>,
    %370 = arith.truncf %345 : vector<4x512xf32> to vector<4x512xbf16>
    %c80_256 = arith.constant 80 : index
    %c0_257 = arith.constant 0 : index
    %371 = vector.load %arg10[%c80_256, %c0_257] : memref<736x512xbf16, #tpu.memory_space<vmem>>, vector<4x512xbf16>
    tpu.vector_store %arg10[%c80_256, %c0_257], %370 {strides = array<i32>} : memref<736x512xbf16, #tpu.memory_space<vmem>>, vector<4x512xbf16>,
    %c511_i32_258 = arith.constant 511 : i32
    %372 = tpu.dynamic_rotate %345 by %c511_i32_258 dim 1 : vector<4x512xf32>, i32 -> vector<4x512xf32>
    %c5_259 = arith.constant 5 : index
    %c0_260 = arith.constant 0 : index
    %373 = vector.load %arg1[%c5_259, %c0_260] : memref<9x512xf32, #tpu.memory_space<vmem>>, vector<1x512xf32>
    %374 = vector.broadcast %373 : vector<1x512xf32> to vector<4x512xf32>
    %375 = arith.mulf %372, %374 : vector<4x512xf32>
    %376 = arith.truncf %375 : vector<4x512xf32> to vector<4x512xbf16>
    %c96_261 = arith.constant 96 : index
    %c0_262 = arith.constant 0 : index
    %377 = vector.load %arg10[%c96_261, %c0_262] : memref<736x512xbf16, #tpu.memory_space<vmem>>, vector<4x512xbf16>
    tpu.vector_store %arg10[%c96_261, %c0_262], %376 {strides = array<i32>} : memref<736x512xbf16, #tpu.memory_space<vmem>>, vector<4x512xbf16>,
    %c497_i32_263 = arith.constant 497 : i32
    %378 = tpu.dynamic_rotate %345 by %c497_i32_263 dim 1 : vector<4x512xf32>, i32 -> vector<4x512xf32>
    %c6_264 = arith.constant 6 : index
    %c0_265 = arith.constant 0 : index
    %379 = vector.load %arg1[%c6_264, %c0_265] : memref<9x512xf32, #tpu.memory_space<vmem>>, vector<1x512xf32>
    %380 = vector.broadcast %379 : vector<1x512xf32> to vector<4x512xf32>
    %381 = arith.mulf %378, %380 : vector<4x512xf32>
    %382 = arith.truncf %381 : vector<4x512xf32> to vector<4x512xbf16>
    %c112_266 = arith.constant 112 : index
    %c0_267 = arith.constant 0 : index
    %383 = vector.load %arg10[%c112_266, %c0_267] : memref<736x512xbf16, #tpu.memory_space<vmem>>, vector<4x512xbf16>
    tpu.vector_store %arg10[%c112_266, %c0_267], %382 {strides = array<i32>} : memref<736x512xbf16, #tpu.memory_space<vmem>>, vector<4x512xbf16>,
    %c496_i32_268 = arith.constant 496 : i32
    %384 = tpu.dynamic_rotate %345 by %c496_i32_268 dim 1 : vector<4x512xf32>, i32 -> vector<4x512xf32>
    %c7_269 = arith.constant 7 : index
    %c0_270 = arith.constant 0 : index
    %385 = vector.load %arg1[%c7_269, %c0_270] : memref<9x512xf32, #tpu.memory_space<vmem>>, vector<1x512xf32>
    %386 = vector.broadcast %385 : vector<1x512xf32> to vector<4x512xf32>
    %387 = arith.mulf %384, %386 : vector<4x512xf32>
    %388 = arith.truncf %387 : vector<4x512xf32> to vector<4x512xbf16>
    %c128_271 = arith.constant 128 : index
    %c0_272 = arith.constant 0 : index
    %389 = vector.load %arg10[%c128_271, %c0_272] : memref<736x512xbf16, #tpu.memory_space<vmem>>, vector<4x512xbf16>
    tpu.vector_store %arg10[%c128_271, %c0_272], %388 {strides = array<i32>} : memref<736x512xbf16, #tpu.memory_space<vmem>>, vector<4x512xbf16>,
    %c495_i32_273 = arith.constant 495 : i32
    %390 = tpu.dynamic_rotate %345 by %c495_i32_273 dim 1 : vector<4x512xf32>, i32 -> vector<4x512xf32>
    %c8_274 = arith.constant 8 : index
    %c0_275 = arith.constant 0 : index
    %391 = vector.load %arg1[%c8_274, %c0_275] : memref<9x512xf32, #tpu.memory_space<vmem>>, vector<1x512xf32>
    %392 = vector.broadcast %391 : vector<1x512xf32> to vector<4x512xf32>
    %393 = arith.mulf %390, %392 : vector<4x512xf32>
    %394 = arith.truncf %393 : vector<4x512xf32> to vector<4x512xbf16>
    %c144_276 = arith.constant 144 : index
    %c0_277 = arith.constant 0 : index
    %395 = vector.load %arg10[%c144_276, %c0_277] : memref<736x512xbf16, #tpu.memory_space<vmem>>, vector<4x512xbf16>
    tpu.vector_store %arg10[%c144_276, %c0_277], %394 {strides = array<i32>} : memref<736x512xbf16, #tpu.memory_space<vmem>>, vector<4x512xbf16>,
    %c0_278 = arith.constant 0 : index
    %c0_279 = arith.constant 0 : index
    %396 = vector.load %arg8[%c0_278, %c0_279] : memref<4x160xbf16, #tpu.memory_space<vmem>>, vector<4x160xbf16>
    %c0_280 = arith.constant 0 : index
    %c0_281 = arith.constant 0 : index
    %397 = vector.load %arg10[%c0_280, %c0_281] : memref<736x512xbf16, #tpu.memory_space<vmem>>, vector<160x512xbf16>
    %cst_282 = arith.constant dense<0.000000e+00> : vector<4x512xf32>
    %398 = tpu.matmul %396, %397, %cst_282 {dimension_numbers = #tpu.dot_dimension_numbers<[1], [0], [0], [1], [0, 0, 1, 1], [], []>} : vector<4x160xbf16>, vector<160x512xbf16>, vector<4x512xf32> -> vector<4x512xf32>
    %cst_283 = arith.constant 0.000000e+00 : f32
    %399 = vector.broadcast %cst_283 : f32 to vector<4x512xf32>
    %400 = arith.cmpf ogt, %398, %399 : vector<4x512xf32>
    %cst_284 = arith.constant 2.000000e-01 : f32
    %401 = vector.broadcast %cst_284 : f32 to vector<4x512xf32>
    %402 = arith.mulf %401, %398 : vector<4x512xf32>
    %403 = arith.select %400, %398, %402 : vector<4x512xi1>, vector<4x512xf32>
    %c0_285 = arith.constant 0 : index
    %c0_286 = arith.constant 0 : index
    %404 = vector.load %arg9[%c0_285, %c0_286] : memref<4x512xf32, #tpu.memory_space<vmem>>, vector<4x512xf32>
    tpu.vector_store %arg9[%c0_285, %c0_286], %403 {strides = array<i32>} : memref<4x512xf32, #tpu.memory_space<vmem>>, vector<4x512xf32>,
    return
  }
  func.func @transform_0(%arg0: i32) -> (i32, i32) {
    %c0_i32 = arith.constant 0 : i32
    %c0_i32_0 = arith.constant 0 : i32
    %c0_i32_1 = arith.constant 0 : i32
    return %c0_i32, %c0_i32_0 : i32, i32
  }
  func.func @transform_1(%arg0: i32) -> (i32, i32) {
    %c0_i32 = arith.constant 0 : i32
    %c0_i32_0 = arith.constant 0 : i32
    return %c0_i32, %arg0 : i32, i32
  }
  func.func @transform_2(%arg0: i32) -> (i32, i32) {
    %c0_i32 = arith.constant 0 : i32
    %c0_i32_0 = arith.constant 0 : i32
    %c0_i32_1 = arith.constant 0 : i32
    return %c0_i32, %c0_i32_0 : i32, i32
  }
  func.func @transform_3(%arg0: i32) -> (i32, i32) {
    %c0_i32 = arith.constant 0 : i32
    %c0_i32_0 = arith.constant 0 : i32
    %c0_i32_1 = arith.constant 0 : i32
    return %c0_i32, %c0_i32_0 : i32, i32
  }
  func.func @transform_4(%arg0: i32) -> (i32, i32) {
    %c0_i32 = arith.constant 0 : i32
    %c0_i32_0 = arith.constant 0 : i32
    %c0_i32_1 = arith.constant 0 : i32
    return %c0_i32, %c0_i32_0 : i32, i32
  }
  func.func @transform_5(%arg0: i32) -> (i32, i32) {
    %c0_i32 = arith.constant 0 : i32
    %c0_i32_0 = arith.constant 0 : i32
    %c0_i32_1 = arith.constant 0 : i32
    return %c0_i32, %c0_i32_0 : i32, i32
  }
  func.func @transform_6(%arg0: i32) -> (i32, i32) {
    %c0_i32 = arith.constant 0 : i32
    %c0_i32_0 = arith.constant 0 : i32
    %c0_i32_1 = arith.constant 0 : i32
    return %c0_i32, %c0_i32_0 : i32, i32
  }
  func.func @transform_7(%arg0: i32) -> (i32, i32) {
    %c0_i32 = arith.constant 0 : i32
    %c0_i32_0 = arith.constant 0 : i32
    %c0_i32_1 = arith.constant 0 : i32
    return %c0_i32, %c0_i32_0 : i32, i32
  }
  func.func @transform_8(%arg0: i32) -> (i32, i32) {
    %c0_i32 = arith.constant 0 : i32
    %c0_i32_0 = arith.constant 0 : i32
    return %c0_i32, %arg0 : i32, i32
  }
}

</mosaic_0001>

<bundles_post_ra>
// kernel: rdb5v2_forward_pallas.1
= control target key start
LH: loop header
LB: loop body
LE: loop exit
PB: predicated region body
PF: predicated region fallthrough
CT: control target
= control target key end

     0   :  { %v30_v0 = vlaneseq  ;;  %v6569_v3 = vmov 0   ;;  %s4467_s9 = smov 17   ;;  %v4468_v7 = vmov 0.0   ;;  %s4469_s10 = smov 16   ;;  %vm4470_vm1 = vmmov 1   ;;  %s6560_s1 = inlined_call_operand.vmem [shape: f32[4,512], index: 1, kind: input, shape index: {}]   ;;  %s6561_s2 = inlined_call_operand.vmem [shape: bf16[8,160], index: 2, kind: input, shape index: {}]   ;;  %s6562_s0 = inlined_call_operand.vmem [shape: f32[9,512], index: 0, kind: input, shape index: {}]   ;;  %s6563_s3 = inlined_call_operand.vmem [shape: bf16[8,304], index: 3, kind: input, shape index: {}]   ;;  %s6564_s4 = inlined_call_operand.vmem [shape: bf16[8,448], index: 4, kind: input, shape index: {}]   ;;  %s6565_s5 = inlined_call_operand.vmem [shape: bf16[8,592], index: 5, kind: input, shape index: {}]   ;;  %s6566_s6 = inlined_call_operand.vmem [shape: bf16[4,736], index: 6, kind: input, shape index: {}]   ;;  %s6567_s7 = inlined_call_operand.vmem [shape: bf16[4,160], index: 7, kind: input, shape index: {}]   ;;  %s6568_s8 = inlined_call_operand.vmem [shape: f32[4,512], index: 8, kind: output, shape index: {}]  }
   0x1   :  { %v4527_v1 = vld [vmem:[%s6560_s1 + $0x8] sm:$0xff]  ;;  %v4532_v2 = vld [vmem:[%s6560_s1] sm:$0xff]  ;;  %45 = vst [vmem:[#allocation2 + $0x28] sm:$0xfc] %v6569_v3  ;;  %44 = vst [vmem:[#allocation2 + $0x20] sm:$0xfc] %v6569_v3 }
   0x2   :  { %46 = vst [vmem:[#allocation2 + $0x30] sm:$0xfc] %v6569_v3  ;;  %47 = vst [vmem:[#allocation2 + $0x38] sm:$0xfc] %v6569_v3  ;;  %236 = vrot.lane.b32.xlu1 %v4527_v1, %s4467_s9  ;;  %232 = vrot.lane.b32.xlu0 %v4532_v2, %s4467_s9  ;;  %v4720_v4 = vcombine.high %v4527_v1, %v4527_v1  ;;  %v4724_v5 = vcombine.high %v4532_v2, %v4532_v2  ;;  %v4727_v6 = vshrl.u32 %v30_v0, 7  ;;  %v4471_v11 = vmov 1.0  }
   0x3   :  { %48 = vst [vmem:[#allocation2 + $0x40] sm:$0xfc] %v6569_v3  ;;  %49 = vst [vmem:[#allocation2 + $0x48] sm:$0xfc] %v6569_v3  ;;  %v4742_v12 = vpack.c.bf16 %v4468_v7, %v4471_v11  ;;  %s4472_s11 = smov 15   ;;  %s4473_s12 = smov 1   ;;  %v425_v15 = vpack.c.bf16 %v4532_v2, %v4532_v2  ;;  %v427_v16 = vpack.c.bf16 %v4527_v1, %v4527_v1 }
   0x4   :  { %50 = vst [vmem:[#allocation2 + $0x50] sm:$0xfc] %v6569_v3  ;;  %51 = vst [vmem:[#allocation2 + $0x58] sm:$0xfc] %v6569_v3  ;;  %vm33_vm0 = vcmp.eq.s32.totalorder %v4727_v6, 0  ;;  %v426_v13 = vpack.c.bf16 %v4724_v5, %v4724_v5  ;;  %v428_v14 = vpack.c.bf16 %v4720_v4, %v4720_v4  ;;  %s4474_s13 = smov 127  }
   0x5   :  { %52 = vst [vmem:[#allocation2 + $0x60] sm:$0xfc] %v6569_v3  ;;  %53 = vst [vmem:[#allocation2 + $0x68] sm:$0xfc] %v6569_v3  ;;  %v4293_v8 = vsel %vm33_vm0, 1.0, %v4468_v7  ;;  %s4475_s14 = smov 113  }
   0x6   :  { %54 = vst [vmem:[#allocation2 + $0x70] sm:$0xfc] %v6569_v3  ;;  %55 = vst [vmem:[#allocation2 + $0x78] sm:$0xfc] %v6569_v3  ;;  %238 = vrot.lane.b32.xlu1 %v4720_v4, %s4467_s9  ;;  %234 = vrot.lane.b32.xlu0 %v4724_v5, %s4467_s9  ;;  %v39_v9 = vpack.c.bf16 %v4468_v7, %v4293_v8  ;;  %s4476_s15 = smov 112   ;;  %s4477_s16 = smov 111  }
   0x7   :  { %56 = vst [vmem:[#allocation2 + $0x80] sm:$0xfc] %v6569_v3  ;;  %57 = vst [vmem:[#allocation2 + $0x88] sm:$0xfc] %v6569_v3  ;;  %v4819_v17 = vld [vmem:[%s6561_s2] sm:$0xff]  ;;  %vm672_vm3 = vcmask 261120  }
   0x8   :  { %58 = vst [vmem:[#allocation2 + $0x90] sm:$0xfc] %v6569_v3  ;;  %59 = vst [vmem:[#allocation2 + $0x98] sm:$0xfc] %v6569_v3  ;;  %v4302_v18 = vcombine.high %v4819_v17, %v4819_v17  ;;  %v4826_v19 = vand.u32 127, %v30_v0  ;;  %v4829_v20 = vsub.s32 0, %v4727_v6 }
   0x9   :  { %60 = vst [vmem:[#allocation2 + $0xa0] sm:$0xfc] %v6569_v3  ;;  %61 = vst [vmem:[#allocation2 + $0xa8] sm:$0xfc] %v6569_v3  ;;  %v4832_v21 = vsub.s32 3, %v4727_v6  ;;  %v4835_v22 = vsub.s32 1, %v4727_v6 }
   0xa   :  { %62 = vst [vmem:[#allocation2 + $0xb0] sm:$0xfc] %v6569_v3  ;;  %63 = vst [vmem:[#allocation2 + $0xb8] sm:$0xfc] %v6569_v3  ;;  %283 = vrot.lane.b32.xlu1 %v4724_v5, %s4469_s10  ;;  %281 = vrot.lane.b32.xlu0 %v4532_v2, %s4469_s10  ;;  %v4838_v23 = vsub.s32 2, %v4727_v6  ;;  %vm242_vm4 = vcmp.lt.s32.totalorder %v4826_v19, 17 }
   0xb   :  { %64 = vst [vmem:[#allocation2 + $0xc0] sm:$0xfc] %v6569_v3  ;;  %65 = vst [vmem:[#allocation2 + $0xc8] sm:$0xfc] %v6569_v3  ;;  %4303 = vmatprep.mubr.msk.bf16.mxu0 %vm672_vm3, %v4302_v18  ;;  %4304 = vmatprep.mubr.msk.bf16.mxu1 %vm672_vm3, %v4302_v18  ;;  %vm289_vm5 = vcmp.lt.s32.totalorder %v4826_v19, 16  ;;  %vm337_vm6 = vcmp.lt.s32.totalorder %v4826_v19, 15 }
   0xc   :  { %66 = vst [vmem:[#allocation2 + $0xd0] sm:$0xfc] %v6569_v3  ;;  %67 = vst [vmem:[#allocation2 + $0xd8] sm:$0xfc] %v6569_v3  ;;  %vm385_vm7 = vcmp.lt.s32.totalorder %v4826_v19, 1  ;;  %vm441_vm8 = vcmp.lt.s32.totalorder %v4826_v19, 127 }
   0xd   :  { %68 = vst [vmem:[#allocation2 + $0xe0] sm:$0xfc] %v6569_v3  ;;  %69 = vst [vmem:[#allocation2 + $0xe8] sm:$0xfc] %v6569_v3  ;;  %vm489_vm9 = vcmp.lt.s32.totalorder %v4826_v19, 113  ;;  %vm537_vm10 = vcmp.lt.s32.totalorder %v4826_v19, 112 }
   0xe   :  { %70 = vst [vmem:[#allocation2 + $0xf0] sm:$0xfc] %v6569_v3  ;;  %71 = vst [vmem:[#allocation2 + $0xf8] sm:$0xfc] %v6569_v3  ;;  %287 = vrot.lane.b32.xlu1 %v4720_v4, %s4469_s10  ;;  %285 = vrot.lane.b32.xlu0 %v4527_v1, %s4469_s10  ;;  %vm585_vm11 = vcmp.lt.s32.totalorder %v4826_v19, 111 }
   0xf   :  { %72 = vst [vmem:[#allocation2 + $0x100] sm:$0xfc] %v6569_v3  ;;  %73 = vst [vmem:[#allocation2 + $0x108] sm:$0xfc] %v6569_v3 }
  0x10   :  { %74 = vst [vmem:[#allocation2 + $0x110] sm:$0xfc] %v6569_v3  ;;  %75 = vst [vmem:[#allocation2 + $0x118] sm:$0xfc] %v6569_v3 }
  0x11   :  { %76 = vst [vmem:[#allocation2 + $0x120] sm:$0xfc] %v6569_v3  ;;  %77 = vst [vmem:[#allocation2 + $0x128] sm:$0xfc] %v6569_v3 }
  0x12   :  { %78 = vst [vmem:[#allocation2 + $0x130] sm:$0xfc] %v6569_v3  ;;  %79 = vst [vmem:[#allocation2 + $0x138] sm:$0xfc] %v6569_v3  ;;  %331 = vrot.lane.b32.xlu1 %v4724_v5, %s4472_s11  ;;  %329 = vrot.lane.b32.xlu0 %v4532_v2, %s4472_s11 }
  0x13   :  { %80 = vst [vmem:[#allocation2 + $0x140] sm:$0xf0] %v6569_v3  ;;  %81 = vst [vmem:[#allocation2 + $0x148] sm:$0xf0] %v6569_v3 }
  0x14   :  { %82 = vst [vmem:[#allocation2 + $0x150] sm:$0xf0] %v6569_v3  ;;  %83 = vst [vmem:[#allocation2 + $0x158] sm:$0xf0] %v6569_v3 }
  0x15   :  { %84 = vst [vmem:[#allocation2 + $0x160] sm:$0xf0] %v6569_v3  ;;  %85 = vst [vmem:[#allocation2 + $0x168] sm:$0xf0] %v6569_v3 }
  0x16   :  { %86 = vst [vmem:[#allocation2 + $0x170] sm:$0xf0] %v6569_v3  ;;  %87 = vst [vmem:[#allocation2 + $0x178] sm:$0xf0] %v6569_v3  ;;  %335 = vrot.lane.b32.xlu1 %v4720_v4, %s4472_s11  ;;  %333 = vrot.lane.b32.xlu0 %v4527_v1, %s4472_s11 }
  0x17   :  { %88 = vst [vmem:[#allocation2 + $0x180] sm:$0xf0] %v6569_v3  ;;  %89 = vst [vmem:[#allocation2 + $0x188] sm:$0xf0] %v6569_v3 }
  0x18   :  { %90 = vst [vmem:[#allocation2 + $0x190] sm:$0xf0] %v6569_v3  ;;  %91 = vst [vmem:[#allocation2 + $0x198] sm:$0xf0] %v6569_v3 }
  0x19   :  { %92 = vst [vmem:[#allocation2 + $0x1a0] sm:$0xf0] %v6569_v3  ;;  %93 = vst [vmem:[#allocation2 + $0x1a8] sm:$0xf0] %v6569_v3 }
  0x1a   :  { %94 = vst [vmem:[#allocation2 + $0x1b0] sm:$0xf0] %v6569_v3  ;;  %95 = vst [vmem:[#allocation2 + $0x1b8] sm:$0xf0] %v6569_v3  ;;  %379 = vrot.lane.b32.xlu1 %v4724_v5, %s4473_s12  ;;  %377 = vrot.lane.b32.xlu0 %v4532_v2, %s4473_s12 }
  0x1b   :  { %96 = vst [vmem:[#allocation2 + $0x1c0] sm:$0xf0] %v6569_v3  ;;  %97 = vst [vmem:[#allocation2 + $0x1c8] sm:$0xf0] %v6569_v3 }
  0x1c   :  { %98 = vst [vmem:[#allocation2 + $0x1d0] sm:$0xf0] %v6569_v3  ;;  %99 = vst [vmem:[#allocation2 + $0x1d8] sm:$0xf0] %v6569_v3 }
  0x1d   :  { %100 = vst [vmem:[#allocation2 + $0x1e0] sm:$0xf0] %v6569_v3  ;;  %101 = vst [vmem:[#allocation2 + $0x1e8] sm:$0xf0] %v6569_v3 }
  0x1e   :  { %102 = vst [vmem:[#allocation2 + $0x1f0] sm:$0xf0] %v6569_v3  ;;  %103 = vst [vmem:[#allocation2 + $0x1f8] sm:$0xf0] %v6569_v3  ;;  %383 = vrot.lane.b32.xlu1 %v4720_v4, %s4473_s12  ;;  %381 = vrot.lane.b32.xlu0 %v4527_v1, %s4473_s12 }
  0x1f   :  { %104 = vst [vmem:[#allocation2 + $0x200] sm:$0xf0] %v6569_v3  ;;  %105 = vst [vmem:[#allocation2 + $0x208] sm:$0xf0] %v6569_v3 }
  0x20   :  { %106 = vst [vmem:[#allocation2 + $0x210] sm:$0xf0] %v6569_v3  ;;  %107 = vst [vmem:[#allocation2 + $0x218] sm:$0xf0] %v6569_v3 }
  0x21   :  { %108 = vst [vmem:[#allocation2 + $0x220] sm:$0xf0] %v6569_v3  ;;  %109 = vst [vmem:[#allocation2 + $0x228] sm:$0xf0] %v6569_v3 }
  0x22   :  { %110 = vst [vmem:[#allocation2 + $0x230] sm:$0xf0] %v6569_v3  ;;  %111 = vst [vmem:[#allocation2 + $0x238] sm:$0xf0] %v6569_v3  ;;  %435 = vrot.lane.b32.xlu1 %v4724_v5, %s4474_s13  ;;  %433 = vrot.lane.b32.xlu0 %v4532_v2, %s4474_s13 }
  0x23   :  { %112 = vst [vmem:[#allocation2 + $0x240] sm:$0xf0] %v6569_v3  ;;  %113 = vst [vmem:[#allocation2 + $0x248] sm:$0xf0] %v6569_v3 }
  0x24   :  { %114 = vst [vmem:[#allocation2 + $0x250] sm:$0xf0] %v6569_v3  ;;  %115 = vst [vmem:[#allocation2 + $0x258] sm:$0xf0] %v6569_v3 }
  0x25   :  { %116 = vst [vmem:[#allocation2 + $0x260] sm:$0xf0] %v6569_v3  ;;  %117 = vst [vmem:[#allocation2 + $0x268] sm:$0xf0] %v6569_v3 }
  0x26   :  { %118 = vst [vmem:[#allocation2 + $0x270] sm:$0xf0] %v6569_v3  ;;  %119 = vst [vmem:[#allocation2 + $0x278] sm:$0xf0] %v6569_v3  ;;  %439 = vrot.lane.b32.xlu1 %v4720_v4, %s4474_s13  ;;  %437 = vrot.lane.b32.xlu0 %v4527_v1, %s4474_s13 }
  0x27   :  { %120 = vst [vmem:[#allocation2 + $0x280] sm:$0xf0] %v6569_v3  ;;  %121 = vst [vmem:[#allocation2 + $0x288] sm:$0xf0] %v6569_v3 }
  0x28   :  { %122 = vst [vmem:[#allocation2 + $0x290] sm:$0xf0] %v6569_v3  ;;  %123 = vst [vmem:[#allocation2 + $0x298] sm:$0xf0] %v6569_v3 }
  0x29   :  { %124 = vst [vmem:[#allocation2 + $0x2a0] sm:$0xf0] %v6569_v3  ;;  %125 = vst [vmem:[#allocation2 + $0x2a8] sm:$0xf0] %v6569_v3 }
  0x2a   :  { %126 = vst [vmem:[#allocation2 + $0x2b0] sm:$0xf0] %v6569_v3  ;;  %127 = vst [vmem:[#allocation2 + $0x2b8] sm:$0xf0] %v6569_v3  ;;  %483 = vrot.lane.b32.xlu1 %v4724_v5, %s4475_s14  ;;  %481 = vrot.lane.b32.xlu0 %v4532_v2, %s4475_s14 }
  0x2b   :  { %128 = vst [vmem:[#allocation2 + $0x2c0] sm:$0xf0] %v6569_v3  ;;  %129 = vst [vmem:[#allocation2 + $0x2c8] sm:$0xf0] %v6569_v3 }
  0x2c   :  { %130 = vst [vmem:[#allocation2 + $0x2d0] sm:$0xf0] %v6569_v3  ;;  %131 = vst [vmem:[#allocation2 + $0x2d8] sm:$0xf0] %v6569_v3 }
  0x2d   :  { %132 = vst [vmem:[#allocation2 + $0x2e0] sm:$0xf0] %v6569_v3  ;;  %133 = vst [vmem:[#allocation2 + $0x2e8] sm:$0xf0] %v6569_v3 }
  0x2e   :  { %134 = vst [vmem:[#allocation2 + $0x2f0] sm:$0xf0] %v6569_v3  ;;  %135 = vst [vmem:[#allocation2 + $0x2f8] sm:$0xf0] %v6569_v3  ;;  %487 = vrot.lane.b32.xlu1 %v4720_v4, %s4475_s14  ;;  %485 = vrot.lane.b32.xlu0 %v4527_v1, %s4475_s14 }
  0x2f   :  { %136 = vst [vmem:[#allocation2 + $0x300] sm:$0xf0] %v6569_v3  ;;  %137 = vst [vmem:[#allocation2 + $0x308] sm:$0xf0] %v6569_v3 }
  0x30   :  { %138 = vst [vmem:[#allocation2 + $0x310] sm:$0xf0] %v6569_v3  ;;  %139 = vst [vmem:[#allocation2 + $0x318] sm:$0xf0] %v6569_v3 }
  0x31   :  { %140 = vst [vmem:[#allocation2 + $0x320] sm:$0xf0] %v6569_v3  ;;  %141 = vst [vmem:[#allocation2 + $0x328] sm:$0xf0] %v6569_v3 }
  0x32   :  { %142 = vst [vmem:[#allocation2 + $0x330] sm:$0xf0] %v6569_v3  ;;  %143 = vst [vmem:[#allocation2 + $0x338] sm:$0xf0] %v6569_v3  ;;  %531 = vrot.lane.b32.xlu1 %v4724_v5, %s4476_s15  ;;  %529 = vrot.lane.b32.xlu0 %v4532_v2, %s4476_s15 }
  0x33   :  { %144 = vst [vmem:[#allocation2 + $0x340] sm:$0xf0] %v6569_v3  ;;  %145 = vst [vmem:[#allocation2 + $0x348] sm:$0xf0] %v6569_v3 }
  0x34   :  { %146 = vst [vmem:[#allocation2 + $0x350] sm:$0xf0] %v6569_v3  ;;  %147 = vst [vmem:[#allocation2 + $0x358] sm:$0xf0] %v6569_v3 }
  0x35   :  { %148 = vst [vmem:[#allocation2 + $0x360] sm:$0xf0] %v6569_v3  ;;  %149 = vst [vmem:[#allocation2 + $0x368] sm:$0xf0] %v6569_v3 }
  0x36   :  { %150 = vst [vmem:[#allocation2 + $0x370] sm:$0xf0] %v6569_v3  ;;  %151 = vst [vmem:[#allocation2 + $0x378] sm:$0xf0] %v6569_v3  ;;  %535 = vrot.lane.b32.xlu1 %v4720_v4, %s4476_s15  ;;  %533 = vrot.lane.b32.xlu0 %v4527_v1, %s4476_s15 }
  0x37   :  { %152 = vst [vmem:[#allocation2 + $0x380] sm:$0xf0] %v6569_v3  ;;  %153 = vst [vmem:[#allocation2 + $0x388] sm:$0xf0] %v6569_v3 }
  0x38   :  { %154 = vst [vmem:[#allocation2 + $0x390] sm:$0xf0] %v6569_v3  ;;  %155 = vst [vmem:[#allocation2 + $0x398] sm:$0xf0] %v6569_v3 }
  0x39   :  { %156 = vst [vmem:[#allocation2 + $0x3a0] sm:$0xf0] %v6569_v3  ;;  %157 = vst [vmem:[#allocation2 + $0x3a8] sm:$0xf0] %v6569_v3 }
  0x3a   :  { %158 = vst [vmem:[#allocation2 + $0x3b0] sm:$0xf0] %v6569_v3  ;;  %159 = vst [vmem:[#allocation2 + $0x3b8] sm:$0xf0] %v6569_v3  ;;  %579 = vrot.lane.b32.xlu1 %v4724_v5, %s4477_s16  ;;  %577 = vrot.lane.b32.xlu0 %v4532_v2, %s4477_s16 }
  0x3b   :  { %160 = vst [vmem:[#allocation2 + $0x3c0] sm:$0xf0] %v6569_v3  ;;  %161 = vst [vmem:[#allocation2 + $0x3c8] sm:$0xf0] %v6569_v3 }
  0x3c   :  { %162 = vst [vmem:[#allocation2 + $0x3d0] sm:$0xf0] %v6569_v3  ;;  %163 = vst [vmem:[#allocation2 + $0x3d8] sm:$0xf0] %v6569_v3 }
  0x3d   :  { %164 = vst [vmem:[#allocation2 + $0x3e0] sm:$0xf0] %v6569_v3  ;;  %165 = vst [vmem:[#allocation2 + $0x3e8] sm:$0xf0] %v6569_v3 }
  0x3e   :  { %166 = vst [vmem:[#allocation2 + $0x3f0] sm:$0xf0] %v6569_v3  ;;  %167 = vst [vmem:[#allocation2 + $0x3f8] sm:$0xf0] %v6569_v3  ;;  %583 = vrot.lane.b32.xlu1 %v4720_v4, %s4477_s16  ;;  %581 = vrot.lane.b32.xlu0 %v4527_v1, %s4477_s16 }
  0x3f   :  { %168 = vst [vmem:[#allocation2 + $0x400] sm:$0xf0] %v6569_v3  ;;  %169 = vst [vmem:[#allocation2 + $0x408] sm:$0xf0] %v6569_v3 }
  0x40   :  { %170 = vst [vmem:[#allocation2 + $0x410] sm:$0xf0] %v6569_v3  ;;  %171 = vst [vmem:[#allocation2 + $0x418] sm:$0xf0] %v6569_v3 }
  0x41   :  { %172 = vst [vmem:[#allocation2 + $0x420] sm:$0xf0] %v6569_v3  ;;  %173 = vst [vmem:[#allocation2 + $0x428] sm:$0xf0] %v6569_v3 }
  0x42   :  { %174 = vst [vmem:[#allocation2 + $0x430] sm:$0xf0] %v6569_v3  ;;  %175 = vst [vmem:[#allocation2 + $0x438] sm:$0xf0] %v6569_v3 }
  0x43   :  { %176 = vst [vmem:[#allocation2 + $0x440] sm:$0xf0] %v6569_v3  ;;  %177 = vst [vmem:[#allocation2 + $0x448] sm:$0xf0] %v6569_v3 }
  0x44   :  { %178 = vst [vmem:[#allocation2 + $0x450] sm:$0xf0] %v6569_v3  ;;  %179 = vst [vmem:[#allocation2 + $0x458] sm:$0xf0] %v6569_v3 }
  0x45   :  { %180 = vst [vmem:[#allocation2 + $0x460] sm:$0xf0] %v6569_v3  ;;  %181 = vst [vmem:[#allocation2 + $0x468] sm:$0xf0] %v6569_v3 }
  0x46   :  { %182 = vst [vmem:[#allocation2 + $0x470] sm:$0xf0] %v6569_v3  ;;  %183 = vst [vmem:[#allocation2 + $0x478] sm:$0xf0] %v6569_v3 }
  0x47   :  { %184 = vst [vmem:[#allocation2 + $0x480] sm:$0xf0] %v6569_v3  ;;  %185 = vst [vmem:[#allocation2 + $0x488] sm:$0xf0] %v6569_v3 }
  0x48   :  { %186 = vst [vmem:[#allocation2 + $0x490] sm:$0xf0] %v6569_v3  ;;  %187 = vst [vmem:[#allocation2 + $0x498] sm:$0xf0] %v6569_v3 }
  0x49   :  { %188 = vst [vmem:[#allocation2 + $0x4a0] sm:$0xf0] %v6569_v3  ;;  %189 = vst [vmem:[#allocation2 + $0x4a8] sm:$0xf0] %v6569_v3 }
  0x4a   :  { %190 = vst [vmem:[#allocation2 + $0x4b0] sm:$0xf0] %v6569_v3  ;;  %191 = vst [vmem:[#allocation2 + $0x4b8] sm:$0xf0] %v6569_v3 }
  0x4b   :  { %192 = vst [vmem:[#allocation2 + $0x4c0] sm:$0xf0] %v6569_v3  ;;  %193 = vst [vmem:[#allocation2 + $0x4c8] sm:$0xf0] %v6569_v3 }
  0x4c   :  { %194 = vst [vmem:[#allocation2 + $0x4d0] sm:$0xf0] %v6569_v3  ;;  %195 = vst [vmem:[#allocation2 + $0x4d8] sm:$0xf0] %v6569_v3 }
  0x4d   :  { %196 = vst [vmem:[#allocation2 + $0x4e0] sm:$0xf0] %v6569_v3  ;;  %197 = vst [vmem:[#allocation2 + $0x4e8] sm:$0xf0] %v6569_v3 }
  0x4e   :  { %198 = vst [vmem:[#allocation2 + $0x4f0] sm:$0xf0] %v6569_v3  ;;  %199 = vst [vmem:[#allocation2 + $0x4f8] sm:$0xf0] %v6569_v3 }
  0x4f   :  { %200 = vst [vmem:[#allocation2 + $0x500] sm:$0xf0] %v6569_v3  ;;  %201 = vst [vmem:[#allocation2 + $0x508] sm:$0xf0] %v6569_v3 }
  0x50   :  { %202 = vst [vmem:[#allocation2 + $0x510] sm:$0xf0] %v6569_v3  ;;  %203 = vst [vmem:[#allocation2 + $0x518] sm:$0xf0] %v6569_v3 }
  0x51   :  { %204 = vst [vmem:[#allocation2 + $0x520] sm:$0xf0] %v6569_v3  ;;  %205 = vst [vmem:[#allocation2 + $0x528] sm:$0xf0] %v6569_v3 }
  0x52   :  { %206 = vst [vmem:[#allocation2 + $0x530] sm:$0xf0] %v6569_v3  ;;  %207 = vst [vmem:[#allocation2 + $0x538] sm:$0xf0] %v6569_v3 }
  0x53   :  { %208 = vst [vmem:[#allocation2 + $0x540] sm:$0xf0] %v6569_v3  ;;  %209 = vst [vmem:[#allocation2 + $0x548] sm:$0xf0] %v6569_v3 }
  0x54   :  { %210 = vst [vmem:[#allocation2 + $0x550] sm:$0xf0] %v6569_v3  ;;  %211 = vst [vmem:[#allocation2 + $0x558] sm:$0xf0] %v6569_v3 }
  0x55   :  { %212 = vst [vmem:[#allocation2 + $0x560] sm:$0xf0] %v6569_v3  ;;  %213 = vst [vmem:[#allocation2 + $0x568] sm:$0xf0] %v6569_v3 }
  0x56   :  { %214 = vst [vmem:[#allocation2 + $0x570] sm:$0xf0] %v6569_v3  ;;  %215 = vst [vmem:[#allocation2 + $0x578] sm:$0xf0] %v6569_v3 }
  0x57   :  { %216 = vst [vmem:[#allocation2 + $0x580] sm:$0xf0] %v6569_v3  ;;  %217 = vst [vmem:[#allocation2 + $0x588] sm:$0xf0] %v6569_v3 }
  0x58   :  { %218 = vst [vmem:[#allocation2 + $0x590] sm:$0xf0] %v6569_v3  ;;  %219 = vst [vmem:[#allocation2 + $0x598] sm:$0xf0] %v6569_v3 }
  0x59   :  { %220 = vst [vmem:[#allocation2 + $0x5a0] sm:$0xf0] %v6569_v3  ;;  %221 = vst [vmem:[#allocation2 + $0x5a8] sm:$0xf0] %v6569_v3 }
  0x5a   :  { %222 = vst [vmem:[#allocation2 + $0x5b0] sm:$0xf0] %v6569_v3  ;;  %223 = vst [vmem:[#allocation2 + $0x5b8] sm:$0xf0] %v6569_v3 }
  0x5b   :  { %6604 = vst [vmem:[#allocation3_spill] sm:$0xff] %v4720_v4  ;;  %6605 = vst [vmem:[#allocation4_spill] sm:$0xff] %v4724_v5  ;;  %v247_v24 = vld [vmem:[%s6562_s0] ss:$8 sm:$0xf] }
  0x5c   :  { %6606 = vst [vmem:[#allocation5_spill] sm:$0xff] %v4727_v6  ;;  %41 = vst [vmem:[#allocation2 + $0x8] sm:$0xff] %v39_v9  ;;  %v4294_v27 = vld [vmem:[%s6562_s0 + $0x1] ss:$8 sm:$0xf]  ;;  %v252_v28 = vrot.slane %v247_v24, %v4829_v20  ;;  %v264_v29 = vrot.slane %v247_v24, %v4832_v21  ;;  %v256_v30 = vrot.slane %v247_v24, %v4835_v22 }
  0x5d   :  { %40 = vst [vmem:[#allocation2] sm:$0xff] %v39_v9  ;;  %42 = vst [vmem:[#allocation2 + $0x10] sm:$0xff] %v39_v9  ;;  %v260_v31 = vrot.slane %v247_v24, %v4838_v23  ;;  %v304_v34 = vrot.slane %v4294_v27, %v4835_v22  ;;  %v300_v51 = vrot.slane %v4294_v27, %v4829_v20  ;;  %v4295_v54 = vld [vmem:[%s6562_s0 + $0x2] ss:$8 sm:$0xf] }
  0x5e   :  { %43 = vst [vmem:[#allocation2 + $0x18] sm:$0xff] %v39_v9  ;;  %vm4738_vm2 = vmpackc.low %vm4470_vm1, %vm33_vm0  ;;  %v308_v52 = vrot.slane %v4294_v27, %v4838_v23  ;;  %v312_v53 = vrot.slane %v4294_v27, %v4832_v21  ;;  %v352_v0 = vrot.slane %v4295_v54, %v4835_v22  ;;  %v4296_v27 = vld [vmem:[%s6562_s0 + $0x3] ss:$8 sm:$0xf]  ;;  %vm1234_vm0 = vcmask 392192  }
  0x5f   :  { %4444 = vmatprep.subr.msk.bf16.mxu0 %vm4738_vm2, %v4742_v12  ;;  %4447 = vmatprep.subr.msk.bf16.mxu1 %vm4738_vm2, %v4742_v12  ;;  %430 = vst [vmem:[#allocation2 + $0xa8] sm:$0x3] %v426_v13  ;;  %432 = vst [vmem:[#allocation2 + $0xb8] sm:$0x3] %v428_v14 }
  0x60   :  { %4450 = vmatpush1.bf16.msk.msra.mxu0 %vm4738_vm2, %v4742_v12  ;;  %4453 = vmatpush1.bf16.msk.msra.mxu1 %vm4738_vm2, %v4742_v12  ;;  %429 = vst [vmem:[#allocation2 + $0xa0] sm:$0x3] %v425_v15  ;;  %431 = vst [vmem:[#allocation2 + $0xb0] sm:$0x3] %v427_v16  ;;  %v348_v16 = vrot.slane %v4295_v54, %v4829_v20 }
  0x61   :  { %6609 = vst [vmem:[#allocation6_spill] sm:$0xff] %v4832_v21 }
  0x66   :  { %v5433_v5 = vld [vmem:[#allocation2 + $0xb8] sm:$0xff] }
  0x67   :  { %6615 = vst [vmem:[#allocation12_spill] sm:$0xff] %v5433_v5 }
  0x74   :  { %v237_v25 = vpop.permute.xlu1 %236  ;;  %v233_v26 = vpop.permute.xlu0 %232 }
  0x78   :  { %v239_v32 = vpop.permute.xlu1 %238  ;;  %v235_v33 = vpop.permute.xlu0 %234 }
  0x79   :  { %v243_v35 = vsel %vm242_vm4, %v237_v25, %v239_v32  ;;  %v246_v36 = vsel %vm242_vm4, %v239_v32, %v233_v26  ;;  %v244_v37 = vsel %vm242_vm4, %v235_v33, %v237_v25  ;;  %v245_v38 = vsel %vm242_vm4, %v233_v26, %v235_v33 }
  0x7a   :  { %v269_v39 = vmul.f32 %v252_v28, %v246_v36  ;;  %v272_v40 = vmul.f32 %v264_v29, %v243_v35  ;;  %v270_v41 = vmul.f32 %v256_v30, %v245_v38  ;;  %v271_v42 = vmul.f32 %v260_v31, %v244_v37 }
  0x7b   :  { %v356_v25 = vrot.slane %v4295_v54, %v4838_v23  ;;  %v360_v26 = vrot.slane %v4295_v54, %v4832_v21  ;;  %v400_v38 = vrot.slane %v4296_v27, %v4835_v22 }
  0x7c   :  { %v273_v43 = vpack.c.bf16 %v269_v39, %v269_v39  ;;  %v276_v44 = vpack.c.bf16 %v272_v40, %v272_v40  ;;  %v274_v45 = vpack.c.bf16 %v270_v41, %v270_v41  ;;  %v275_v46 = vpack.c.bf16 %v271_v42, %v271_v42  ;;  %v284_v47 = vpop.permute.xlu1 %283  ;;  %v282_v48 = vpop.permute.xlu0 %281 }
  0x7d   :  { %v292_v49 = vsel %vm289_vm5, %v282_v48, %v284_v47 }
  0x7e   :  { %277 = vst [vmem:[#allocation2 + $0x20] sm:$0x3] %v273_v43  ;;  %280 = vst [vmem:[#allocation2 + $0x38] sm:$0x3] %v276_v44  ;;  %v318_v50 = vmul.f32 %v304_v34, %v292_v49 }
  0x7f   :  { %278 = vst [vmem:[#allocation2 + $0x28] sm:$0x3] %v274_v45  ;;  %279 = vst [vmem:[#allocation2 + $0x30] sm:$0x3] %v275_v46 }
  0x80   :  { %v322_v55 = vpack.c.bf16 %v318_v50, %v318_v50  ;;  %v288_v56 = vpop.permute.xlu1 %287  ;;  %v286_v57 = vpop.permute.xlu0 %285  ;;  %v404_v50 = vrot.slane %v4296_v27, %v4838_v23 }
  0x81   :  { %v293_v58 = vsel %vm289_vm5, %v288_v56, %v282_v48  ;;  %v290_v59 = vsel %vm289_vm5, %v286_v57, %v288_v56  ;;  %v291_v60 = vsel %vm289_vm5, %v284_v47, %v286_v57  ;;  %v396_v48 = vrot.slane %v4296_v27, %v4829_v20 }
  0x82   :  { %326 = vst [vmem:[#allocation2 + $0x48] sm:$0x3] %v322_v55  ;;  %v317_v61 = vmul.f32 %v300_v51, %v293_v58  ;;  %v319_v62 = vmul.f32 %v308_v52, %v291_v60  ;;  %v320_v63 = vmul.f32 %v312_v53, %v290_v59  ;;  %v408_v51 = vrot.slane %v4296_v27, %v4832_v21  ;;  %v4297_v52 = vld [vmem:[%s6562_s0 + $0x5] ss:$8 sm:$0xf] }
  0x83   :  { %v456_v27 = vrot.slane %v4297_v52, %v4835_v22 }
  0x84   :  { %v321_v1 = vpack.c.bf16 %v317_v61, %v317_v61  ;;  %v323_v2 = vpack.c.bf16 %v319_v62, %v319_v62  ;;  %v324_v7 = vpack.c.bf16 %v320_v63, %v320_v63  ;;  %v332_v8 = vpop.permute.xlu1 %331  ;;  %v330_v9 = vpop.permute.xlu0 %329  ;;  %v452_v63 = vrot.slane %v4297_v52, %v4829_v20 }
  0x85   :  { %v340_v11 = vsel %vm337_vm6, %v330_v9, %v332_v8  ;;  %v4881_v14 = vld [vmem:[#allocation2 + $0x38] sm:$0xff]  ;;  %v4883_v15 = vld [vmem:[#allocation2 + $0x20] sm:$0xff] }
  0x86   :  { %v4879_v13 = vld [vmem:[#allocation2 + $0x28] sm:$0xff]  ;;  %325 = vst [vmem:[#allocation2 + $0x40] sm:$0x3] %v321_v1  ;;  %327 = vst [vmem:[#allocation2 + $0x50] sm:$0x3] %v323_v2  ;;  %v366_v18 = vmul.f32 %v352_v0, %v340_v11  ;;  %719 = vmatprep.subr.bf16.mxu1 %v4881_v14  ;;  %v4888_v24 = vld [vmem:[#allocation2 + $0x30] sm:$0xff] }
  0x87   :  { %328 = vst [vmem:[#allocation2 + $0x58] sm:$0x3] %v324_v7  ;;  %678 = vmatprep.subr.bf16.mxu0 %v4879_v13  ;;  %720 = vmatpush1.bf16.msra.mxu1 %v4888_v24 }
  0x88   :  { %679 = vmatpush1.bf16.msra.mxu0 %v4883_v15  ;;  %v370_v28 = vpack.c.bf16 %v366_v18, %v366_v18  ;;  %v336_v29 = vpop.permute.xlu1 %335  ;;  %v334_v30 = vpop.permute.xlu0 %333 }
  0x89   :  { %v341_v31 = vsel %vm337_vm6, %v336_v29, %v330_v9  ;;  %v338_v32 = vsel %vm337_vm6, %v334_v30, %v336_v29  ;;  %v339_v33 = vsel %vm337_vm6, %v332_v8, %v334_v30  ;;  %v4904_v34 = vld [vmem:[#allocation2 + $0x48] sm:$0xff] }
  0x8a   :  { %374 = vst [vmem:[#allocation2 + $0x68] sm:$0x3] %v370_v28  ;;  %v365_v35 = vmul.f32 %v348_v16, %v341_v31  ;;  %v367_v36 = vmul.f32 %v356_v25, %v339_v33  ;;  %v368_v37 = vmul.f32 %v360_v26, %v338_v32  ;;  %680 = vmatprep.subr.bf16.mxu0 %v4904_v34  ;;  %v4298_v29 = vld [vmem:[%s6562_s0 + $0x6] ss:$8 sm:$0xf] }
  0x8b   :  { %v464_v25 = vrot.slane %v4297_v52, %v4832_v21  ;;  %v460_v28 = vrot.slane %v4297_v52, %v4838_v23 }
  0x8c   :  { %v369_v39 = vpack.c.bf16 %v365_v35, %v365_v35  ;;  %v371_v40 = vpack.c.bf16 %v367_v36, %v367_v36  ;;  %v372_v41 = vpack.c.bf16 %v368_v37, %v368_v37  ;;  %v380_v42 = vpop.permute.xlu1 %379  ;;  %v378_v43 = vpop.permute.xlu0 %377 }
  0x8d   :  { %v388_v44 = vsel %vm385_vm7, %v378_v43, %v380_v42  ;;  %v4910_v45 = vld [vmem:[#allocation2 + $0x40] sm:$0xff]  ;;  %v4914_v47 = vld [vmem:[#allocation2 + $0x50] sm:$0xff] }
  0x8e   :  { %v4912_v46 = vld [vmem:[#allocation2 + $0x58] sm:$0xff]  ;;  %373 = vst [vmem:[#allocation2 + $0x60] sm:$0x3] %v369_v39  ;;  %375 = vst [vmem:[#allocation2 + $0x70] sm:$0x3] %v371_v40  ;;  %v414_v49 = vmul.f32 %v400_v38, %v388_v44  ;;  %681 = vmatpush1.bf16.msra.mxu0 %v4910_v45 }
  0x8f   :  { %376 = vst [vmem:[#allocation2 + $0x78] sm:$0x3] %v372_v41  ;;  %721 = vmatprep.subr.bf16.mxu1 %v4912_v46  ;;  %v500_v41 = vrot.slane %v4298_v29, %v4829_v20 }
  0x90   :  { %722 = vmatpush1.bf16.msra.mxu1 %v4914_v47  ;;  %v418_v53 = vpack.c.bf16 %v414_v49, %v414_v49  ;;  %v384_v54 = vpop.permute.xlu1 %383  ;;  %v382_v55 = vpop.permute.xlu0 %381 }
  0x91   :  { %v389_v56 = vsel %vm385_vm7, %v384_v54, %v378_v43  ;;  %v386_v57 = vsel %vm385_vm7, %v382_v55, %v384_v54  ;;  %v387_v58 = vsel %vm385_vm7, %v380_v42, %v382_v55  ;;  %v4932_v59 = vld [vmem:[#allocation2 + $0x68] sm:$0xff] }
  0x92   :  { %422 = vst [vmem:[#allocation2 + $0x88] sm:$0x3] %v418_v53  ;;  %v413_v60 = vmul.f32 %v396_v48, %v389_v56  ;;  %v415_v61 = vmul.f32 %v404_v50, %v387_v58  ;;  %v416_v62 = vmul.f32 %v408_v51, %v386_v57  ;;  %682 = vmatprep.subr.bf16.mxu0 %v4932_v59  ;;  %v4964_v50 = vld [vmem:[#allocation2 + $0xa8] sm:$0xff]  ;;  %v4966_v51 = vld [vmem:[#allocation2 + $0xb8] sm:$0xff] }
  0x93   :  { %v512_v56 = vrot.slane %v4298_v29, %v4832_v21  ;;  %v504_v58 = vrot.slane %v4298_v29, %v4835_v22 }
  0x94   :  { %v417_v0 = vpack.c.bf16 %v413_v60, %v413_v60  ;;  %v419_v1 = vpack.c.bf16 %v415_v61, %v415_v61  ;;  %v420_v2 = vpack.c.bf16 %v416_v62, %v416_v62  ;;  %v436_v7 = vpop.permute.xlu1 %435  ;;  %v434_v8 = vpop.permute.xlu0 %433  ;;  %v508_v60 = vrot.slane %v4298_v29, %v4838_v23  ;;  %v4983_v61 = vld [vmem:[#allocation2 + $0xa0] sm:$0xff] }
  0x95   :  { %v444_v9 = vsel %vm441_vm8, %v434_v8, %v436_v7  ;;  %v4938_v11 = vld [vmem:[#allocation2 + $0x60] sm:$0xff]  ;;  %v4942_v18 = vld [vmem:[#allocation2 + $0x70] sm:$0xff] }
  0x96   :  { %v4940_v16 = vld [vmem:[#allocation2 + $0x78] sm:$0xff]  ;;  %421 = vst [vmem:[#allocation2 + $0x80] sm:$0x3] %v417_v0  ;;  %423 = vst [vmem:[#allocation2 + $0x90] sm:$0x3] %v419_v1  ;;  %v469_v26 = vmul.f32 %v452_v63, %v444_v9  ;;  %683 = vmatpush1.bf16.msra.mxu0 %v4938_v11 }
  0x97   :  { %424 = vst [vmem:[#allocation2 + $0x98] sm:$0x3] %v420_v2  ;;  %723 = vmatprep.subr.bf16.mxu1 %v4940_v16  ;;  %v4299_v62 = vld [vmem:[%s6562_s0 + $0x7] ss:$8 sm:$0xf] }
  0x98   :  { %724 = vmatpush1.bf16.msra.mxu1 %v4942_v18  ;;  %v473_v30 = vpack.c.bf16 %v469_v26, %v469_v26  ;;  %v440_v31 = vpop.permute.xlu1 %439  ;;  %v438_v32 = vpop.permute.xlu0 %437  ;;  %v4989_v2 = vld [vmem:[#allocation2 + $0xb0] sm:$0xff] }
  0x99   :  { %v445_v33 = vsel %vm441_vm8, %v440_v31, %v434_v8  ;;  %v442_v35 = vsel %vm441_vm8, %v438_v32, %v440_v31  ;;  %v443_v36 = vsel %vm441_vm8, %v436_v7, %v438_v32  ;;  %v4960_v37 = vld [vmem:[#allocation2 + $0x88] sm:$0xff] }
  0x9a   :  { %477 = vst [vmem:[#allocation2 + $0xc0] sm:$0x3] %v473_v30  ;;  %v472_v38 = vmul.f32 %v464_v25, %v445_v33  ;;  %v470_v39 = vmul.f32 %v456_v27, %v443_v36  ;;  %v471_v40 = vmul.f32 %v460_v28, %v442_v35  ;;  %684 = vmatprep.subr.bf16.mxu0 %v4960_v37 }
  0x9b   :  { %v548_v28 = vrot.slane %v4299_v62, %v4829_v20 }
  0x9c   :  { %v476_v42 = vpack.c.bf16 %v472_v38, %v472_v38  ;;  %v474_v43 = vpack.c.bf16 %v470_v39, %v470_v39  ;;  %v475_v44 = vpack.c.bf16 %v471_v40, %v471_v40  ;;  %v484_v48 = vpop.permute.xlu1 %483  ;;  %v482_v49 = vpop.permute.xlu0 %481  ;;  %v560_v40 = vrot.slane %v4299_v62, %v4832_v21 }
  0x9d   :  { %v492_v52 = vsel %vm489_vm9, %v482_v49, %v484_v48  ;;  %v4970_v53 = vld [vmem:[#allocation2 + $0x80] sm:$0xff]  ;;  %v4974_v55 = vld [vmem:[#allocation2 + $0x90] sm:$0xff] }
  0x9e   :  { %v4972_v54 = vld [vmem:[#allocation2 + $0x98] sm:$0xff]  ;;  %480 = vst [vmem:[#allocation2 + $0xd8] sm:$0x3] %v476_v42  ;;  %478 = vst [vmem:[#allocation2 + $0xc8] sm:$0x3] %v474_v43  ;;  %v517_v57 = vmul.f32 %v500_v41, %v492_v52  ;;  %685 = vmatpush1.bf16.msra.mxu0 %v4970_v53  ;;  %v552_v43 = vrot.slane %v4299_v62, %v4835_v22  ;;  %v5431_v4 = vld [vmem:[#allocation2 + $0x80] sm:$0xff] }
  0x9f   :  { %479 = vst [vmem:[#allocation2 + $0xd0] sm:$0x3] %v475_v44  ;;  %725 = vmatprep.subr.bf16.mxu1 %v4972_v54  ;;  %686 = vmatprep.subr.bf16.mxu0 %v4964_v50  ;;  %v556_v44 = vrot.slane %v4299_v62, %v4838_v23  ;;  %6614 = vst [vmem:[#allocation11_spill] sm:$0xff] %v5431_v4  ;;  %v5436_v6 = vld [vmem:[#allocation2 + $0x90] sm:$0xff] }
  0xa0   :  { %726 = vmatpush1.bf16.msra.mxu1 %v4974_v55  ;;  %v521_v63 = vpack.c.bf16 %v517_v57, %v517_v57  ;;  %v488_v0 = vpop.permute.xlu1 %487  ;;  %v486_v1 = vpop.permute.xlu0 %485  ;;  %6616 = vst [vmem:[#allocation13_spill] sm:$0xff] %v5436_v6 }
  0xa1   :  { %727 = vmatprep.subr.bf16.mxu1 %v4966_v51  ;;  %v493_v7 = vsel %vm489_vm9, %v488_v0, %v482_v49  ;;  %v490_v8 = vsel %vm489_vm9, %v486_v1, %v488_v0  ;;  %v491_v9 = vsel %vm489_vm9, %v484_v48, %v486_v1  ;;  %v5012_v42 = vld [vmem:[#allocation2 + $0xc0] sm:$0xff] }
  0xa2   :  { %525 = vst [vmem:[#allocation2 + $0xe0] sm:$0x3] %v521_v63  ;;  %v520_v25 = vmul.f32 %v512_v56, %v493_v7  ;;  %v518_v26 = vmul.f32 %v504_v58, %v491_v9  ;;  %v519_v27 = vmul.f32 %v508_v60, %v490_v8  ;;  %687 = vmatpush1.bf16.msra.mxu0 %v4983_v61  ;;  %v4300_v48 = vld [vmem:[%s6562_s0 + $0x20] ss:$8 sm:$0xf] }
  0xa3   :  { %v596_v1 = vrot.slane %v4300_v48, %v4829_v20 }
  0xa4   :  { %728 = vmatpush1.bf16.msra.mxu1 %v4989_v2  ;;  %v524_v29 = vpack.c.bf16 %v520_v25, %v520_v25  ;;  %v522_v30 = vpack.c.bf16 %v518_v26, %v518_v26  ;;  %v523_v31 = vpack.c.bf16 %v519_v27, %v519_v27  ;;  %v532_v32 = vpop.permute.xlu1 %531  ;;  %v530_v33 = vpop.permute.xlu0 %529 }
  0xa5   :  { %v540_v35 = vsel %vm537_vm10, %v530_v33, %v532_v32  ;;  %v5003_v36 = vld [vmem:[#allocation2 + $0xc8] sm:$0xff]  ;;  %v5005_v38 = vld [vmem:[#allocation2 + $0xd8] sm:$0xff] }
  0xa6   :  { %v5007_v39 = vld [vmem:[#allocation2 + $0xd0] sm:$0xff]  ;;  %528 = vst [vmem:[#allocation2 + $0xf8] sm:$0x3] %v524_v29  ;;  %526 = vst [vmem:[#allocation2 + $0xe8] sm:$0x3] %v522_v30  ;;  %v565_v41 = vmul.f32 %v548_v28, %v540_v35  ;;  %688 = vmatprep.subr.bf16.mxu0 %v5003_v36  ;;  %729 = vmatprep.subr.bf16.mxu1 %v5005_v38  ;;  %v600_v35 = vrot.slane %v4300_v48, %v4835_v22 }
  0xa7   :  { %527 = vst [vmem:[#allocation2 + $0xf0] sm:$0x3] %v523_v31  ;;  %689 = vmatpush1.bf16.msra.mxu0 %v5012_v42  ;;  %v608_v31 = vrot.slane %v4300_v48, %v4832_v21 }
  0xa8   :  { %730 = vmatpush1.bf16.msra.mxu1 %v5007_v39  ;;  %v569_v49 = vpack.c.bf16 %v565_v41, %v565_v41  ;;  %v536_v52 = vpop.permute.xlu1 %535  ;;  %v534_v56 = vpop.permute.xlu0 %533 }
  0xa9   :  { %v541_v57 = vsel %vm537_vm10, %v536_v52, %v530_v33  ;;  %v538_v58 = vsel %vm537_vm10, %v534_v56, %v536_v52  ;;  %v539_v60 = vsel %vm537_vm10, %v532_v32, %v534_v56  ;;  %v5040_v33 = vld [vmem:[#allocation2 + $0xe0] sm:$0xff] }
  0xaa   :  { %573 = vst [vmem:[#allocation2 + $0x100] sm:$0x3] %v569_v49  ;;  %v568_v62 = vmul.f32 %v560_v40, %v541_v57  ;;  %v566_v63 = vmul.f32 %v552_v43, %v539_v60  ;;  %v567_v0 = vmul.f32 %v556_v44, %v538_v58  ;;  %v604_v40 = vrot.slane %v4300_v48, %v4838_v23 }
  0xac   :  { %v572_v7 = vpack.c.bf16 %v568_v62, %v568_v62  ;;  %v570_v8 = vpack.c.bf16 %v566_v63, %v566_v63  ;;  %v571_v9 = vpack.c.bf16 %v567_v0, %v567_v0  ;;  %v580_v25 = vpop.permute.xlu1 %579  ;;  %v578_v26 = vpop.permute.xlu0 %577 }
  0xad   :  { %v588_v27 = vsel %vm585_vm11, %v578_v26, %v580_v25  ;;  %v5031_v28 = vld [vmem:[#allocation2 + $0xe8] sm:$0xff]  ;;  %v5033_v29 = vld [vmem:[#allocation2 + $0xf8] sm:$0xff] }
  0xae   :  { %v5035_v30 = vld [vmem:[#allocation2 + $0xf0] sm:$0xff]  ;;  %576 = vst [vmem:[#allocation2 + $0x118] sm:$0x3] %v572_v7  ;;  %574 = vst [vmem:[#allocation2 + $0x108] sm:$0x3] %v570_v8  ;;  %v613_v32 = vmul.f32 %v596_v1, %v588_v27  ;;  %690 = vmatprep.subr.bf16.mxu0 %v5031_v28  ;;  %731 = vmatprep.subr.bf16.mxu1 %v5033_v29 }
  0xaf   :  { %575 = vst [vmem:[#allocation2 + $0x110] sm:$0x3] %v571_v9  ;;  %691 = vmatpush1.bf16.msra.mxu0 %v5040_v33  ;;  %732 = vmatpush1.bf16.msra.mxu1 %v5035_v30 }
  0xb0   :  { %v617_v41 = vpack.c.bf16 %v613_v32, %v613_v32  ;;  %v584_v43 = vpop.permute.xlu1 %583  ;;  %v582_v44 = vpop.permute.xlu0 %581 }
  0xb1   :  { %v589_v49 = vsel %vm585_vm11, %v584_v43, %v578_v26  ;;  %v586_v52 = vsel %vm585_vm11, %v582_v44, %v584_v43  ;;  %v587_v56 = vsel %vm585_vm11, %v580_v25, %v582_v44  ;;  %v658_v8 = vld [vmem:[#allocation2 + $0x100] sm:$0xff] }
  0xb2   :  { %621 = vst [vmem:[#allocation2 + $0x120] sm:$0x3] %v617_v41  ;;  %v616_v57 = vmul.f32 %v608_v31, %v589_v49  ;;  %v614_v58 = vmul.f32 %v600_v35, %v587_v56  ;;  %v615_v48 = vmul.f32 %v604_v40, %v586_v52  ;;  %v4301_v31 = vcombine.low %v4819_v17, %v4819_v17  ;;  %v4305_v35 = vld [vmem:[%s6562_s0 + $0x1] ss:$8 sm:$0xf] }
  0xb4   :  { %v620_v60 = vpack.c.bf16 %v616_v57, %v616_v57  ;;  %v618_v62 = vpack.c.bf16 %v614_v58, %v614_v58  ;;  %v619_v63 = vpack.c.bf16 %v615_v48, %v615_v48  ;;  %v837_v58 = vrot.slane %v4305_v35, %v4835_v22 }
  0xb5   :  { %v659_v0 = vld [vmem:[#allocation2 + $0x108] sm:$0xff]  ;;  %v661_v1 = vld [vmem:[#allocation2 + $0x118] sm:$0xff] }
  0xb6   :  { %v660_v7 = vld [vmem:[#allocation2 + $0x110] sm:$0xff]  ;;  %624 = vst [vmem:[#allocation2 + $0x138] sm:$0x3] %v620_v60  ;;  %622 = vst [vmem:[#allocation2 + $0x128] sm:$0x3] %v618_v62  ;;  %692 = vmatprep.subr.bf16.mxu0 %v659_v0  ;;  %733 = vmatprep.subr.bf16.mxu1 %v661_v1 }
  0xb7   :  { %623 = vst [vmem:[#allocation2 + $0x130] sm:$0x3] %v619_v63  ;;  %693 = vmatpush1.bf16.msra.mxu0 %v658_v8  ;;  %734 = vmatpush1.bf16.msra.mxu1 %v660_v7 }
  0xb9   :  { %v662_v27 = vld [vmem:[#allocation2 + $0x120] sm:$0xff] }
  0xbd   :  { %v663_v9 = vld [vmem:[#allocation2 + $0x128] sm:$0xff]  ;;  %v665_v25 = vld [vmem:[#allocation2 + $0x138] sm:$0xff] }
  0xbe   :  { %v664_v26 = vld [vmem:[#allocation2 + $0x130] sm:$0xff]  ;;  %694 = vmatprep.subr.bf16.mxu0 %v663_v9  ;;  %735 = vmatprep.subr.bf16.mxu1 %v665_v25 }
  0xbf   :  { %695 = vmatpush1.bf16.msra.mxu0 %v662_v27  ;;  %736 = vmatpush1.bf16.msra.mxu1 %v664_v26 }
  0xc0   :  { %4456 = vmatprep.subr.msk.bf16.mxu0 %vm4738_vm2, %v4742_v12  ;;  %4459 = vmatprep.subr.msk.bf16.mxu1 %vm4738_vm2, %v4742_v12 }
  0xc2   :  { %709 = vmatmul.mubr.bf16.vlgmr.msra.gmra.mrb[0].mxu0 %v4301_v31  ;;  %750 = vmatmul.mubr.bf16.vlgmr.msra.gmra.mrb[0].mxu1 %v4301_v31 }
  0xc3   :  { %4462 = vmatpush1.bf16.msk.msra.mxu0 %vm4738_vm2, %v4742_v12  ;;  %4465 = vmatpush1.bf16.msk.msra.mxu1 %vm4738_vm2, %v4742_v12 }
  0xc4   :  { %1240 = vmatprep.subr.bf16.mxu0 %v4879_v13  ;;  %1322 = vmatprep.subr.bf16.mxu1 %v4881_v14 }
  0xc7   :  { %1241 = vmatpush1.bf16.msra.mxu0 %v4883_v15  ;;  %1323 = vmatpush1.bf16.msra.mxu1 %v4888_v24 }
  0xc8   :  { %1242 = vmatprep.subr.bf16.mxu0 %v4904_v34  ;;  %1324 = vmatprep.subr.bf16.mxu1 %v4912_v46 }
  0xcb   :  { %1243 = vmatpush1.bf16.msra.mxu0 %v4910_v45  ;;  %1325 = vmatpush1.bf16.msra.mxu1 %v4914_v47 }
  0xcc   :  { %1244 = vmatprep.subr.bf16.mxu0 %v4932_v59  ;;  %1326 = vmatprep.subr.bf16.mxu1 %v4940_v16 }
  0xcf   :  { %1245 = vmatpush1.bf16.msra.mxu0 %v4938_v11  ;;  %1327 = vmatpush1.bf16.msra.mxu1 %v4942_v18 }
  0xd0   :  { %1246 = vmatprep.subr.bf16.mxu0 %v4960_v37  ;;  %1328 = vmatprep.subr.bf16.mxu1 %v4972_v54 }
  0xd3   :  { %1247 = vmatpush1.bf16.msra.mxu0 %v4970_v53  ;;  %1329 = vmatpush1.bf16.msra.mxu1 %v4974_v55  ;;  %v5119_v55 = vld [vmem:[%s6563_s3] sm:$0xff] }
  0xd4   :  { %1248 = vmatprep.subr.bf16.mxu0 %v4964_v50  ;;  %1330 = vmatprep.subr.bf16.mxu1 %v4966_v51 }
  0xd7   :  { %1249 = vmatpush1.bf16.msra.mxu0 %v4983_v61  ;;  %1331 = vmatpush1.bf16.msra.mxu1 %v4989_v2  ;;  %v4313_v61 = vcombine.high %v5119_v55, %v5119_v55  ;;  %v782_v2 = vld [vmem:[%s6562_s0] ss:$8 sm:$0xf] }
  0xd8   :  { %1250 = vmatprep.subr.bf16.mxu0 %v5003_v36  ;;  %1332 = vmatprep.subr.bf16.mxu1 %v5005_v38  ;;  %v791_v36 = vrot.slane %v782_v2, %v4835_v22  ;;  %v799_v32 = vrot.slane %v782_v2, %v4832_v21 }
  0xd9   :  { %1270 = vmatprep.mubr.bf16.mxu0 %v4313_v61  ;;  %1352 = vmatprep.mubr.bf16.mxu1 %v4313_v61 }
  0xdb   :  { %1251 = vmatpush1.bf16.msra.mxu0 %v5012_v42  ;;  %1333 = vmatpush1.bf16.msra.mxu1 %v5007_v39 }
  0xdc   :  { %1252 = vmatprep.subr.bf16.mxu0 %v5031_v28  ;;  %1334 = vmatprep.subr.bf16.mxu1 %v5033_v29  ;;  %v795_v28 = vrot.slane %v782_v2, %v4838_v23 }
  0xdf   :  { %1253 = vmatpush1.bf16.msra.mxu0 %v5040_v33  ;;  %1335 = vmatpush1.bf16.msra.mxu1 %v5035_v30  ;;  %v787_v30 = vrot.slane %v782_v2, %v4829_v20 }
  0xe0   :  { %1254 = vmatprep.subr.bf16.mxu0 %v659_v0  ;;  %1336 = vmatprep.subr.bf16.mxu1 %v661_v1 }
  0xe3   :  { %1255 = vmatpush1.bf16.msra.mxu0 %v658_v8  ;;  %1337 = vmatpush1.bf16.msra.mxu1 %v660_v7  ;;  %v841_v7 = vrot.slane %v4305_v35, %v4838_v23 }
  0xe4   :  { %1256 = vmatprep.subr.bf16.mxu0 %v663_v9  ;;  %1338 = vmatprep.subr.bf16.mxu1 %v665_v25  ;;  %v833_v9 = vrot.slane %v4305_v35, %v4829_v20  ;;  %v845_v25 = vrot.slane %v4305_v35, %v4832_v21 }
  0xe7   :  { %1257 = vmatpush1.bf16.msra.mxu0 %v662_v27  ;;  %1339 = vmatpush1.bf16.msra.mxu1 %v664_v26  ;;  %v4306_v27 = vld [vmem:[%s6562_s0 + $0x2] ss:$8 sm:$0xf] }
  0xe8   :  { %v879_v61 = vrot.slane %v4306_v27, %v4829_v20  ;;  %v891_v2 = vrot.slane %v4306_v27, %v4832_v21 }
 0x195   :  { %v710_v10 = vpop.f32.mrb[0].mxu0  ;;  %v751_v12 = vpop.f32.mrb[0].mxu1 }
 0x196   :  { %vm758_vm12 = vcmp.gt.f32.partialorder %v710_v10, 0.0  ;;  %v762_v17 = vmul.f32 0.2, %v710_v10  ;;  %v712_v13 = vpop.f32.mrb[1].mxu0  ;;  %vm760_vm13 = vcmp.gt.f32.partialorder %v751_v12, 0.0  ;;  %v753_v14 = vpop.f32.mrb[1].mxu1 }
 0x197   :  { %vm759_vm14 = vcmp.gt.f32.partialorder %v712_v13, 0.0  ;;  %v763_v15 = vmul.f32 0.2, %v712_v13  ;;  %v764_v24 = vmul.f32 0.2, %v751_v12  ;;  %v714_v34 = vpop.f32.mrb[2].mxu0 }
 0x198   :  { %v766_v45 = vsel %vm758_vm12, %v710_v10, %v762_v17  ;;  %vm761_vm15 = vcmp.gt.f32.partialorder %v753_v14, 0.0  ;;  %v765_v46 = vmul.f32 0.2, %v753_v14  ;;  %v715_v47 = vpop.f32.mrb[3].mxu0  ;;  %v755_v59 = vpop.f32.mrb[2].mxu1 }
 0x199   :  { %v954_v11 = vpack.c.bf16 %v766_v45, %v766_v45  ;;  %v767_v16 = vsel %vm759_vm14, %v712_v13, %v763_v15  ;;  %v768_v18 = vsel %vm760_vm13, %v751_v12, %v764_v24  ;;  %v756_v37 = vpop.f32.mrb[3].mxu1  ;;  %770 = vrot.lane.b32.xlu0 %v766_v45, %s4467_s9  ;;  %vm1917_vm14 = vcmask 523264  }
 0x19a   :  { %v955_v50 = vpack.c.bf16 %v767_v16, %v767_v16  ;;  %v956_v51 = vpack.c.bf16 %v768_v18, %v768_v18  ;;  %v769_v53 = vsel %vm761_vm15, %v753_v14, %v765_v46  ;;  %772 = vrot.lane.b32.xlu1 %v767_v16, %s4467_s9 }
 0x19b   :  { %958 = vst [vmem:[#allocation2 + $0x1c0] sm:$0xf] %v954_v11  ;;  %v957_v54 = vpack.c.bf16 %v769_v53, %v769_v53 }
 0x19c   :  { %959 = vst [vmem:[#allocation2 + $0x1c8] sm:$0xf] %v955_v50  ;;  %960 = vst [vmem:[#allocation2 + $0x1d0] sm:$0xf] %v956_v51  ;;  %v887_v51 = vrot.slane %v4306_v27, %v4838_v23 }
 0x19d   :  { %961 = vst [vmem:[#allocation2 + $0x1d8] sm:$0xf] %v957_v54  ;;  %774 = vrot.lane.b32.xlu0 %v768_v18, %s4467_s9 }
 0x19e   :  { %776 = vrot.lane.b32.xlu1 %v769_v53, %s4467_s9 }
 0x1a1   :  { %816 = vrot.lane.b32.xlu0 %v766_v45, %s4469_s10 }
 0x1a2   :  { %818 = vrot.lane.b32.xlu1 %v767_v16, %s4469_s10 }
 0x1a5   :  { %820 = vrot.lane.b32.xlu0 %v768_v18, %s4469_s10 }
 0x1a6   :  { %822 = vrot.lane.b32.xlu1 %v769_v53, %s4469_s10 }
 0x1a9   :  { %862 = vrot.lane.b32.xlu0 %v766_v45, %s4472_s11 }
 0x1aa   :  { %864 = vrot.lane.b32.xlu1 %v767_v16, %s4472_s11 }
 0x1ad   :  { %866 = vrot.lane.b32.xlu0 %v768_v18, %s4472_s11 }
 0x1ae   :  { %868 = vrot.lane.b32.xlu1 %v769_v53, %s4472_s11 }
 0x1b1   :  { %908 = vrot.lane.b32.xlu0 %v766_v45, %s4473_s12 }
 0x1b2   :  { %910 = vrot.lane.b32.xlu1 %v767_v16, %s4473_s12 }
 0x1b5   :  { %912 = vrot.lane.b32.xlu0 %v768_v18, %s4473_s12 }
 0x1b6   :  { %914 = vrot.lane.b32.xlu1 %v769_v53, %s4473_s12 }
 0x1b9   :  { %962 = vrot.lane.b32.xlu0 %v766_v45, %s4474_s13 }
 0x1ba   :  { %964 = vrot.lane.b32.xlu1 %v767_v16, %s4474_s13 }
 0x1bd   :  { %966 = vrot.lane.b32.xlu0 %v768_v18, %s4474_s13 }
 0x1be   :  { %968 = vrot.lane.b32.xlu1 %v769_v53, %s4474_s13 }
 0x1c1   :  { %1008 = vrot.lane.b32.xlu0 %v766_v45, %s4475_s14 }
 0x1c2   :  { %1010 = vrot.lane.b32.xlu1 %v767_v16, %s4475_s14 }
 0x1c5   :  { %1012 = vrot.lane.b32.xlu0 %v768_v18, %s4475_s14 }
 0x1c6   :  { %1014 = vrot.lane.b32.xlu1 %v769_v53, %s4475_s14 }
 0x1c9   :  { %1054 = vrot.lane.b32.xlu0 %v766_v45, %s4476_s15 }
 0x1ca   :  { %1056 = vrot.lane.b32.xlu1 %v767_v16, %s4476_s15 }
 0x1cd   :  { %1058 = vrot.lane.b32.xlu0 %v768_v18, %s4476_s15 }
 0x1ce   :  { %1060 = vrot.lane.b32.xlu1 %v769_v53, %s4476_s15 }
 0x1d1   :  { %1100 = vrot.lane.b32.xlu0 %v766_v45, %s4477_s16  ;;  %v883_v45 = vrot.slane %v4306_v27, %v4835_v22 }
 0x1d2   :  { %1102 = vrot.lane.b32.xlu1 %v767_v16, %s4477_s16 }
 0x1d5   :  { %1104 = vrot.lane.b32.xlu0 %v768_v18, %s4477_s16 }
 0x1d6   :  { %1106 = vrot.lane.b32.xlu1 %v769_v53, %s4477_s16 }
 0x20b   :  { %v771_v38 = vpop.permute.xlu0 %770 }
 0x20c   :  { %v773_v39 = vpop.permute.xlu1 %772 }
 0x20d   :  { %v780_v42 = vsel %vm242_vm4, %v771_v38, %v773_v39 }
 0x20e   :  { %v805_v29 = vmul.f32 %v791_v36, %v780_v42 }
 0x20f   :  { %v775_v33 = vpop.permute.xlu0 %774 }
 0x210   :  { %v809_v40 = vpack.c.bf16 %v805_v29, %v805_v29  ;;  %v779_v41 = vsel %vm242_vm4, %v773_v39, %v775_v33  ;;  %v777_v43 = vpop.permute.xlu1 %776 }
 0x211   :  { %v806_v44 = vmul.f32 %v795_v28, %v779_v41  ;;  %v778_v49 = vsel %vm242_vm4, %v775_v33, %v777_v43  ;;  %v781_v52 = vsel %vm242_vm4, %v777_v43, %v771_v38  ;;  %v4307_v38 = vld [vmem:[%s6562_s0 + $0x3] ss:$8 sm:$0xf] }
 0x212   :  { %813 = vst [vmem:[#allocation2 + $0x148] sm:$0xf] %v809_v40  ;;  %v804_v56 = vmul.f32 %v787_v30, %v781_v52  ;;  %v807_v57 = vmul.f32 %v799_v32, %v778_v49  ;;  %v929_v41 = vrot.slane %v4307_v38, %v4835_v22 }
 0x213   :  { %v810_v48 = vpack.c.bf16 %v806_v44, %v806_v44  ;;  %v817_v60 = vpop.permute.xlu0 %816 }
 0x214   :  { %v808_v62 = vpack.c.bf16 %v804_v56, %v804_v56  ;;  %v811_v63 = vpack.c.bf16 %v807_v57, %v807_v57  ;;  %v819_v0 = vpop.permute.xlu1 %818 }
 0x215   :  { %814 = vst [vmem:[#allocation2 + $0x150] sm:$0xf] %v810_v48  ;;  %v826_v1 = vsel %vm289_vm5, %v817_v60, %v819_v0 }
 0x216   :  { %812 = vst [vmem:[#allocation2 + $0x140] sm:$0xf] %v808_v62  ;;  %815 = vst [vmem:[#allocation2 + $0x158] sm:$0xf] %v811_v63  ;;  %v851_v8 = vmul.f32 %v837_v58, %v826_v1  ;;  %v937_v1 = vrot.slane %v4307_v38, %v4832_v21 }
 0x217   :  { %v821_v26 = vpop.permute.xlu0 %820 }
 0x218   :  { %v855_v31 = vpack.c.bf16 %v851_v8, %v851_v8  ;;  %v825_v10 = vsel %vm289_vm5, %v819_v0, %v821_v26  ;;  %v823_v12 = vpop.permute.xlu1 %822  ;;  %v925_v0 = vrot.slane %v4307_v38, %v4829_v20  ;;  %v4308_v8 = vld [vmem:[%s6562_s0 + $0x5] ss:$8 sm:$0xf] }
 0x219   :  { %v852_v17 = vmul.f32 %v841_v7, %v825_v10  ;;  %v824_v13 = vsel %vm289_vm5, %v821_v26, %v823_v12  ;;  %v827_v14 = vsel %vm289_vm5, %v823_v12, %v817_v60  ;;  %v5166_v15 = vld [vmem:[#allocation2 + $0x148] sm:$0xff]  ;;  %v933_v60 = vrot.slane %v4307_v38, %v4838_v23 }
 0x21a   :  { %859 = vst [vmem:[#allocation2 + $0x168] sm:$0xf] %v855_v31  ;;  %v850_v24 = vmul.f32 %v833_v9, %v827_v14  ;;  %v853_v34 = vmul.f32 %v845_v25, %v824_v13  ;;  %1258 = vmatprep.subr.bf16.mxu0 %v5166_v15  ;;  %v979_v14 = vrot.slane %v4308_v8, %v4829_v20  ;;  %v4309_v38 = vld [vmem:[%s6562_s0 + $0x6] ss:$8 sm:$0xf] }
 0x21b   :  { %v856_v46 = vpack.c.bf16 %v852_v17, %v852_v17  ;;  %v863_v47 = vpop.permute.xlu0 %862 }
 0x21c   :  { %v854_v59 = vpack.c.bf16 %v850_v24, %v850_v24  ;;  %v857_v11 = vpack.c.bf16 %v853_v34, %v853_v34  ;;  %v865_v16 = vpop.permute.xlu1 %864  ;;  %v5179_v54 = vld [vmem:[#allocation2 + $0x150] sm:$0xff] }
 0x21d   :  { %860 = vst [vmem:[#allocation2 + $0x170] sm:$0xf] %v856_v46  ;;  %v872_v18 = vsel %vm337_vm6, %v863_v47, %v865_v16  ;;  %v5172_v37 = vld [vmem:[#allocation2 + $0x140] sm:$0xff]  ;;  %v5174_v50 = vld [vmem:[#allocation2 + $0x158] sm:$0xff] }
 0x21e   :  { %858 = vst [vmem:[#allocation2 + $0x160] sm:$0xf] %v854_v59  ;;  %861 = vst [vmem:[#allocation2 + $0x178] sm:$0xf] %v857_v11  ;;  %v897_v53 = vmul.f32 %v883_v45, %v872_v18  ;;  %1259 = vmatpush1.bf16.msra.mxu0 %v5172_v37  ;;  %1340 = vmatprep.subr.bf16.mxu1 %v5174_v50  ;;  %v983_v18 = vrot.slane %v4308_v8, %v4835_v22 }
 0x21f   :  { %v867_v36 = vpop.permute.xlu0 %866  ;;  %1341 = vmatpush1.bf16.msra.mxu1 %v5179_v54 }
 0x220   :  { %v901_v39 = vpack.c.bf16 %v897_v53, %v897_v53  ;;  %v871_v42 = vsel %vm337_vm6, %v865_v16, %v867_v36  ;;  %v869_v28 = vpop.permute.xlu1 %868 }
 0x221   :  { %v898_v29 = vmul.f32 %v887_v51, %v871_v42  ;;  %v870_v30 = vsel %vm337_vm6, %v867_v36, %v869_v28  ;;  %v873_v32 = vsel %vm337_vm6, %v869_v28, %v863_v47  ;;  %v5193_v33 = vld [vmem:[#allocation2 + $0x168] sm:$0xff] }
 0x222   :  { %905 = vst [vmem:[#allocation2 + $0x188] sm:$0xf] %v901_v39  ;;  %v896_v35 = vmul.f32 %v879_v61, %v873_v32  ;;  %v899_v40 = vmul.f32 %v891_v2, %v870_v30  ;;  %1260 = vmatprep.subr.bf16.mxu0 %v5193_v33  ;;  %v987_v61 = vrot.slane %v4308_v8, %v4838_v23 }
 0x223   :  { %v902_v43 = vpack.c.bf16 %v898_v29, %v898_v29  ;;  %v909_v44 = vpop.permute.xlu0 %908  ;;  %v991_v2 = vrot.slane %v4308_v8, %v4832_v21  ;;  %v5260_v8 = vld [vmem:[#allocation2 + $0x1c8] sm:$0xff] }
 0x224   :  { %v900_v49 = vpack.c.bf16 %v896_v35, %v896_v35  ;;  %v903_v52 = vpack.c.bf16 %v899_v40, %v899_v40  ;;  %v911_v56 = vpop.permute.xlu1 %910  ;;  %v5206_v63 = vld [vmem:[#allocation2 + $0x170] sm:$0xff] }
 0x225   :  { %906 = vst [vmem:[#allocation2 + $0x190] sm:$0xf] %v902_v43  ;;  %v918_v57 = vsel %vm385_vm7, %v909_v44, %v911_v56  ;;  %v5199_v58 = vld [vmem:[#allocation2 + $0x160] sm:$0xff]  ;;  %v5201_v48 = vld [vmem:[#allocation2 + $0x178] sm:$0xff]  ;;  %v1025_v43 = vrot.slane %v4309_v38, %v4829_v20 }
 0x226   :  { %904 = vst [vmem:[#allocation2 + $0x180] sm:$0xf] %v900_v49  ;;  %907 = vst [vmem:[#allocation2 + $0x198] sm:$0xf] %v903_v52  ;;  %v943_v62 = vmul.f32 %v929_v41, %v918_v57  ;;  %1261 = vmatpush1.bf16.msra.mxu0 %v5199_v58  ;;  %1342 = vmatprep.subr.bf16.mxu1 %v5201_v48 }
 0x227   :  { %v913_v7 = vpop.permute.xlu0 %912  ;;  %1343 = vmatpush1.bf16.msra.mxu1 %v5206_v63 }
 0x228   :  { %v947_v9 = vpack.c.bf16 %v943_v62, %v943_v62  ;;  %v917_v25 = vsel %vm385_vm7, %v911_v56, %v913_v7  ;;  %v915_v26 = vpop.permute.xlu1 %914 }
 0x229   :  { %v944_v27 = vmul.f32 %v933_v60, %v917_v25  ;;  %v916_v31 = vsel %vm385_vm7, %v913_v7, %v915_v26  ;;  %v919_v10 = vsel %vm385_vm7, %v915_v26, %v909_v44  ;;  %v5220_v12 = vld [vmem:[#allocation2 + $0x188] sm:$0xff]  ;;  %v1033_v25 = vrot.slane %v4309_v38, %v4838_v23 }
 0x22a   :  { %951 = vst [vmem:[#allocation2 + $0x1a8] sm:$0xf] %v947_v9  ;;  %v942_v17 = vmul.f32 %v925_v0, %v919_v10  ;;  %v945_v13 = vmul.f32 %v937_v1, %v916_v31  ;;  %1262 = vmatprep.subr.bf16.mxu0 %v5220_v12  ;;  %v1029_v1 = vrot.slane %v4309_v38, %v4835_v22  ;;  %v5268_v31 = vld [vmem:[#allocation2 + $0x1d8] sm:$0xff] }
 0x22b   :  { %v948_v24 = vpack.c.bf16 %v944_v27, %v944_v27  ;;  %v963_v34 = vpop.permute.xlu0 %962  ;;  %v1037_v26 = vrot.slane %v4309_v38, %v4832_v21  ;;  %v4310_v10 = vld [vmem:[%s6562_s0 + $0x7] ss:$8 sm:$0xf] }
 0x22c   :  { %v946_v45 = vpack.c.bf16 %v942_v17, %v942_v17  ;;  %v949_v46 = vpack.c.bf16 %v945_v13, %v945_v13  ;;  %v965_v47 = vpop.permute.xlu1 %964  ;;  %v5233_v53 = vld [vmem:[#allocation2 + $0x190] sm:$0xff] }
 0x22d   :  { %952 = vst [vmem:[#allocation2 + $0x1b0] sm:$0xf] %v948_v24  ;;  %v972_v59 = vsel %vm441_vm8, %v963_v34, %v965_v47  ;;  %v5226_v11 = vld [vmem:[#allocation2 + $0x180] sm:$0xff]  ;;  %v5228_v16 = vld [vmem:[#allocation2 + $0x198] sm:$0xff] }
 0x22e   :  { %950 = vst [vmem:[#allocation2 + $0x1a0] sm:$0xf] %v946_v45  ;;  %953 = vst [vmem:[#allocation2 + $0x1b8] sm:$0xf] %v949_v46  ;;  %v996_v51 = vmul.f32 %v979_v14, %v972_v59  ;;  %1263 = vmatpush1.bf16.msra.mxu0 %v5226_v11  ;;  %1344 = vmatprep.subr.bf16.mxu1 %v5228_v16  ;;  %v5280_v46 = vld [vmem:[#allocation2 + $0x1c0] sm:$0xff] }
 0x22f   :  { %v967_v36 = vpop.permute.xlu0 %966  ;;  %1345 = vmatpush1.bf16.msra.mxu1 %v5233_v53 }
 0x230   :  { %v1000_v39 = vpack.c.bf16 %v996_v51, %v996_v51  ;;  %v971_v42 = vsel %vm441_vm8, %v965_v47, %v967_v36  ;;  %v969_v28 = vpop.permute.xlu1 %968  ;;  %v1071_v51 = vrot.slane %v4310_v10, %v4829_v20 }
 0x231   :  { %v997_v29 = vmul.f32 %v983_v18, %v971_v42  ;;  %v970_v30 = vsel %vm441_vm8, %v967_v36, %v969_v28  ;;  %v973_v32 = vsel %vm441_vm8, %v969_v28, %v963_v34  ;;  %v5247_v35 = vld [vmem:[#allocation2 + $0x1a8] sm:$0xff]  ;;  %v5283_v18 = vld [vmem:[#allocation2 + $0x1d0] sm:$0xff] }
 0x232   :  { %1004 = vst [vmem:[#allocation2 + $0x1e0] sm:$0xf] %v1000_v39  ;;  %v998_v40 = vmul.f32 %v987_v61, %v970_v30  ;;  %v999_v41 = vmul.f32 %v991_v2, %v973_v32  ;;  %1264 = vmatprep.subr.bf16.mxu0 %v5247_v35  ;;  %v1075_v32 = vrot.slane %v4310_v10, %v4835_v22 }
 0x233   :  { %v1001_v44 = vpack.c.bf16 %v997_v29, %v997_v29  ;;  %v1009_v49 = vpop.permute.xlu0 %1008 }
 0x234   :  { %v1002_v52 = vpack.c.bf16 %v998_v40, %v998_v40  ;;  %v1003_v56 = vpack.c.bf16 %v999_v41, %v999_v41  ;;  %v1011_v57 = vpop.permute.xlu1 %1010  ;;  %v5262_v9 = vld [vmem:[#allocation2 + $0x1b0] sm:$0xff]  ;;  %v4312_v41 = vcombine.low %v5119_v55, %v5119_v55 }
 0x235   :  { %1005 = vst [vmem:[#allocation2 + $0x1e8] sm:$0xf] %v1001_v44  ;;  %v1018_v60 = vsel %vm489_vm9, %v1009_v49, %v1011_v57  ;;  %v5253_v62 = vld [vmem:[#allocation2 + $0x1a0] sm:$0xff]  ;;  %v5255_v0 = vld [vmem:[#allocation2 + $0x1b8] sm:$0xff]  ;;  %v1079_v44 = vrot.slane %v4310_v10, %v4838_v23 }
 0x236   :  { %1006 = vst [vmem:[#allocation2 + $0x1f0] sm:$0xf] %v1002_v52  ;;  %1007 = vst [vmem:[#allocation2 + $0x1f8] sm:$0xf] %v1003_v56  ;;  %v1042_v7 = vmul.f32 %v1025_v43, %v1018_v60  ;;  %1265 = vmatpush1.bf16.msra.mxu0 %v5253_v62  ;;  %1346 = vmatprep.subr.bf16.mxu1 %v5255_v0 }
 0x237   :  { %v1013_v27 = vpop.permute.xlu0 %1012  ;;  %1266 = vmatprep.subr.bf16.mxu0 %v5260_v8  ;;  %1347 = vmatpush1.bf16.msra.mxu1 %v5262_v9  ;;  %v4311_v56 = vld [vmem:[%s6562_s0 + $0x20] ss:$8 sm:$0xf] }
 0x238   :  { %v1046_v17 = vpack.c.bf16 %v1042_v7, %v1042_v7  ;;  %v1017_v13 = vsel %vm489_vm9, %v1011_v57, %v1013_v27  ;;  %1348 = vmatprep.subr.bf16.mxu1 %v5268_v31  ;;  %v1015_v14 = vpop.permute.xlu1 %1014 }
 0x239   :  { %v1043_v24 = vmul.f32 %v1029_v1, %v1017_v13  ;;  %v1016_v34 = vsel %vm489_vm9, %v1013_v27, %v1015_v14  ;;  %v1019_v45 = vsel %vm489_vm9, %v1015_v14, %v1009_v49  ;;  %v5292_v29 = vld [vmem:[#allocation2 + $0x1e0] sm:$0xff]  ;;  %v1083_v49 = vrot.slane %v4310_v10, %v4832_v21 }
 0x23a   :  { %1050 = vst [vmem:[#allocation2 + $0x200] sm:$0xf] %v1046_v17  ;;  %v1044_v47 = vmul.f32 %v1033_v25, %v1016_v34  ;;  %v1045_v59 = vmul.f32 %v1037_v26, %v1019_v45  ;;  %1267 = vmatpush1.bf16.msra.mxu0 %v5280_v46  ;;  %v1117_v10 = vrot.slane %v4311_v56, %v4829_v20 }
 0x23b   :  { %v1047_v61 = vpack.c.bf16 %v1043_v24, %v1043_v24  ;;  %v1055_v2 = vpop.permute.xlu0 %1054  ;;  %1349 = vmatpush1.bf16.msra.mxu1 %v5283_v18 }
 0x23c   :  { %v1048_v36 = vpack.c.bf16 %v1044_v47, %v1044_v47  ;;  %v1049_v38 = vpack.c.bf16 %v1045_v59, %v1045_v59  ;;  %v1057_v39 = vpop.permute.xlu1 %1056  ;;  %v5287_v42 = vld [vmem:[#allocation2 + $0x1e8] sm:$0xff] }
 0x23d   :  { %1051 = vst [vmem:[#allocation2 + $0x208] sm:$0xf] %v1047_v61  ;;  %v1064_v28 = vsel %vm537_vm10, %v1055_v2, %v1057_v39  ;;  %1268 = vmatprep.subr.bf16.mxu0 %v5287_v42  ;;  %v5294_v30 = vld [vmem:[#allocation2 + $0x1f8] sm:$0xff]  ;;  %v5297_v40 = vld [vmem:[#allocation2 + $0x1f0] sm:$0xff]  ;;  %v1121_v61 = vrot.slane %v4311_v56, %v4835_v22 }
 0x23e   :  { %1052 = vst [vmem:[#allocation2 + $0x210] sm:$0xf] %v1048_v36  ;;  %1053 = vst [vmem:[#allocation2 + $0x218] sm:$0xf] %v1049_v38  ;;  %v1088_v43 = vmul.f32 %v1071_v51, %v1064_v28  ;;  %1269 = vmatpush1.bf16.msra.mxu0 %v5292_v29  ;;  %1350 = vmatprep.subr.bf16.mxu1 %v5294_v30  ;;  %v1125_v38 = vrot.slane %v4311_v56, %v4838_v23 }
 0x23f   :  { %v1059_v52 = vpop.permute.xlu0 %1058  ;;  %1351 = vmatpush1.bf16.msra.mxu1 %v5297_v40 }
 0x240   :  { %v1092_v57 = vpack.c.bf16 %v1088_v43, %v1088_v43  ;;  %v1063_v55 = vsel %vm537_vm10, %v1057_v39, %v1059_v52  ;;  %v1061_v60 = vpop.permute.xlu1 %1060  ;;  %v1129_v39 = vrot.slane %v4311_v56, %v4832_v21 }
 0x241   :  { %v1089_v1 = vmul.f32 %v1075_v32, %v1063_v55  ;;  %v1062_v7 = vsel %vm537_vm10, %v1059_v52, %v1061_v60  ;;  %v1065_v25 = vsel %vm537_vm10, %v1061_v60, %v1055_v2  ;;  %1271 = vmatmul.mubr.bf16.vlgmr.msra.gmra.mrb[4].mxu0 %v4312_v41  ;;  %v5323_v59 = vld [vmem:[#allocation2 + $0x200] sm:$0xff] }
 0x242   :  { %1096 = vst [vmem:[#allocation2 + $0x220] sm:$0xf] %v1092_v57  ;;  %v1090_v26 = vmul.f32 %v1079_v44, %v1062_v7  ;;  %v1091_v27 = vmul.f32 %v1083_v49, %v1065_v25  ;;  %1353 = vmatmul.mubr.bf16.vlgmr.msra.gmra.mrb[4].mxu1 %v4312_v41  ;;  %1311 = vmatprep.mubr.bf16.mxu0 %v6569_v3 }
 0x243   :  { %v1093_v17 = vpack.c.bf16 %v1089_v1, %v1089_v1  ;;  %v1101_v13 = vpop.permute.xlu0 %1100  ;;  %1393 = vmatprep.mubr.bf16.mxu1 %v6569_v3  ;;  %v5429_v3 = vld [vmem:[#allocation2 + $0xa8] sm:$0xff] }
 0x244   :  { %v1094_v14 = vpack.c.bf16 %v1090_v26, %v1090_v26  ;;  %v1095_v24 = vpack.c.bf16 %v1091_v27, %v1091_v27  ;;  %v1103_v34 = vpop.permute.xlu1 %1102  ;;  %v5318_v45 = vld [vmem:[#allocation2 + $0x208] sm:$0xff]  ;;  %6613 = vst [vmem:[#allocation10_spill] sm:$0xff] %v5429_v3 }
 0x245   :  { %1097 = vst [vmem:[#allocation2 + $0x228] sm:$0xf] %v1093_v17  ;;  %v1110_v47 = vsel %vm585_vm11, %v1101_v13, %v1103_v34  ;;  %1279 = vmatprep.subr.bf16.mxu0 %v5318_v45  ;;  %v5325_v51 = vld [vmem:[#allocation2 + $0x218] sm:$0xff]  ;;  %v5328_v2 = vld [vmem:[#allocation2 + $0x210] sm:$0xff]  ;;  %v5356_v17 = vld [vmem:[#allocation2 + $0x8] sm:$0xff] }
 0x246   :  { %1098 = vst [vmem:[#allocation2 + $0x230] sm:$0xf] %v1094_v14  ;;  %1099 = vst [vmem:[#allocation2 + $0x238] sm:$0xf] %v1095_v24  ;;  %v1134_v36 = vmul.f32 %v1117_v10, %v1110_v47  ;;  %1280 = vmatpush1.bf16.msra.mxu0 %v5323_v59  ;;  %1361 = vmatprep.subr.bf16.mxu1 %v5325_v51  ;;  %v4429_v10 = vld [vmem:[%s6563_s3 + $0x8] ss:$0 sps:$4 sm:$0xff]  }
 0x247   :  { %v1105_v28 = vpop.permute.xlu0 %1104  ;;  %1362 = vmatpush1.bf16.msra.mxu1 %v5328_v2  ;;  %v5360_v14 = vld [vmem:[#allocation2 + $0x18] sm:$0xff]  ;;  %v5365_v24 = vld [vmem:[%s6564_s4] sm:$0xff] }
 0x248   :  { %v1138_v32 = vpack.c.bf16 %v1134_v36, %v1134_v36  ;;  %v1109_v41 = vsel %vm585_vm11, %v1103_v34, %v1105_v28  ;;  %v1107_v43 = vpop.permute.xlu1 %1106  ;;  %v5378_v36 = vld [vmem:[#allocation2] sm:$0xff] }
 0x249   :  { %v1135_v44 = vmul.f32 %v1121_v61, %v1109_v41  ;;  %v1108_v49 = vsel %vm585_vm11, %v1105_v28, %v1107_v43  ;;  %v1111_v52 = vsel %vm585_vm11, %v1107_v43, %v1101_v13  ;;  %v5344_v25 = vld [vmem:[#allocation2 + $0x220] sm:$0xff]  ;;  %v5386_v28 = vld [vmem:[#allocation2 + $0x28] sm:$0xff] }
 0x24a   :  { %1142 = vst [vmem:[#allocation2 + $0x240] sm:$0xf] %v1138_v32  ;;  %v1136_v57 = vmul.f32 %v1125_v38, %v1108_v49  ;;  %v1137_v55 = vmul.f32 %v1129_v39, %v1111_v52  ;;  %v5381_v38 = vld [vmem:[#allocation2 + $0x10] sm:$0xff]  ;;  %v4325_v39 = vcombine.high %v5365_v24, %v5365_v24  ;;  %v5390_v32 = vld [vmem:[#allocation2 + $0x38] sm:$0xff]  ;;  %v5393_v41 = vld [vmem:[#allocation2 + $0x20] sm:$0xff] }
 0x24b   :  { %v1139_v60 = vpack.c.bf16 %v1135_v44, %v1135_v44  ;;  %v5396_v43 = vld [vmem:[#allocation2 + $0x48] sm:$0xff]  ;;  %v5398_v44 = vld [vmem:[#allocation2 + $0x30] sm:$0xff]  ;;  %v5402_v49 = vld [vmem:[#allocation2 + $0x58] sm:$0xff] }
 0x24c   :  { %v1140_v56 = vpack.c.bf16 %v1136_v57, %v1136_v57  ;;  %v1141_v1 = vpack.c.bf16 %v1137_v55, %v1137_v55  ;;  %v5341_v7 = vld [vmem:[#allocation2 + $0x228] sm:$0xff]  ;;  %v5405_v52 = vld [vmem:[#allocation2 + $0x40] sm:$0xff]  ;;  %v5410_v55 = vld [vmem:[#allocation2 + $0x50] sm:$0xff] }
 0x24d   :  { %1143 = vst [vmem:[#allocation2 + $0x248] sm:$0xf] %v1139_v60  ;;  %1281 = vmatprep.subr.bf16.mxu0 %v5341_v7  ;;  %v5346_v26 = vld [vmem:[#allocation2 + $0x238] sm:$0xff]  ;;  %v5348_v27 = vld [vmem:[#allocation2 + $0x230] sm:$0xff]  ;;  %v5408_v57 = vld [vmem:[#allocation2 + $0x68] sm:$0xff] }
 0x24e   :  { %1144 = vst [vmem:[#allocation2 + $0x250] sm:$0xf] %v1140_v56  ;;  %1145 = vst [vmem:[#allocation2 + $0x258] sm:$0xf] %v1141_v1  ;;  %1282 = vmatpush1.bf16.msra.mxu0 %v5344_v25  ;;  %1363 = vmatprep.subr.bf16.mxu1 %v5346_v26  ;;  %v5414_v60 = vld [vmem:[#allocation2 + $0x78] sm:$0xff]  ;;  %v5417_v56 = vld [vmem:[#allocation2 + $0x60] sm:$0xff] }
 0x24f   :  { %1364 = vmatpush1.bf16.msra.mxu1 %v5348_v27  ;;  %v5420_v1 = vld [vmem:[#allocation2 + $0x88] sm:$0xff] }
 0x250   :  { %6610 = vst [vmem:[#allocation7_spill] sm:$0xff] %v5420_v1 }
 0x251   :  { %v5368_v34 = vld [vmem:[#allocation2 + $0x240] sm:$0xff] }
 0x254   :  { %v5358_v13 = vld [vmem:[#allocation2 + $0x248] sm:$0xff] }
 0x255   :  { %1283 = vmatprep.subr.bf16.mxu0 %v5358_v13  ;;  %v5370_v47 = vld [vmem:[#allocation2 + $0x258] sm:$0xff]  ;;  %v5372_v61 = vld [vmem:[#allocation2 + $0x250] sm:$0xff] }
 0x256   :  { %1284 = vmatpush1.bf16.msra.mxu0 %v5368_v34  ;;  %1365 = vmatprep.subr.bf16.mxu1 %v5370_v47 }
 0x257   :  { %1366 = vmatpush1.bf16.msra.mxu1 %v5372_v61  ;;  %1921 = vmatprep.subr.bf16.mxu0 %v5356_v17 }
 0x258   :  { %2003 = vmatprep.subr.bf16.mxu1 %v5360_v14 }
 0x259   :  { %4315 = vmatmul.mubr.msk.bf16.vlgmr.msra.gmra.mrb[4].mxu0 %vm1234_vm0, %v4429_v10 }
 0x25a   :  { %4316 = vmatmul.mubr.msk.bf16.vlgmr.msra.gmra.mrb[4].mxu1 %vm1234_vm0, %v4429_v10  ;;  %1922 = vmatpush1.bf16.msra.mxu0 %v5378_v36  ;;  %v5422_v10 = vld [vmem:[#allocation2 + $0x70] sm:$0xff] }
 0x25b   :  { %1923 = vmatprep.subr.bf16.mxu0 %v5386_v28  ;;  %2004 = vmatpush1.bf16.msra.mxu1 %v5381_v38  ;;  %6611 = vst [vmem:[#allocation8_spill] sm:$0xff] %v5422_v10 }
 0x25c   :  { %2005 = vmatprep.subr.bf16.mxu1 %v5390_v32  ;;  %1953 = vmatprep.mubr.bf16.mxu0 %v4325_v39 }
 0x25d   :  { %2035 = vmatprep.mubr.bf16.mxu1 %v4325_v39  ;;  %v5426_v39 = vld [vmem:[#allocation2 + $0x98] sm:$0xff] }
 0x25e   :  { %1924 = vmatpush1.bf16.msra.mxu0 %v5393_v41  ;;  %6612 = vst [vmem:[#allocation9_spill] sm:$0xff] %v5426_v39 }
 0x25f   :  { %1925 = vmatprep.subr.bf16.mxu0 %v5396_v43  ;;  %2006 = vmatpush1.bf16.msra.mxu1 %v5398_v44 }
 0x260   :  { %2007 = vmatprep.subr.bf16.mxu1 %v5402_v49 }
 0x262   :  { %1926 = vmatpush1.bf16.msra.mxu0 %v5405_v52 }
 0x263   :  { %1927 = vmatprep.subr.bf16.mxu0 %v5408_v57  ;;  %2008 = vmatpush1.bf16.msra.mxu1 %v5410_v55 }
 0x264   :  { %2009 = vmatprep.subr.bf16.mxu1 %v5414_v60 }
 0x266   :  { %1928 = vmatpush1.bf16.msra.mxu0 %v5417_v56 }
 0x267   :  { %1929 = vmatprep.subr.bf16.mxu0 %v5420_v1  ;;  %2010 = vmatpush1.bf16.msra.mxu1 %v5422_v10  ;;  %v5440_v1 = vld [vmem:[#allocation2 + $0xa0] sm:$0xff]  ;;  %v5443_v10 = vld [vmem:[#allocation2 + $0xb0] sm:$0xff] }
 0x268   :  { %2011 = vmatprep.subr.bf16.mxu1 %v5426_v39  ;;  %6617 = vst [vmem:[#allocation14_spill] sm:$0xff] %v5440_v1  ;;  %6618 = vst [vmem:[#allocation15_spill] sm:$0xff] %v5443_v10  ;;  %v5446_v39 = vld [vmem:[#allocation2 + $0xc8] sm:$0xff] }
 0x269   :  { %6619 = vst [vmem:[#allocation16_spill] sm:$0xff] %v5446_v39 }
 0x26a   :  { %1930 = vmatpush1.bf16.msra.mxu0 %v5431_v4  ;;  %v5450_v4 = vld [vmem:[#allocation2 + $0xd8] sm:$0xff] }
 0x26b   :  { %2012 = vmatpush1.bf16.msra.mxu1 %v5436_v6  ;;  %1931 = vmatprep.subr.bf16.mxu0 %v5429_v3  ;;  %6620 = vst [vmem:[#allocation17_spill] sm:$0xff] %v5450_v4  ;;  %v5453_v6 = vld [vmem:[#allocation2 + $0xc0] sm:$0xff]  ;;  %v5456_v3 = vld [vmem:[#allocation2 + $0xe8] sm:$0xff] }
 0x26c   :  { %2013 = vmatprep.subr.bf16.mxu1 %v5433_v5  ;;  %6621 = vst [vmem:[#allocation18_spill] sm:$0xff] %v5453_v6  ;;  %6622 = vst [vmem:[#allocation19_spill] sm:$0xff] %v5456_v3  ;;  %v5458_v5 = vld [vmem:[#allocation2 + $0xd0] sm:$0xff] }
 0x26d   :  { %6623 = vst [vmem:[#allocation20_spill] sm:$0xff] %v5458_v5 }
 0x26e   :  { %1932 = vmatpush1.bf16.msra.mxu0 %v5440_v1  ;;  %v5462_v1 = vld [vmem:[#allocation2 + $0xf8] sm:$0xff] }
 0x26f   :  { %1933 = vmatprep.subr.bf16.mxu0 %v5446_v39  ;;  %2014 = vmatpush1.bf16.msra.mxu1 %v5443_v10  ;;  %6624 = vst [vmem:[#allocation21_spill] sm:$0xff] %v5462_v1  ;;  %v5465_v10 = vld [vmem:[#allocation2 + $0xe0] sm:$0xff]  ;;  %v5470_v39 = vld [vmem:[#allocation2 + $0xf0] sm:$0xff] }
 0x270   :  { %2015 = vmatprep.subr.bf16.mxu1 %v5450_v4  ;;  %6625 = vst [vmem:[#allocation22_spill] sm:$0xff] %v5465_v10  ;;  %v5468_v4 = vld [vmem:[#allocation2 + $0x108] sm:$0xff]  ;;  %6626 = vst [vmem:[#allocation23_spill] sm:$0xff] %v5470_v39 }
 0x272   :  { %1934 = vmatpush1.bf16.msra.mxu0 %v5453_v6  ;;  %v5474_v6 = vld [vmem:[#allocation2 + $0x118] sm:$0xff] }
 0x273   :  { %1935 = vmatprep.subr.bf16.mxu0 %v5456_v3  ;;  %2016 = vmatpush1.bf16.msra.mxu1 %v5458_v5  ;;  %6627 = vst [vmem:[#allocation24_spill] sm:$0xff] %v5474_v6  ;;  %v5477_v5 = vld [vmem:[#allocation2 + $0x100] sm:$0xff]  ;;  %v5482_v3 = vld [vmem:[#allocation2 + $0x110] sm:$0xff] }
 0x274   :  { %2017 = vmatprep.subr.bf16.mxu1 %v5462_v1  ;;  %v5480_v1 = vld [vmem:[#allocation2 + $0x128] sm:$0xff] }
 0x276   :  { %1936 = vmatpush1.bf16.msra.mxu0 %v5465_v10  ;;  %v5486_v10 = vld [vmem:[#allocation2 + $0x138] sm:$0xff] }
 0x277   :  { %1937 = vmatprep.subr.bf16.mxu0 %v5468_v4  ;;  %2018 = vmatpush1.bf16.msra.mxu1 %v5470_v39  ;;  %v5489_v39 = vld [vmem:[#allocation2 + $0x120] sm:$0xff] }
 0x278   :  { %2019 = vmatprep.subr.bf16.mxu1 %v5474_v6  ;;  %v5492_v6 = vld [vmem:[#allocation2 + $0x130] sm:$0xff] }
 0x27a   :  { %1938 = vmatpush1.bf16.msra.mxu0 %v5477_v5 }
 0x27b   :  { %1939 = vmatprep.subr.bf16.mxu0 %v5480_v1  ;;  %2020 = vmatpush1.bf16.msra.mxu1 %v5482_v3 }
 0x27c   :  { %2021 = vmatprep.subr.bf16.mxu1 %v5486_v10 }
 0x27e   :  { %1940 = vmatpush1.bf16.msra.mxu0 %v5489_v39 }
 0x27f   :  { %1941 = vmatprep.subr.bf16.mxu0 %v5166_v15  ;;  %2022 = vmatpush1.bf16.msra.mxu1 %v5492_v6  ;;  %v4324_v15 = vcombine.low %v5365_v24, %v5365_v24  ;;  %v4317_v24 = vld [vmem:[%s6562_s0 + $0x1] ss:$8 sm:$0xf] }
 0x280   :  { %2023 = vmatprep.subr.bf16.mxu1 %v5174_v50 }
 0x282   :  { %1942 = vmatpush1.bf16.msra.mxu0 %v5172_v37 }
 0x283   :  { %1943 = vmatprep.subr.bf16.mxu0 %v5193_v33  ;;  %2024 = vmatpush1.bf16.msra.mxu1 %v5179_v54 }
 0x284   :  { %2025 = vmatprep.subr.bf16.mxu1 %v5201_v48 }
 0x286   :  { %1944 = vmatpush1.bf16.msra.mxu0 %v5199_v58 }
 0x287   :  { %1945 = vmatprep.subr.bf16.mxu0 %v5220_v12  ;;  %2026 = vmatpush1.bf16.msra.mxu1 %v5206_v63 }
 0x288   :  { %2027 = vmatprep.subr.bf16.mxu1 %v5228_v16 }
 0x28a   :  { %1946 = vmatpush1.bf16.msra.mxu0 %v5226_v11 }
 0x28b   :  { %1947 = vmatprep.subr.bf16.mxu0 %v5247_v35  ;;  %2028 = vmatpush1.bf16.msra.mxu1 %v5233_v53 }
 0x28c   :  { %2029 = vmatprep.subr.bf16.mxu1 %v5255_v0 }
 0x28e   :  { %1948 = vmatpush1.bf16.msra.mxu0 %v5253_v62 }
 0x28f   :  { %1949 = vmatprep.subr.bf16.mxu0 %v5260_v8  ;;  %2030 = vmatpush1.bf16.msra.mxu1 %v5262_v9 }
 0x290   :  { %2031 = vmatprep.subr.bf16.mxu1 %v5268_v31 }
 0x292   :  { %1950 = vmatpush1.bf16.msra.mxu0 %v5280_v46 }
 0x293   :  { %1951 = vmatprep.subr.bf16.mxu0 %v5287_v42  ;;  %2032 = vmatpush1.bf16.msra.mxu1 %v5283_v18 }
 0x294   :  { %2033 = vmatprep.subr.bf16.mxu1 %v5294_v30 }
 0x296   :  { %1952 = vmatpush1.bf16.msra.mxu0 %v5292_v29  ;;  %v5566_v29 = vld [vmem:[%s6564_s4 + $0x8] sm:$0xff] }
 0x297   :  { %1962 = vmatprep.subr.bf16.mxu0 %v5318_v45  ;;  %2034 = vmatpush1.bf16.msra.mxu1 %v5297_v40  ;;  %v4327_v30 = vcombine.high %v5566_v29, %v5566_v29  ;;  %v1426_v40 = vld [vmem:[%s6562_s0] ss:$8 sm:$0xf] }
 0x298   :  { %2044 = vmatprep.subr.bf16.mxu1 %v5325_v51  ;;  %v1435_v45 = vrot.slane %v1426_v40, %v4835_v22 }
 0x299   :  { %1954 = vmatmul.mubr.bf16.vlgmr.msra.gmra.mrb[8].mxu0 %v4324_v15 }
 0x29a   :  { %1963 = vmatpush1.bf16.msra.mxu0 %v5323_v59  ;;  %2036 = vmatmul.mubr.bf16.vlgmr.msra.gmra.mrb[8].mxu1 %v4324_v15 }
 0x29b   :  { %1964 = vmatprep.subr.bf16.mxu0 %v5341_v7  ;;  %2045 = vmatpush1.bf16.msra.mxu1 %v5328_v2  ;;  %v1439_v7 = vrot.slane %v1426_v40, %v4838_v23 }
 0x29c   :  { %2046 = vmatprep.subr.bf16.mxu1 %v5346_v26  ;;  %4328 = vmatprep.mubr.msk.bf16.mxu0 %vm1917_vm14, %v4327_v30  ;;  %v1431_v26 = vrot.slane %v1426_v40, %v4829_v20 }
 0x29d   :  { %4329 = vmatprep.mubr.msk.bf16.mxu1 %vm1917_vm14, %v4327_v30 }
 0x29e   :  { %1965 = vmatpush1.bf16.msra.mxu0 %v5344_v25 }
 0x29f   :  { %1966 = vmatprep.subr.bf16.mxu0 %v5358_v13  ;;  %2047 = vmatpush1.bf16.msra.mxu1 %v5348_v27  ;;  %v1443_v27 = vrot.slane %v1426_v40, %v4832_v21 }
 0x2a0   :  { %2048 = vmatprep.subr.bf16.mxu1 %v5370_v47 }
 0x2a2   :  { %1967 = vmatpush1.bf16.msra.mxu0 %v5368_v34 }
 0x2a3   :  { %2049 = vmatpush1.bf16.msra.mxu1 %v5372_v61 }
 0x32c   :  { %v1313_v37 = vpop.f32.mrb[4].mxu0 }
 0x32d   :  { %vm1402_vm1 = vcmp.gt.f32.partialorder %v1313_v37, 0.0  ;;  %v1406_v50 = vmul.f32 0.2, %v1313_v37  ;;  %v1315_v54 = vpop.f32.mrb[5].mxu0  ;;  %v1395_v33 = vpop.f32.mrb[4].mxu1 }
 0x32e   :  { %vm1403_vm2 = vcmp.gt.f32.partialorder %v1315_v54, 0.0  ;;  %v1407_v58 = vmul.f32 0.2, %v1315_v54  ;;  %vm1404_vm12 = vcmp.gt.f32.partialorder %v1395_v33, 0.0  ;;  %v1408_v48 = vmul.f32 0.2, %v1395_v33 }
 0x32f   :  { %v1410_v63 = vsel %vm1402_vm1, %v1313_v37, %v1406_v50  ;;  %v1317_v12 = vpop.f32.mrb[6].mxu0  ;;  %v1397_v11 = vpop.f32.mrb[5].mxu1 }
 0x330   :  { %v1598_v16 = vpack.c.bf16 %v1410_v63, %v1410_v63  ;;  %v1411_v53 = vsel %vm1403_vm2, %v1315_v54, %v1407_v58  ;;  %v1412_v35 = vsel %vm1404_vm12, %v1395_v33, %v1408_v48  ;;  %vm1405_vm13 = vcmp.gt.f32.partialorder %v1397_v11, 0.0  ;;  %v1318_v62 = vpop.f32.mrb[7].mxu0  ;;  %v1399_v0 = vpop.f32.mrb[6].mxu1  ;;  %1414 = vrot.lane.b32.xlu0 %v1410_v63, %s4467_s9 }
 0x331   :  { %v1599_v8 = vpack.c.bf16 %v1411_v53, %v1411_v53  ;;  %v1600_v9 = vpack.c.bf16 %v1412_v35, %v1412_v35  ;;  %v1409_v31 = vmul.f32 0.2, %v1397_v11  ;;  %v1400_v46 = vpop.f32.mrb[7].mxu1  ;;  %1416 = vrot.lane.b32.xlu1 %v1411_v53, %s4467_s9  ;;  %v1481_v58 = vrot.slane %v4317_v24, %v4835_v22 }
 0x332   :  { %1602 = vst [vmem:[#allocation2 + $0x2e0] sm:$0xf] %v1598_v16  ;;  %v1477_v0 = vrot.slane %v4317_v24, %v4829_v20  ;;  %vm2641_vm12 = vcmask 654336  }
 0x333   :  { %1603 = vst [vmem:[#allocation2 + $0x2e8] sm:$0xf] %v1599_v8  ;;  %1604 = vst [vmem:[#allocation2 + $0x2f0] sm:$0xf] %v1600_v9  ;;  %v1413_v18 = vsel %vm1405_vm13, %v1397_v11, %v1409_v31  ;;  %v1489_v8 = vrot.slane %v4317_v24, %v4832_v21 }
 0x334   :  { %v1601_v42 = vpack.c.bf16 %v1413_v18, %v1413_v18  ;;  %1418 = vrot.lane.b32.xlu0 %v1412_v35, %s4467_s9  ;;  %v4318_v31 = vld [vmem:[%s6562_s0 + $0x2] ss:$8 sm:$0xf] }
 0x335   :  { %1420 = vrot.lane.b32.xlu1 %v1413_v18, %s4467_s9 }
 0x336   :  { %1605 = vst [vmem:[#allocation2 + $0x2f8] sm:$0xf] %v1601_v42 }
 0x338   :  { %1460 = vrot.lane.b32.xlu0 %v1410_v63, %s4469_s10 }
 0x339   :  { %1462 = vrot.lane.b32.xlu1 %v1411_v53, %s4469_s10 }
 0x33c   :  { %1464 = vrot.lane.b32.xlu0 %v1412_v35, %s4469_s10 }
 0x33d   :  { %1466 = vrot.lane.b32.xlu1 %v1413_v18, %s4469_s10 }
 0x340   :  { %1506 = vrot.lane.b32.xlu0 %v1410_v63, %s4472_s11 }
 0x341   :  { %1508 = vrot.lane.b32.xlu1 %v1411_v53, %s4472_s11 }
 0x344   :  { %1510 = vrot.lane.b32.xlu0 %v1412_v35, %s4472_s11 }
 0x345   :  { %1512 = vrot.lane.b32.xlu1 %v1413_v18, %s4472_s11 }
 0x348   :  { %1552 = vrot.lane.b32.xlu0 %v1410_v63, %s4473_s12 }
 0x349   :  { %1554 = vrot.lane.b32.xlu1 %v1411_v53, %s4473_s12 }
 0x34c   :  { %1556 = vrot.lane.b32.xlu0 %v1412_v35, %s4473_s12 }
 0x34d   :  { %1558 = vrot.lane.b32.xlu1 %v1413_v18, %s4473_s12 }
 0x350   :  { %1606 = vrot.lane.b32.xlu0 %v1410_v63, %s4474_s13 }
 0x351   :  { %1608 = vrot.lane.b32.xlu1 %v1411_v53, %s4474_s13 }
 0x354   :  { %1610 = vrot.lane.b32.xlu0 %v1412_v35, %s4474_s13 }
 0x355   :  { %1612 = vrot.lane.b32.xlu1 %v1413_v18, %s4474_s13 }
 0x358   :  { %1652 = vrot.lane.b32.xlu0 %v1410_v63, %s4475_s14 }
 0x359   :  { %1654 = vrot.lane.b32.xlu1 %v1411_v53, %s4475_s14 }
 0x35c   :  { %1656 = vrot.lane.b32.xlu0 %v1412_v35, %s4475_s14 }
 0x35d   :  { %1658 = vrot.lane.b32.xlu1 %v1413_v18, %s4475_s14 }
 0x360   :  { %1698 = vrot.lane.b32.xlu0 %v1410_v63, %s4476_s15 }
 0x361   :  { %1700 = vrot.lane.b32.xlu1 %v1411_v53, %s4476_s15 }
 0x364   :  { %1702 = vrot.lane.b32.xlu0 %v1412_v35, %s4476_s15 }
 0x365   :  { %1704 = vrot.lane.b32.xlu1 %v1413_v18, %s4476_s15 }
 0x368   :  { %1744 = vrot.lane.b32.xlu0 %v1410_v63, %s4477_s16 }
 0x369   :  { %1746 = vrot.lane.b32.xlu1 %v1411_v53, %s4477_s16 }
 0x36c   :  { %1748 = vrot.lane.b32.xlu0 %v1412_v35, %s4477_s16  ;;  %v1485_v35 = vrot.slane %v4317_v24, %v4838_v23 }
 0x36d   :  { %1750 = vrot.lane.b32.xlu1 %v1413_v18, %s4477_s16 }
 0x3a2   :  { %v1415_v59 = vpop.permute.xlu0 %1414 }
 0x3a3   :  { %v1417_v51 = vpop.permute.xlu1 %1416 }
 0x3a4   :  { %v1424_v2 = vsel %vm242_vm4, %v1415_v59, %v1417_v51 }
 0x3a5   :  { %v1449_v25 = vmul.f32 %v1435_v45, %v1424_v2 }
 0x3a6   :  { %v1419_v13 = vpop.permute.xlu0 %1418 }
 0x3a7   :  { %v1453_v34 = vpack.c.bf16 %v1449_v25, %v1449_v25  ;;  %v1423_v47 = vsel %vm242_vm4, %v1417_v51, %v1419_v13  ;;  %v1421_v61 = vpop.permute.xlu1 %1420 }
 0x3a8   :  { %v1450_v15 = vmul.f32 %v1439_v7, %v1423_v47  ;;  %v1422_v37 = vsel %vm242_vm4, %v1419_v13, %v1421_v61  ;;  %v1425_v50 = vsel %vm242_vm4, %v1421_v61, %v1415_v59  ;;  %v1527_v7 = vrot.slane %v4318_v31, %v4835_v22 }
 0x3a9   :  { %1457 = vst [vmem:[#allocation2 + $0x268] sm:$0xf] %v1453_v34  ;;  %v1448_v54 = vmul.f32 %v1431_v26, %v1425_v50  ;;  %v1451_v33 = vmul.f32 %v1443_v27, %v1422_v37 }
 0x3aa   :  { %v1454_v48 = vpack.c.bf16 %v1450_v15, %v1450_v15  ;;  %v1461_v63 = vpop.permute.xlu0 %1460  ;;  %v1531_v15 = vrot.slane %v4318_v31, %v4838_v23 }
 0x3ab   :  { %v1452_v12 = vpack.c.bf16 %v1448_v54, %v1448_v54  ;;  %v1455_v11 = vpack.c.bf16 %v1451_v33, %v1451_v33  ;;  %v1463_v16 = vpop.permute.xlu1 %1462  ;;  %v1523_v54 = vrot.slane %v4318_v31, %v4829_v20  ;;  %v1535_v33 = vrot.slane %v4318_v31, %v4832_v21 }
 0x3ac   :  { %1458 = vst [vmem:[#allocation2 + $0x270] sm:$0xf] %v1454_v48  ;;  %v1470_v53 = vsel %vm289_vm5, %v1461_v63, %v1463_v16  ;;  %v4319_v48 = vld [vmem:[%s6562_s0 + $0x3] ss:$8 sm:$0xf] }
 0x3ad   :  { %1456 = vst [vmem:[#allocation2 + $0x260] sm:$0xf] %v1452_v12  ;;  %1459 = vst [vmem:[#allocation2 + $0x278] sm:$0xf] %v1455_v11  ;;  %v1495_v62 = vmul.f32 %v1481_v58, %v1470_v53 }
 0x3ae   :  { %v1465_v9 = vpop.permute.xlu0 %1464 }
 0x3af   :  { %v1499_v46 = vpack.c.bf16 %v1495_v62, %v1495_v62  ;;  %v1469_v18 = vsel %vm289_vm5, %v1463_v16, %v1465_v9  ;;  %v1467_v42 = vpop.permute.xlu1 %1466 }
 0x3b0   :  { %v1496_v30 = vmul.f32 %v1485_v35, %v1469_v18  ;;  %v1468_v40 = vsel %vm289_vm5, %v1465_v9, %v1467_v42  ;;  %v1471_v45 = vsel %vm289_vm5, %v1467_v42, %v1461_v63  ;;  %v5605_v59 = vld [vmem:[#allocation2 + $0x268] sm:$0xff]  ;;  %v1573_v9 = vrot.slane %v4319_v48, %v4835_v22 }
 0x3b1   :  { %1503 = vst [vmem:[#allocation2 + $0x288] sm:$0xf] %v1499_v46  ;;  %v1494_v51 = vmul.f32 %v1477_v0, %v1471_v45  ;;  %v1497_v2 = vmul.f32 %v1489_v8, %v1468_v40  ;;  %1968 = vmatprep.subr.bf16.mxu0 %v5605_v59 }
 0x3b2   :  { %v1500_v25 = vpack.c.bf16 %v1496_v30, %v1496_v30  ;;  %v1507_v26 = vpop.permute.xlu0 %1506 }
 0x3b3   :  { %v1498_v27 = vpack.c.bf16 %v1494_v51, %v1494_v51  ;;  %v1501_v13 = vpack.c.bf16 %v1497_v2, %v1497_v2  ;;  %v1509_v24 = vpop.permute.xlu1 %1508  ;;  %v5618_v50 = vld [vmem:[#allocation2 + $0x270] sm:$0xff]  ;;  %v1577_v2 = vrot.slane %v4319_v48, %v4838_v23 }
 0x3b4   :  { %1504 = vst [vmem:[#allocation2 + $0x290] sm:$0xf] %v1500_v25  ;;  %v1516_v34 = vsel %vm337_vm6, %v1507_v26, %v1509_v24  ;;  %v5611_v47 = vld [vmem:[#allocation2 + $0x260] sm:$0xff]  ;;  %v5613_v61 = vld [vmem:[#allocation2 + $0x278] sm:$0xff] }
 0x3b5   :  { %1502 = vst [vmem:[#allocation2 + $0x280] sm:$0xf] %v1498_v27  ;;  %1505 = vst [vmem:[#allocation2 + $0x298] sm:$0xf] %v1501_v13  ;;  %v1541_v37 = vmul.f32 %v1527_v7, %v1516_v34  ;;  %1969 = vmatpush1.bf16.msra.mxu0 %v5611_v47  ;;  %2050 = vmatprep.subr.bf16.mxu1 %v5613_v61  ;;  %v1581_v27 = vrot.slane %v4319_v48, %v4832_v21 }
 0x3b6   :  { %v1511_v58 = vpop.permute.xlu0 %1510  ;;  %2051 = vmatpush1.bf16.msra.mxu1 %v5618_v50 }
 0x3b7   :  { %v1545_v63 = vpack.c.bf16 %v1541_v37, %v1541_v37  ;;  %v1515_v12 = vsel %vm337_vm6, %v1509_v24, %v1511_v58  ;;  %v1513_v11 = vpop.permute.xlu1 %1512  ;;  %v4320_v24 = vld [vmem:[%s6562_s0 + $0x5] ss:$8 sm:$0xf] }
 0x3b8   :  { %v1542_v16 = vmul.f32 %v1531_v15, %v1515_v12  ;;  %v1514_v53 = vsel %vm337_vm6, %v1511_v58, %v1513_v11  ;;  %v1517_v35 = vsel %vm337_vm6, %v1513_v11, %v1507_v26  ;;  %v5632_v62 = vld [vmem:[#allocation2 + $0x288] sm:$0xff]  ;;  %v1569_v26 = vrot.slane %v4319_v48, %v4829_v20 }
 0x3b9   :  { %1549 = vst [vmem:[#allocation2 + $0x2a8] sm:$0xf] %v1545_v63  ;;  %v1540_v0 = vmul.f32 %v1523_v54, %v1517_v35  ;;  %v1543_v8 = vmul.f32 %v1535_v33, %v1514_v53  ;;  %1970 = vmatprep.subr.bf16.mxu0 %v5632_v62  ;;  %v1623_v11 = vrot.slane %v4320_v24, %v4829_v20 }
 0x3ba   :  { %v1546_v31 = vpack.c.bf16 %v1542_v16, %v1542_v16  ;;  %v1553_v46 = vpop.permute.xlu0 %1552 }
 0x3bb   :  { %v1544_v18 = vpack.c.bf16 %v1540_v0, %v1540_v0  ;;  %v1547_v42 = vpack.c.bf16 %v1543_v8, %v1543_v8  ;;  %v1555_v30 = vpop.permute.xlu1 %1554  ;;  %v5645_v25 = vld [vmem:[#allocation2 + $0x290] sm:$0xff] }
 0x3bc   :  { %1550 = vst [vmem:[#allocation2 + $0x2b0] sm:$0xf] %v1546_v31  ;;  %v1562_v40 = vsel %vm385_vm7, %v1553_v46, %v1555_v30  ;;  %v5638_v45 = vld [vmem:[#allocation2 + $0x280] sm:$0xff]  ;;  %v5640_v51 = vld [vmem:[#allocation2 + $0x298] sm:$0xff] }
 0x3bd   :  { %1548 = vst [vmem:[#allocation2 + $0x2a0] sm:$0xf] %v1544_v18  ;;  %1551 = vst [vmem:[#allocation2 + $0x2b8] sm:$0xf] %v1547_v42  ;;  %v1587_v7 = vmul.f32 %v1573_v9, %v1562_v40  ;;  %1971 = vmatpush1.bf16.msra.mxu0 %v5638_v45  ;;  %2052 = vmatprep.subr.bf16.mxu1 %v5640_v51  ;;  %v1627_v18 = vrot.slane %v4320_v24, %v4835_v22 }
 0x3be   :  { %v1557_v13 = vpop.permute.xlu0 %1556  ;;  %2053 = vmatpush1.bf16.msra.mxu1 %v5645_v25  ;;  %v1631_v40 = vrot.slane %v4320_v24, %v4838_v23 }
 0x3bf   :  { %v1591_v34 = vpack.c.bf16 %v1587_v7, %v1587_v7  ;;  %v1561_v15 = vsel %vm385_vm7, %v1555_v30, %v1557_v13  ;;  %v1559_v37 = vpop.permute.xlu1 %1558 }
 0x3c0   :  { %v1588_v54 = vmul.f32 %v1577_v2, %v1561_v15  ;;  %v1560_v33 = vsel %vm385_vm7, %v1557_v13, %v1559_v37  ;;  %v1563_v58 = vsel %vm385_vm7, %v1559_v37, %v1553_v46  ;;  %v5659_v48 = vld [vmem:[#allocation2 + $0x2a8] sm:$0xff]  ;;  %v1635_v2 = vrot.slane %v4320_v24, %v4832_v21 }
 0x3c1   :  { %1595 = vst [vmem:[#allocation2 + $0x2c8] sm:$0xf] %v1591_v34  ;;  %v1586_v63 = vmul.f32 %v1569_v26, %v1563_v58  ;;  %v1589_v12 = vmul.f32 %v1581_v27, %v1560_v33  ;;  %1972 = vmatprep.subr.bf16.mxu0 %v5659_v48  ;;  %v4321_v26 = vld [vmem:[%s6562_s0 + $0x6] ss:$8 sm:$0xf] }
 0x3c2   :  { %v1592_v16 = vpack.c.bf16 %v1588_v54, %v1588_v54  ;;  %v1607_v53 = vpop.permute.xlu0 %1606 }
 0x3c3   :  { %v1590_v35 = vpack.c.bf16 %v1586_v63, %v1586_v63  ;;  %v1593_v0 = vpack.c.bf16 %v1589_v12, %v1589_v12  ;;  %v1609_v8 = vpop.permute.xlu1 %1608  ;;  %v5672_v30 = vld [vmem:[#allocation2 + $0x2b0] sm:$0xff]  ;;  %v1669_v63 = vrot.slane %v4321_v26, %v4829_v20 }
 0x3c4   :  { %1596 = vst [vmem:[#allocation2 + $0x2d0] sm:$0xf] %v1592_v16  ;;  %v1616_v9 = vsel %vm441_vm8, %v1607_v53, %v1609_v8  ;;  %v5665_v31 = vld [vmem:[#allocation2 + $0x2a0] sm:$0xff]  ;;  %v5667_v46 = vld [vmem:[#allocation2 + $0x2b8] sm:$0xff] }
 0x3c5   :  { %1594 = vst [vmem:[#allocation2 + $0x2c0] sm:$0xf] %v1590_v35  ;;  %1597 = vst [vmem:[#allocation2 + $0x2d8] sm:$0xf] %v1593_v0  ;;  %v1640_v42 = vmul.f32 %v1623_v11, %v1616_v9  ;;  %1973 = vmatpush1.bf16.msra.mxu0 %v5665_v31  ;;  %2054 = vmatprep.subr.bf16.mxu1 %v5667_v46 }
 0x3c6   :  { %v1611_v7 = vpop.permute.xlu0 %1610  ;;  %2055 = vmatpush1.bf16.msra.mxu1 %v5672_v30 }
 0x3c7   :  { %v1644_v27 = vpack.c.bf16 %v1640_v42, %v1640_v42  ;;  %v1615_v13 = vsel %vm441_vm8, %v1609_v8, %v1611_v7  ;;  %v1613_v34 = vpop.permute.xlu1 %1612 }
 0x3c8   :  { %v1641_v15 = vmul.f32 %v1627_v18, %v1615_v13  ;;  %v1614_v37 = vsel %vm441_vm8, %v1611_v7, %v1613_v34  ;;  %v1617_v54 = vsel %vm441_vm8, %v1613_v34, %v1607_v53  ;;  %v5686_v24 = vld [vmem:[#allocation2 + $0x2c8] sm:$0xff]  ;;  %v1673_v18 = vrot.slane %v4321_v26, %v4835_v22  ;;  %v5707_v34 = vld [vmem:[#allocation2 + $0x2f8] sm:$0xff] }
 0x3c9   :  { %1648 = vst [vmem:[#allocation2 + $0x300] sm:$0xf] %v1644_v27  ;;  %v1642_v33 = vmul.f32 %v1631_v40, %v1614_v37  ;;  %v1643_v58 = vmul.f32 %v1635_v2, %v1617_v54  ;;  %1974 = vmatprep.subr.bf16.mxu0 %v5686_v24  ;;  %v5699_v40 = vld [vmem:[#allocation2 + $0x2e8] sm:$0xff]  ;;  %v1677_v7 = vrot.slane %v4321_v26, %v4838_v23  ;;  %6631 = vst [vmem:[#allocation28_spill] sm:$0xff] %v5707_v34 }
 0x3ca   :  { %v1645_v12 = vpack.c.bf16 %v1641_v15, %v1641_v15  ;;  %v1653_v11 = vpop.permute.xlu0 %1652  ;;  %6629 = vst [vmem:[#allocation26_spill] sm:$0xff] %v5699_v40  ;;  %v1681_v27 = vrot.slane %v4321_v26, %v4832_v21  ;;  %v4322_v15 = vld [vmem:[%s6562_s0 + $0x7] ss:$8 sm:$0xf] }
 0x3cb   :  { %v1646_v16 = vpack.c.bf16 %v1642_v33, %v1642_v33  ;;  %v1647_v35 = vpack.c.bf16 %v1643_v58, %v1643_v58  ;;  %v1655_v0 = vpop.permute.xlu1 %1654  ;;  %v5701_v2 = vld [vmem:[#allocation2 + $0x2d0] sm:$0xff] }
 0x3cc   :  { %1649 = vst [vmem:[#allocation2 + $0x308] sm:$0xf] %v1645_v12  ;;  %v1662_v8 = vsel %vm489_vm9, %v1653_v11, %v1655_v0  ;;  %v5692_v9 = vld [vmem:[#allocation2 + $0x2c0] sm:$0xff]  ;;  %v5694_v53 = vld [vmem:[#allocation2 + $0x2d8] sm:$0xff]  ;;  %6630 = vst [vmem:[#allocation27_spill] sm:$0xff] %v5701_v2 }
 0x3cd   :  { %6628 = vst [vmem:[#allocation25_spill] sm:$0xff] %v5692_v9  ;;  %1650 = vst [vmem:[#allocation2 + $0x310] sm:$0xf] %v1646_v16  ;;  %v1686_v42 = vmul.f32 %v1669_v63, %v1662_v8  ;;  %1975 = vmatpush1.bf16.msra.mxu0 %v5692_v9  ;;  %2056 = vmatprep.subr.bf16.mxu1 %v5694_v53  ;;  %v5719_v12 = vld [vmem:[#allocation2 + $0x2e0] sm:$0xff]  ;;  %v5722_v8 = vld [vmem:[#allocation2 + $0x2f0] sm:$0xff] }
 0x3ce   :  { %1651 = vst [vmem:[#allocation2 + $0x318] sm:$0xf] %v1647_v35  ;;  %v1657_v13 = vpop.permute.xlu0 %1656  ;;  %1976 = vmatprep.subr.bf16.mxu0 %v5699_v40  ;;  %2057 = vmatpush1.bf16.msra.mxu1 %v5701_v2  ;;  %6632 = vst [vmem:[#allocation29_spill] sm:$0xff] %v5719_v12 }
 0x3cf   :  { %v1690_v37 = vpack.c.bf16 %v1686_v42, %v1686_v42  ;;  %v1661_v54 = vsel %vm489_vm9, %v1655_v0, %v1657_v13  ;;  %2058 = vmatprep.subr.bf16.mxu1 %v5707_v34  ;;  %v1659_v33 = vpop.permute.xlu1 %1658  ;;  %6633 = vst [vmem:[#allocation30_spill] sm:$0xff] %v5722_v8  ;;  %v1715_v0 = vrot.slane %v4322_v15, %v4829_v20 }
 0x3d0   :  { %v1687_v58 = vmul.f32 %v1673_v18, %v1661_v54  ;;  %v1660_v26 = vsel %vm489_vm9, %v1657_v13, %v1659_v33  ;;  %v1663_v63 = vsel %vm489_vm9, %v1659_v33, %v1653_v11 }
 0x3d1   :  { %1694 = vst [vmem:[#allocation2 + $0x320] sm:$0xf] %v1690_v37  ;;  %v1688_v16 = vmul.f32 %v1677_v7, %v1660_v26  ;;  %v1689_v35 = vmul.f32 %v1681_v27, %v1663_v63  ;;  %1977 = vmatpush1.bf16.msra.mxu0 %v5719_v12  ;;  %v5731_v7 = vld [vmem:[#allocation2 + $0x300] sm:$0xff]  ;;  %v1719_v37 = vrot.slane %v4322_v15, %v4835_v22 }
 0x3d2   :  { %v1691_v42 = vpack.c.bf16 %v1687_v58, %v1687_v58  ;;  %v1699_v34 = vpop.permute.xlu0 %1698  ;;  %2059 = vmatpush1.bf16.msra.mxu1 %v5722_v8  ;;  %6635 = vst [vmem:[#allocation32_spill] sm:$0xff] %v5731_v7  ;;  %v1723_v26 = vrot.slane %v4322_v15, %v4838_v23  ;;  %v1727_v63 = vrot.slane %v4322_v15, %v4832_v21 }
 0x3d3   :  { %v1692_v18 = vpack.c.bf16 %v1688_v16, %v1688_v16  ;;  %v1693_v13 = vpack.c.bf16 %v1689_v35, %v1689_v35  ;;  %v1701_v54 = vpop.permute.xlu1 %1700  ;;  %v5726_v2 = vld [vmem:[#allocation2 + $0x308] sm:$0xff] }
 0x3d4   :  { %6634 = vst [vmem:[#allocation31_spill] sm:$0xff] %v5726_v2  ;;  %1695 = vst [vmem:[#allocation2 + $0x328] sm:$0xf] %v1691_v42  ;;  %v1708_v11 = vsel %vm537_vm10, %v1699_v34, %v1701_v54  ;;  %1978 = vmatprep.subr.bf16.mxu0 %v5726_v2  ;;  %v5736_v33 = vld [vmem:[#allocation2 + $0x310] sm:$0xff] }
 0x3d5   :  { %v5733_v27 = vld [vmem:[#allocation2 + $0x318] sm:$0xff]  ;;  %6637 = vst [vmem:[#allocation34_spill] sm:$0xff] %v5736_v33  ;;  %1696 = vst [vmem:[#allocation2 + $0x330] sm:$0xf] %v1692_v18  ;;  %v1732_v58 = vmul.f32 %v1715_v0, %v1708_v11  ;;  %1979 = vmatpush1.bf16.msra.mxu0 %v5731_v7 }
 0x3d6   :  { %6636 = vst [vmem:[#allocation33_spill] sm:$0xff] %v5733_v27  ;;  %1697 = vst [vmem:[#allocation2 + $0x338] sm:$0xf] %v1693_v13  ;;  %2060 = vmatprep.subr.bf16.mxu1 %v5733_v27  ;;  %v1703_v16 = vpop.permute.xlu0 %1702  ;;  %v4323_v35 = vld [vmem:[%s6562_s0 + $0x20] ss:$8 sm:$0xf] }
 0x3d7   :  { %2061 = vmatpush1.bf16.msra.mxu1 %v5736_v33  ;;  %v1736_v42 = vpack.c.bf16 %v1732_v58, %v1732_v58  ;;  %v1707_v18 = vsel %vm537_vm10, %v1701_v54, %v1703_v16  ;;  %v1705_v0 = vpop.permute.xlu1 %1704  ;;  %v1761_v33 = vrot.slane %v4323_v35, %v4829_v20 }
 0x3d8   :  { %v1733_v13 = vmul.f32 %v1719_v37, %v1707_v18  ;;  %v1706_v11 = vsel %vm537_vm10, %v1703_v16, %v1705_v0  ;;  %v1709_v7 = vsel %vm537_vm10, %v1705_v0, %v1699_v34  ;;  %v5758_v37 = vld [vmem:[#allocation2 + $0x320] sm:$0xff] }
 0x3d9   :  { %1740 = vst [vmem:[#allocation2 + $0x340] sm:$0xf] %v1736_v42  ;;  %v1734_v15 = vmul.f32 %v1723_v26, %v1706_v11  ;;  %v1735_v27 = vmul.f32 %v1727_v63, %v1709_v7  ;;  %v1765_v7 = vrot.slane %v4323_v35, %v4835_v22  ;;  %v1773_v63 = vrot.slane %v4323_v35, %v4832_v21 }
 0x3da   :  { %v1737_v8 = vpack.c.bf16 %v1733_v13, %v1733_v13  ;;  %v1745_v2 = vpop.permute.xlu0 %1744 }
 0x3db   :  { %v1738_v12 = vpack.c.bf16 %v1734_v15, %v1734_v15  ;;  %v1739_v58 = vpack.c.bf16 %v1735_v27, %v1735_v27  ;;  %v1747_v40 = vpop.permute.xlu1 %1746  ;;  %v5753_v9 = vld [vmem:[#allocation2 + $0x328] sm:$0xff] }
 0x3dc   :  { %1741 = vst [vmem:[#allocation2 + $0x348] sm:$0xf] %v1737_v8  ;;  %v1754_v54 = vsel %vm585_vm11, %v1745_v2, %v1747_v40  ;;  %1980 = vmatprep.subr.bf16.mxu0 %v5753_v9  ;;  %v5763_v26 = vld [vmem:[#allocation2 + $0x330] sm:$0xff]  ;;  %v1769_v8 = vrot.slane %v4323_v35, %v4838_v23 }
 0x3dd   :  { %v5760_v34 = vld [vmem:[#allocation2 + $0x338] sm:$0xff]  ;;  %1742 = vst [vmem:[#allocation2 + $0x350] sm:$0xf] %v1738_v12  ;;  %1743 = vst [vmem:[#allocation2 + $0x358] sm:$0xf] %v1739_v58  ;;  %v1778_v27 = vmul.f32 %v1761_v33, %v1754_v54  ;;  %1981 = vmatpush1.bf16.msra.mxu0 %v5758_v37 }
 0x3de   :  { %2062 = vmatprep.subr.bf16.mxu1 %v5760_v34  ;;  %v1749_v16 = vpop.permute.xlu0 %1748 }
 0x3df   :  { %2063 = vmatpush1.bf16.msra.mxu1 %v5763_v26  ;;  %v1782_v42 = vpack.c.bf16 %v1778_v27, %v1778_v27  ;;  %v1753_v18 = vsel %vm585_vm11, %v1747_v40, %v1749_v16  ;;  %v1751_v0 = vpop.permute.xlu1 %1750 }
 0x3e0   :  { %v1779_v13 = vmul.f32 %v1765_v7, %v1753_v18  ;;  %v1752_v12 = vsel %vm585_vm11, %v1749_v16, %v1751_v0  ;;  %v1755_v33 = vsel %vm585_vm11, %v1751_v0, %v1745_v2  ;;  %v5779_v40 = vld [vmem:[#allocation2 + $0x340] sm:$0xff]  ;;  %v4326_v18 = vcombine.low %v5566_v29, %v5566_v29  ;;  %v6653_v29 = vld [vmem:[#allocation22_spill] sm:$0xff] }
 0x3e1   :  { %1786 = vst [vmem:[#allocation2 + $0x360] sm:$0xf] %v1782_v42  ;;  %v1780_v11 = vmul.f32 %v1769_v8, %v1752_v12  ;;  %v1781_v15 = vmul.f32 %v1773_v63, %v1755_v33  ;;  %v5793_v8 = vld [vmem:[%s6565_s5] sm:$0xff]  ;;  %v6655_v12 = vld [vmem:[#allocation24_spill] sm:$0xff] }
 0x3e2   :  { %v1783_v58 = vpack.c.bf16 %v1779_v13, %v1779_v13  ;;  %v4338_v0 = vcombine.high %v5793_v8, %v5793_v8  ;;  %v6654_v13 = vld [vmem:[#allocation23_spill] sm:$0xff]  ;;  %v2517_v33 = vld [vmem:[#allocation2 + $0x148] sm:$0xff] }
 0x3e3   :  { %v1784_v35 = vpack.c.bf16 %v1780_v11, %v1780_v11  ;;  %v1785_v54 = vpack.c.bf16 %v1781_v15, %v1781_v15  ;;  %v5776_v21 = vld [vmem:[#allocation2 + $0x348] sm:$0xff]  ;;  %v2519_v11 = vld [vmem:[#allocation2 + $0x158] sm:$0xff] }
 0x3e4   :  { %1787 = vst [vmem:[#allocation2 + $0x368] sm:$0xf] %v1783_v58  ;;  %1982 = vmatprep.subr.bf16.mxu0 %v5776_v21  ;;  %v5781_v7 = vld [vmem:[#allocation2 + $0x358] sm:$0xff]  ;;  %v5783_v27 = vld [vmem:[#allocation2 + $0x350] sm:$0xff]  ;;  %v2521_v15 = vld [vmem:[#allocation2 + $0x168] sm:$0xff] }
 0x3e5   :  { %1788 = vst [vmem:[#allocation2 + $0x370] sm:$0xf] %v1784_v35  ;;  %1789 = vst [vmem:[#allocation2 + $0x378] sm:$0xf] %v1785_v54  ;;  %1983 = vmatpush1.bf16.msra.mxu0 %v5779_v40  ;;  %2064 = vmatprep.subr.bf16.mxu1 %v5781_v7  ;;  %v2518_v58 = vld [vmem:[#allocation2 + $0x150] sm:$0xff]  ;;  %v2524_v35 = vld [vmem:[#allocation2 + $0x180] sm:$0xff] }
 0x3e6   :  { %2065 = vmatpush1.bf16.msra.mxu1 %v5783_v27  ;;  %v2526_v54 = vld [vmem:[#allocation2 + $0x190] sm:$0xff] }
 0x3e8   :  { %v5796_v63 = vld [vmem:[#allocation2 + $0x360] sm:$0xff] }
 0x3eb   :  { %v5788_v2 = vld [vmem:[#allocation2 + $0x368] sm:$0xff] }
 0x3ec   :  { %1984 = vmatprep.subr.bf16.mxu0 %v5788_v2  ;;  %v5798_v16 = vld [vmem:[#allocation2 + $0x378] sm:$0xff]  ;;  %v5800_v42 = vld [vmem:[#allocation2 + $0x370] sm:$0xff] }
 0x3ed   :  { %1985 = vmatpush1.bf16.msra.mxu0 %v5796_v63  ;;  %2066 = vmatprep.subr.bf16.mxu1 %v5798_v16 }
 0x3ee   :  { %2067 = vmatpush1.bf16.msra.mxu1 %v5800_v42  ;;  %2645 = vmatprep.subr.bf16.mxu0 %v5356_v17  ;;  %v6638_v17 = vld [vmem:[#allocation7_spill] sm:$0xff] }
 0x3ef   :  { %2768 = vmatprep.subr.bf16.mxu1 %v5360_v14  ;;  %v6639_v14 = vld [vmem:[#allocation8_spill] sm:$0xff] }
 0x3f0   :  { %1995 = vmatmul.mubr.bf16.vlgmr.msra.gmra.mrb[8].mxu0 %v4326_v18 }
 0x3f1   :  { %2077 = vmatmul.mubr.bf16.vlgmr.msra.gmra.mrb[8].mxu1 %v4326_v18  ;;  %2646 = vmatpush1.bf16.msra.mxu0 %v5378_v36  ;;  %v6640_v36 = vld [vmem:[#allocation9_spill] sm:$0xff]  ;;  %v2531_v18 = vld [vmem:[#allocation2 + $0x1b8] sm:$0xff] }
 0x3f2   :  { %2647 = vmatprep.subr.bf16.mxu0 %v5386_v28  ;;  %2769 = vmatpush1.bf16.msra.mxu1 %v5381_v38  ;;  %v6641_v38 = vld [vmem:[#allocation11_spill] sm:$0xff]  ;;  %v6642_v28 = vld [vmem:[#allocation13_spill] sm:$0xff] }
 0x3f3   :  { %2770 = vmatprep.subr.bf16.mxu1 %v5390_v32  ;;  %2677 = vmatprep.mubr.bf16.mxu0 %v4338_v0  ;;  %v6643_v32 = vld [vmem:[#allocation10_spill] sm:$0xff] }
 0x3f4   :  { %2800 = vmatprep.mubr.bf16.mxu1 %v4338_v0  ;;  %v2528_v0 = vld [vmem:[#allocation2 + $0x1a0] sm:$0xff] }
 0x3f5   :  { %2648 = vmatpush1.bf16.msra.mxu0 %v5393_v41  ;;  %v6644_v41 = vld [vmem:[#allocation12_spill] sm:$0xff] }
 0x3f6   :  { %2649 = vmatprep.subr.bf16.mxu0 %v5396_v43  ;;  %2771 = vmatpush1.bf16.msra.mxu1 %v5398_v44  ;;  %v6645_v43 = vld [vmem:[#allocation14_spill] sm:$0xff]  ;;  %v6646_v44 = vld [vmem:[#allocation16_spill] sm:$0xff] }
 0x3f7   :  { %2772 = vmatprep.subr.bf16.mxu1 %v5402_v49  ;;  %v6647_v49 = vld [vmem:[#allocation15_spill] sm:$0xff] }
 0x3f9   :  { %2650 = vmatpush1.bf16.msra.mxu0 %v5405_v52  ;;  %v6648_v52 = vld [vmem:[#allocation17_spill] sm:$0xff] }
 0x3fa   :  { %2651 = vmatprep.subr.bf16.mxu0 %v5408_v57  ;;  %2773 = vmatpush1.bf16.msra.mxu1 %v5410_v55  ;;  %v6649_v57 = vld [vmem:[#allocation18_spill] sm:$0xff]  ;;  %v6650_v55 = vld [vmem:[#allocation19_spill] sm:$0xff] }
 0x3fb   :  { %2774 = vmatprep.subr.bf16.mxu1 %v5414_v60  ;;  %v6651_v60 = vld [vmem:[#allocation20_spill] sm:$0xff] }
 0x3fd   :  { %2652 = vmatpush1.bf16.msra.mxu0 %v5417_v56  ;;  %v6652_v56 = vld [vmem:[#allocation21_spill] sm:$0xff] }
 0x3fe   :  { %2653 = vmatprep.subr.bf16.mxu0 %v6638_v17  ;;  %2775 = vmatpush1.bf16.msra.mxu1 %v6639_v14  ;;  %v2533_v17 = vld [vmem:[#allocation2 + $0x1c8] sm:$0xff]  ;;  %v2530_v14 = vld [vmem:[#allocation2 + $0x1b0] sm:$0xff] }
 0x3ff   :  { %2776 = vmatprep.subr.bf16.mxu1 %v6640_v36  ;;  %v2535_v36 = vld [vmem:[#allocation2 + $0x1d8] sm:$0xff] }
 0x401   :  { %2654 = vmatpush1.bf16.msra.mxu0 %v6641_v38  ;;  %v2532_v38 = vld [vmem:[#allocation2 + $0x1c0] sm:$0xff] }
 0x402   :  { %2777 = vmatpush1.bf16.msra.mxu1 %v6642_v28  ;;  %2655 = vmatprep.subr.bf16.mxu0 %v6643_v32  ;;  %v2537_v28 = vld [vmem:[#allocation2 + $0x1e8] sm:$0xff]  ;;  %v2534_v32 = vld [vmem:[#allocation2 + $0x1d0] sm:$0xff] }
 0x403   :  { %2778 = vmatprep.subr.bf16.mxu1 %v6644_v41  ;;  %v2539_v41 = vld [vmem:[#allocation2 + $0x1f8] sm:$0xff] }
 0x405   :  { %2656 = vmatpush1.bf16.msra.mxu0 %v6645_v43  ;;  %v2536_v43 = vld [vmem:[#allocation2 + $0x1e0] sm:$0xff] }
 0x406   :  { %2657 = vmatprep.subr.bf16.mxu0 %v6646_v44  ;;  %2779 = vmatpush1.bf16.msra.mxu1 %v6647_v49  ;;  %v4337_v44 = vcombine.low %v5793_v8, %v5793_v8  ;;  %v2541_v49 = vld [vmem:[#allocation2 + $0x208] sm:$0xff] }
 0x407   :  { %2780 = vmatprep.subr.bf16.mxu1 %v6648_v52  ;;  %v2538_v52 = vld [vmem:[#allocation2 + $0x1f0] sm:$0xff]  ;;  %v2549_v8 = vld [vmem:[#allocation2 + $0x248] sm:$0xff] }
 0x409   :  { %2658 = vmatpush1.bf16.msra.mxu0 %v6649_v57  ;;  %v2543_v57 = vld [vmem:[#allocation2 + $0x218] sm:$0xff] }
 0x40a   :  { %2659 = vmatprep.subr.bf16.mxu0 %v6650_v55  ;;  %2781 = vmatpush1.bf16.msra.mxu1 %v6651_v60  ;;  %v2540_v55 = vld [vmem:[#allocation2 + $0x200] sm:$0xff]  ;;  %v2545_v60 = vld [vmem:[#allocation2 + $0x228] sm:$0xff] }
 0x40b   :  { %2782 = vmatprep.subr.bf16.mxu1 %v6652_v56  ;;  %v2542_v56 = vld [vmem:[#allocation2 + $0x210] sm:$0xff] }
 0x40d   :  { %2660 = vmatpush1.bf16.msra.mxu0 %v6653_v29  ;;  %v2547_v29 = vld [vmem:[#allocation2 + $0x238] sm:$0xff] }
 0x40e   :  { %2661 = vmatprep.subr.bf16.mxu0 %v5468_v4  ;;  %2783 = vmatpush1.bf16.msra.mxu1 %v6654_v13  ;;  %v2516_v4 = vld [vmem:[#allocation2 + $0x140] sm:$0xff] }
 0x40f   :  { %2784 = vmatprep.subr.bf16.mxu1 %v6655_v12  ;;  %v2544_v13 = vld [vmem:[#allocation2 + $0x220] sm:$0xff]  ;;  %v2546_v12 = vld [vmem:[#allocation2 + $0x230] sm:$0xff] }
 0x411   :  { %2662 = vmatpush1.bf16.msra.mxu0 %v5477_v5  ;;  %v2523_v5 = vld [vmem:[#allocation2 + $0x178] sm:$0xff] }
 0x412   :  { %2663 = vmatprep.subr.bf16.mxu0 %v5480_v1  ;;  %2785 = vmatpush1.bf16.msra.mxu1 %v5482_v3  ;;  %v2520_v1 = vld [vmem:[#allocation2 + $0x160] sm:$0xff]  ;;  %v2525_v3 = vld [vmem:[#allocation2 + $0x188] sm:$0xff] }
 0x413   :  { %2786 = vmatprep.subr.bf16.mxu1 %v5486_v10  ;;  %v2522_v10 = vld [vmem:[#allocation2 + $0x170] sm:$0xff] }
 0x415   :  { %2664 = vmatpush1.bf16.msra.mxu0 %v5489_v39  ;;  %v2527_v39 = vld [vmem:[#allocation2 + $0x198] sm:$0xff] }
 0x416   :  { %2665 = vmatprep.subr.bf16.mxu0 %v2517_v33  ;;  %2787 = vmatpush1.bf16.msra.mxu1 %v5492_v6  ;;  %v2529_v6 = vld [vmem:[#allocation2 + $0x1a8] sm:$0xff]  ;;  %v2551_v33 = vld [vmem:[#allocation2 + $0x258] sm:$0xff] }
 0x417   :  { %2788 = vmatprep.subr.bf16.mxu1 %v2519_v11  ;;  %v2548_v11 = vld [vmem:[#allocation2 + $0x240] sm:$0xff] }
 0x419   :  { %2666 = vmatpush1.bf16.msra.mxu0 %v2516_v4  ;;  %v2550_v4 = vld [vmem:[#allocation2 + $0x250] sm:$0xff] }
 0x41a   :  { %2667 = vmatprep.subr.bf16.mxu0 %v2521_v15  ;;  %2789 = vmatpush1.bf16.msra.mxu1 %v2518_v58 }
 0x41b   :  { %2790 = vmatprep.subr.bf16.mxu1 %v2523_v5 }
 0x41d   :  { %2668 = vmatpush1.bf16.msra.mxu0 %v2520_v1 }
 0x41e   :  { %2669 = vmatprep.subr.bf16.mxu0 %v2525_v3  ;;  %2791 = vmatpush1.bf16.msra.mxu1 %v2522_v10  ;;  %v5906_v3 = vld [vmem:[%s6565_s5 + $0x8] sm:$0xff] }
 0x41f   :  { %2792 = vmatprep.subr.bf16.mxu1 %v2527_v39  ;;  %v4340_v10 = vcombine.high %v5906_v3, %v5906_v3  ;;  %v2109_v39 = vld [vmem:[%s6562_s0] ss:$8 sm:$0xf] }
 0x421   :  { %2670 = vmatpush1.bf16.msra.mxu0 %v2524_v35  ;;  %v2118_v35 = vrot.slane %v2109_v39, %v4835_v22 }
 0x422   :  { %2671 = vmatprep.subr.bf16.mxu0 %v2529_v6  ;;  %2793 = vmatpush1.bf16.msra.mxu1 %v2526_v54 }
 0x423   :  { %2794 = vmatprep.subr.bf16.mxu1 %v2531_v18 }
 0x425   :  { %2672 = vmatpush1.bf16.msra.mxu0 %v2528_v0  ;;  %v2122_v0 = vrot.slane %v2109_v39, %v4838_v23 }
 0x426   :  { %2673 = vmatprep.subr.bf16.mxu0 %v2533_v17  ;;  %2795 = vmatpush1.bf16.msra.mxu1 %v2530_v14  ;;  %v2114_v14 = vrot.slane %v2109_v39, %v4829_v20 }
 0x427   :  { %2796 = vmatprep.subr.bf16.mxu1 %v2535_v36  ;;  %v6666_v36 = vld [vmem:[#allocation6_spill] sm:$0xff] }
 0x429   :  { %2674 = vmatpush1.bf16.msra.mxu0 %v2532_v38  ;;  %v2126_v38 = vrot.slane %v2109_v39, %v6666_v36 }
 0x42a   :  { %2675 = vmatprep.subr.bf16.mxu0 %v2537_v28  ;;  %2797 = vmatpush1.bf16.msra.mxu1 %v2534_v32  ;;  %v4330_v32 = vld [vmem:[%s6562_s0 + $0x1] ss:$8 sm:$0xf] }
 0x42b   :  { %2798 = vmatprep.subr.bf16.mxu1 %v2539_v41 }
 0x42d   :  { %2676 = vmatpush1.bf16.msra.mxu0 %v2536_v43 }
 0x42e   :  { %2686 = vmatprep.subr.bf16.mxu0 %v2541_v49  ;;  %2799 = vmatpush1.bf16.msra.mxu1 %v2538_v52 }
 0x42f   :  { %2809 = vmatprep.subr.bf16.mxu1 %v2543_v57 }
 0x430   :  { %2678 = vmatmul.mubr.bf16.vlgmr.msra.gmra.mrb[12].mxu0 %v4337_v44 }
 0x431   :  { %2687 = vmatpush1.bf16.msra.mxu0 %v2540_v55  ;;  %2801 = vmatmul.mubr.bf16.vlgmr.msra.gmra.mrb[12].mxu1 %v4337_v44 }
 0x432   :  { %2688 = vmatprep.subr.bf16.mxu0 %v2545_v60  ;;  %2810 = vmatpush1.bf16.msra.mxu1 %v2542_v56  ;;  %v2164_v56 = vrot.slane %v4330_v32, %v4835_v22 }
 0x433   :  { %2811 = vmatprep.subr.bf16.mxu1 %v2547_v29  ;;  %2718 = vmatprep.mubr.bf16.mxu0 %v4340_v10 }
 0x434   :  { %2841 = vmatprep.mubr.bf16.mxu1 %v4340_v10 }
 0x435   :  { %2689 = vmatpush1.bf16.msra.mxu0 %v2544_v13 }
 0x436   :  { %2690 = vmatprep.subr.bf16.mxu0 %v2549_v8  ;;  %2812 = vmatpush1.bf16.msra.mxu1 %v2546_v12 }
 0x437   :  { %2813 = vmatprep.subr.bf16.mxu1 %v2551_v33 }
 0x439   :  { %2691 = vmatpush1.bf16.msra.mxu0 %v2548_v11 }
 0x43a   :  { %2692 = vmatprep.subr.bf16.mxu0 %v5605_v59  ;;  %2814 = vmatpush1.bf16.msra.mxu1 %v2550_v4  ;;  %v6656_v59 = vld [vmem:[#allocation25_spill] sm:$0xff]  ;;  %v2168_v4 = vrot.slane %v4330_v32, %v4838_v23 }
 0x43b   :  { %2815 = vmatprep.subr.bf16.mxu1 %v5613_v61  ;;  %v6658_v61 = vld [vmem:[#allocation27_spill] sm:$0xff] }
 0x43d   :  { %2693 = vmatpush1.bf16.msra.mxu0 %v5611_v47  ;;  %v6657_v47 = vld [vmem:[#allocation26_spill] sm:$0xff] }
 0x43e   :  { %2694 = vmatprep.subr.bf16.mxu0 %v5632_v62  ;;  %2816 = vmatpush1.bf16.msra.mxu1 %v5618_v50  ;;  %v6659_v50 = vld [vmem:[#allocation28_spill] sm:$0xff]  ;;  %v6660_v62 = vld [vmem:[#allocation29_spill] sm:$0xff] }
 0x43f   :  { %2817 = vmatprep.subr.bf16.mxu1 %v5640_v51  ;;  %v6662_v51 = vld [vmem:[#allocation30_spill] sm:$0xff] }
 0x441   :  { %2695 = vmatpush1.bf16.msra.mxu0 %v5638_v45  ;;  %v6661_v45 = vld [vmem:[#allocation31_spill] sm:$0xff] }
 0x442   :  { %2696 = vmatprep.subr.bf16.mxu0 %v5659_v48  ;;  %2818 = vmatpush1.bf16.msra.mxu1 %v5645_v25  ;;  %v6663_v25 = vld [vmem:[#allocation33_spill] sm:$0xff]  ;;  %v6664_v48 = vld [vmem:[#allocation32_spill] sm:$0xff] }
 0x443   :  { %2819 = vmatprep.subr.bf16.mxu1 %v5667_v46 }
 0x445   :  { %2697 = vmatpush1.bf16.msra.mxu0 %v5665_v31  ;;  %v6665_v31 = vld [vmem:[#allocation34_spill] sm:$0xff] }
 0x446   :  { %2698 = vmatprep.subr.bf16.mxu0 %v5686_v24  ;;  %2820 = vmatpush1.bf16.msra.mxu1 %v5672_v30 }
 0x447   :  { %2821 = vmatprep.subr.bf16.mxu1 %v5694_v53 }
 0x449   :  { %2699 = vmatpush1.bf16.msra.mxu0 %v6656_v59 }
 0x44a   :  { %2700 = vmatprep.subr.bf16.mxu0 %v6657_v47  ;;  %2822 = vmatpush1.bf16.msra.mxu1 %v6658_v61  ;;  %v2160_v47 = vrot.slane %v4330_v32, %v4829_v20  ;;  %v2172_v61 = vrot.slane %v4330_v32, %v6666_v36 }
 0x44b   :  { %2823 = vmatprep.subr.bf16.mxu1 %v6659_v50 }
 0x44d   :  { %2701 = vmatpush1.bf16.msra.mxu0 %v6660_v62  ;;  %v4331_v62 = vld [vmem:[%s6562_s0 + $0x2] ss:$8 sm:$0xf] }
 0x44e   :  { %2702 = vmatprep.subr.bf16.mxu0 %v6661_v45  ;;  %2824 = vmatpush1.bf16.msra.mxu1 %v6662_v51 }
 0x44f   :  { %2825 = vmatprep.subr.bf16.mxu1 %v6663_v25 }
 0x451   :  { %2703 = vmatpush1.bf16.msra.mxu0 %v6664_v48 }
 0x452   :  { %2704 = vmatprep.subr.bf16.mxu0 %v5753_v9  ;;  %2826 = vmatpush1.bf16.msra.mxu1 %v6665_v31 }
 0x453   :  { %2827 = vmatprep.subr.bf16.mxu1 %v5760_v34 }
 0x455   :  { %2705 = vmatpush1.bf16.msra.mxu0 %v5758_v37 }
 0x456   :  { %2706 = vmatprep.subr.bf16.mxu0 %v5776_v21  ;;  %2828 = vmatpush1.bf16.msra.mxu1 %v5763_v26 }
 0x457   :  { %2829 = vmatprep.subr.bf16.mxu1 %v5781_v7 }
 0x459   :  { %2707 = vmatpush1.bf16.msra.mxu0 %v5779_v40 }
 0x45a   :  { %2708 = vmatprep.subr.bf16.mxu0 %v5788_v2  ;;  %2830 = vmatpush1.bf16.msra.mxu1 %v5783_v27 }
 0x45b   :  { %2831 = vmatprep.subr.bf16.mxu1 %v5798_v16 }
 0x45d   :  { %2709 = vmatpush1.bf16.msra.mxu0 %v5796_v63 }
 0x45e   :  { %2832 = vmatpush1.bf16.msra.mxu1 %v5800_v42 }
 0x4c3   :  { %v1996_v46 = vpop.f32.mrb[8].mxu0 }
 0x4c4   :  { %vm2085_vm15 = vcmp.gt.f32.partialorder %v1996_v46, 0.0  ;;  %v2089_v30 = vmul.f32 0.2, %v1996_v46  ;;  %v1998_v21 = vpop.f32.mrb[9].mxu0  ;;  %v2078_v24 = vpop.f32.mrb[8].mxu1 }
 0x4c5   :  { %vm2086_vm0 = vcmp.gt.f32.partialorder %v1998_v21, 0.0  ;;  %v2090_v9 = vmul.f32 0.2, %v1998_v21  ;;  %vm2087_vm1 = vcmp.gt.f32.partialorder %v2078_v24, 0.0  ;;  %v2091_v53 = vmul.f32 0.2, %v2078_v24 }
 0x4c6   :  { %v2093_v37 = vsel %vm2085_vm15, %v1996_v46, %v2089_v30  ;;  %v2000_v34 = vpop.f32.mrb[10].mxu0  ;;  %v2080_v26 = vpop.f32.mrb[9].mxu1 }
 0x4c7   :  { %v2281_v40 = vpack.c.bf16 %v2093_v37, %v2093_v37  ;;  %v2094_v7 = vsel %vm2086_vm0, %v1998_v21, %v2090_v9  ;;  %v2095_v27 = vsel %vm2087_vm1, %v2078_v24, %v2091_v53  ;;  %vm2088_vm2 = vcmp.gt.f32.partialorder %v2080_v26, 0.0  ;;  %v2001_v2 = vpop.f32.mrb[11].mxu0  ;;  %v2082_v63 = vpop.f32.mrb[10].mxu1  ;;  %2097 = vrot.lane.b32.xlu0 %v2093_v37, %s4467_s9 }
 0x4c8   :  { %v2282_v16 = vpack.c.bf16 %v2094_v7, %v2094_v7  ;;  %v2283_v42 = vpack.c.bf16 %v2095_v27, %v2095_v27  ;;  %v2092_v15 = vmul.f32 0.2, %v2080_v26  ;;  %v2083_v58 = vpop.f32.mrb[11].mxu1  ;;  %2099 = vrot.lane.b32.xlu1 %v2094_v7, %s4467_s9  ;;  %v2210_v9 = vrot.slane %v4331_v62, %v4835_v22 }
 0x4c9   :  { %2285 = vst [vmem:[#allocation2 + $0x400] sm:$0xf] %v2281_v40  ;;  %v2214_v63 = vrot.slane %v4331_v62, %v4838_v23  ;;  %v2218_v58 = vrot.slane %v4331_v62, %v6666_v36  ;;  %vm3497_vm1 = vcmask 785408  }
 0x4ca   :  { %2286 = vst [vmem:[#allocation2 + $0x408] sm:$0xf] %v2282_v16  ;;  %2287 = vst [vmem:[#allocation2 + $0x410] sm:$0xf] %v2283_v42  ;;  %v2096_v5 = vsel %vm2088_vm2, %v2080_v26, %v2092_v15  ;;  %v2206_v15 = vrot.slane %v4331_v62, %v4829_v20 }
 0x4cb   :  { %v2284_v1 = vpack.c.bf16 %v2096_v5, %v2096_v5  ;;  %2101 = vrot.lane.b32.xlu0 %v2095_v27, %s4467_s9 }
 0x4cc   :  { %2103 = vrot.lane.b32.xlu1 %v2096_v5, %s4467_s9 }
 0x4cd   :  { %2288 = vst [vmem:[#allocation2 + $0x418] sm:$0xf] %v2284_v1  ;;  %v4332_v1 = vld [vmem:[%s6562_s0 + $0x3] ss:$8 sm:$0xf] }
 0x4cf   :  { %2143 = vrot.lane.b32.xlu0 %v2093_v37, %s4469_s10 }
 0x4d0   :  { %2145 = vrot.lane.b32.xlu1 %v2094_v7, %s4469_s10 }
 0x4d3   :  { %2147 = vrot.lane.b32.xlu0 %v2095_v27, %s4469_s10 }
 0x4d4   :  { %2149 = vrot.lane.b32.xlu1 %v2096_v5, %s4469_s10 }
 0x4d7   :  { %2189 = vrot.lane.b32.xlu0 %v2093_v37, %s4472_s11 }
 0x4d8   :  { %2191 = vrot.lane.b32.xlu1 %v2094_v7, %s4472_s11 }
 0x4db   :  { %2193 = vrot.lane.b32.xlu0 %v2095_v27, %s4472_s11 }
 0x4dc   :  { %2195 = vrot.lane.b32.xlu1 %v2096_v5, %s4472_s11 }
 0x4df   :  { %2235 = vrot.lane.b32.xlu0 %v2093_v37, %s4473_s12 }
 0x4e0   :  { %2237 = vrot.lane.b32.xlu1 %v2094_v7, %s4473_s12 }
 0x4e3   :  { %2239 = vrot.lane.b32.xlu0 %v2095_v27, %s4473_s12 }
 0x4e4   :  { %2241 = vrot.lane.b32.xlu1 %v2096_v5, %s4473_s12 }
 0x4e7   :  { %2289 = vrot.lane.b32.xlu0 %v2093_v37, %s4474_s13 }
 0x4e8   :  { %2291 = vrot.lane.b32.xlu1 %v2094_v7, %s4474_s13 }
 0x4eb   :  { %2293 = vrot.lane.b32.xlu0 %v2095_v27, %s4474_s13 }
 0x4ec   :  { %2295 = vrot.lane.b32.xlu1 %v2096_v5, %s4474_s13 }
 0x4ef   :  { %2335 = vrot.lane.b32.xlu0 %v2093_v37, %s4475_s14 }
 0x4f0   :  { %2337 = vrot.lane.b32.xlu1 %v2094_v7, %s4475_s14 }
 0x4f3   :  { %2339 = vrot.lane.b32.xlu0 %v2095_v27, %s4475_s14 }
 0x4f4   :  { %2341 = vrot.lane.b32.xlu1 %v2096_v5, %s4475_s14 }
 0x4f7   :  { %2381 = vrot.lane.b32.xlu0 %v2093_v37, %s4476_s15 }
 0x4f8   :  { %2383 = vrot.lane.b32.xlu1 %v2094_v7, %s4476_s15 }
 0x4fb   :  { %2385 = vrot.lane.b32.xlu0 %v2095_v27, %s4476_s15 }
 0x4fc   :  { %2387 = vrot.lane.b32.xlu1 %v2096_v5, %s4476_s15 }
 0x4ff   :  { %2427 = vrot.lane.b32.xlu0 %v2093_v37, %s4477_s16 }
 0x500   :  { %2429 = vrot.lane.b32.xlu1 %v2094_v7, %s4477_s16 }
 0x503   :  { %2431 = vrot.lane.b32.xlu0 %v2095_v27, %s4477_s16 }
 0x504   :  { %2433 = vrot.lane.b32.xlu1 %v2096_v5, %s4477_s16 }
 0x539   :  { %v2098_v6 = vpop.permute.xlu0 %2097 }
 0x53a   :  { %v2100_v54 = vpop.permute.xlu1 %2099 }
 0x53b   :  { %v2107_v18 = vsel %vm242_vm4, %v2098_v6, %v2100_v54 }
 0x53c   :  { %v2132_v17 = vmul.f32 %v2118_v35, %v2107_v18 }
 0x53d   :  { %v2102_v28 = vpop.permute.xlu0 %2101 }
 0x53e   :  { %v2136_v41 = vpack.c.bf16 %v2132_v17, %v2132_v17  ;;  %v2106_v43 = vsel %vm242_vm4, %v2100_v54, %v2102_v28  ;;  %v2104_v44 = vpop.permute.xlu1 %2103 }
 0x53f   :  { %v2133_v49 = vmul.f32 %v2122_v0, %v2106_v43  ;;  %v2105_v52 = vsel %vm242_vm4, %v2102_v28, %v2104_v44  ;;  %v2108_v57 = vsel %vm242_vm4, %v2104_v44, %v2098_v6 }
 0x540   :  { %2140 = vst [vmem:[#allocation2 + $0x388] sm:$0xf] %v2136_v41  ;;  %v2131_v55 = vmul.f32 %v2114_v14, %v2108_v57  ;;  %v2134_v60 = vmul.f32 %v2126_v38, %v2105_v52  ;;  %v2256_v38 = vrot.slane %v4332_v1, %v4835_v22 }
 0x541   :  { %v2137_v29 = vpack.c.bf16 %v2133_v49, %v2133_v49  ;;  %v2144_v13 = vpop.permute.xlu0 %2143 }
 0x542   :  { %v2135_v8 = vpack.c.bf16 %v2131_v55, %v2131_v55  ;;  %v2138_v12 = vpack.c.bf16 %v2134_v60, %v2134_v60  ;;  %v2146_v33 = vpop.permute.xlu1 %2145  ;;  %v2260_v55 = vrot.slane %v4332_v1, %v4838_v23 }
 0x543   :  { %2141 = vst [vmem:[#allocation2 + $0x390] sm:$0xf] %v2137_v29  ;;  %v2153_v11 = vsel %vm289_vm5, %v2144_v13, %v2146_v33  ;;  %v2252_v29 = vrot.slane %v4332_v1, %v4829_v20 }
 0x544   :  { %2139 = vst [vmem:[#allocation2 + $0x380] sm:$0xf] %v2135_v8  ;;  %2142 = vst [vmem:[#allocation2 + $0x398] sm:$0xf] %v2138_v12  ;;  %v2178_v59 = vmul.f32 %v2164_v56, %v2153_v11 }
 0x545   :  { %v2148_v50 = vpop.permute.xlu0 %2147  ;;  %v4333_v12 = vld [vmem:[%s6562_s0 + $0x5] ss:$8 sm:$0xf] }
 0x546   :  { %v2182_v45 = vpack.c.bf16 %v2178_v59, %v2178_v59  ;;  %v2152_v51 = vsel %vm289_vm5, %v2146_v33, %v2148_v50  ;;  %v2150_v25 = vpop.permute.xlu1 %2149 }
 0x547   :  { %v2179_v48 = vmul.f32 %v2168_v4, %v2152_v51  ;;  %v2151_v31 = vsel %vm289_vm5, %v2148_v50, %v2150_v25  ;;  %v2154_v46 = vsel %vm289_vm5, %v2150_v25, %v2144_v13  ;;  %v5959_v30 = vld [vmem:[#allocation2 + $0x388] sm:$0xff]  ;;  %v2264_v13 = vrot.slane %v4332_v1, %v6666_v36 }
 0x548   :  { %2186 = vst [vmem:[#allocation2 + $0x3a8] sm:$0xf] %v2182_v45  ;;  %v2177_v21 = vmul.f32 %v2160_v47, %v2154_v46  ;;  %v2180_v24 = vmul.f32 %v2172_v61, %v2151_v31  ;;  %2710 = vmatprep.subr.bf16.mxu0 %v5959_v30  ;;  %v2306_v51 = vrot.slane %v4333_v12, %v4829_v20 }
 0x549   :  { %v2183_v53 = vpack.c.bf16 %v2179_v48, %v2179_v48  ;;  %v2190_v37 = vpop.permute.xlu0 %2189 }
 0x54a   :  { %v2181_v34 = vpack.c.bf16 %v2177_v21, %v2177_v21  ;;  %v2184_v26 = vpack.c.bf16 %v2180_v24, %v2180_v24  ;;  %v2192_v40 = vpop.permute.xlu1 %2191  ;;  %v5972_v42 = vld [vmem:[#allocation2 + $0x390] sm:$0xff] }
 0x54b   :  { %2187 = vst [vmem:[#allocation2 + $0x3b0] sm:$0xf] %v2183_v53  ;;  %v2199_v7 = vsel %vm337_vm6, %v2190_v37, %v2192_v40  ;;  %v5965_v27 = vld [vmem:[#allocation2 + $0x380] sm:$0xff]  ;;  %v5967_v2 = vld [vmem:[#allocation2 + $0x398] sm:$0xff] }
 0x54c   :  { %2185 = vst [vmem:[#allocation2 + $0x3a0] sm:$0xf] %v2181_v34  ;;  %2188 = vst [vmem:[#allocation2 + $0x3b8] sm:$0xf] %v2184_v26  ;;  %v2224_v16 = vmul.f32 %v2210_v9, %v2199_v7  ;;  %2711 = vmatpush1.bf16.msra.mxu0 %v5965_v27  ;;  %2833 = vmatprep.subr.bf16.mxu1 %v5967_v2  ;;  %v2318_v7 = vrot.slane %v4333_v12, %v6666_v36 }
 0x54d   :  { %v2194_v5 = vpop.permute.xlu0 %2193  ;;  %2834 = vmatpush1.bf16.msra.mxu1 %v5972_v42 }
 0x54e   :  { %v2228_v10 = vpack.c.bf16 %v2224_v16, %v2224_v16  ;;  %v2198_v39 = vsel %vm337_vm6, %v2192_v40, %v2194_v5  ;;  %v2196_v35 = vpop.permute.xlu1 %2195  ;;  %v2314_v40 = vrot.slane %v4333_v12, %v4838_v23  ;;  %v4334_v16 = vld [vmem:[%s6562_s0 + $0x6] ss:$8 sm:$0xf] }
 0x54f   :  { %v2225_v6 = vmul.f32 %v2214_v63, %v2198_v39  ;;  %v2197_v54 = vsel %vm337_vm6, %v2194_v5, %v2196_v35  ;;  %v2200_v18 = vsel %vm337_vm6, %v2196_v35, %v2190_v37  ;;  %v5986_v0 = vld [vmem:[#allocation2 + $0x3a8] sm:$0xff]  ;;  %v2310_v37 = vrot.slane %v4333_v12, %v4835_v22 }
 0x550   :  { %2232 = vst [vmem:[#allocation2 + $0x3c8] sm:$0xf] %v2228_v10  ;;  %v2223_v17 = vmul.f32 %v2206_v15, %v2200_v18  ;;  %v2226_v14 = vmul.f32 %v2218_v58, %v2197_v54  ;;  %2712 = vmatprep.subr.bf16.mxu0 %v5986_v0  ;;  %v2352_v18 = vrot.slane %v4334_v16, %v4829_v20 }
 0x551   :  { %v2229_v28 = vpack.c.bf16 %v2225_v6, %v2225_v6  ;;  %v2236_v32 = vpop.permute.xlu0 %2235  ;;  %v2364_v12 = vrot.slane %v4334_v16, %v6666_v36 }
 0x552   :  { %v2227_v41 = vpack.c.bf16 %v2223_v17, %v2223_v17  ;;  %v2230_v43 = vpack.c.bf16 %v2226_v14, %v2226_v14  ;;  %v2238_v44 = vpop.permute.xlu1 %2237  ;;  %v5999_v56 = vld [vmem:[#allocation2 + $0x3b0] sm:$0xff] }
 0x553   :  { %2233 = vst [vmem:[#allocation2 + $0x3d0] sm:$0xf] %v2229_v28  ;;  %v2245_v49 = vsel %vm385_vm7, %v2236_v32, %v2238_v44  ;;  %v5992_v52 = vld [vmem:[#allocation2 + $0x3a0] sm:$0xff]  ;;  %v5994_v57 = vld [vmem:[#allocation2 + $0x3b8] sm:$0xff] }
 0x554   :  { %2231 = vst [vmem:[#allocation2 + $0x3c0] sm:$0xf] %v2227_v41  ;;  %2234 = vst [vmem:[#allocation2 + $0x3d8] sm:$0xf] %v2230_v43  ;;  %v2270_v60 = vmul.f32 %v2256_v38, %v2245_v49  ;;  %2713 = vmatpush1.bf16.msra.mxu0 %v5992_v52  ;;  %2835 = vmatprep.subr.bf16.mxu1 %v5994_v57  ;;  %v2356_v49 = vrot.slane %v4334_v16, %v4835_v22 }
 0x555   :  { %v2240_v8 = vpop.permute.xlu0 %2239  ;;  %2836 = vmatpush1.bf16.msra.mxu1 %v5999_v56 }
 0x556   :  { %v2274_v33 = vpack.c.bf16 %v2270_v60, %v2270_v60  ;;  %v2244_v11 = vsel %vm385_vm7, %v2238_v44, %v2240_v8  ;;  %v2242_v4 = vpop.permute.xlu1 %2241 }
 0x557   :  { %v2271_v59 = vmul.f32 %v2260_v55, %v2244_v11  ;;  %v2243_v47 = vsel %vm385_vm7, %v2240_v8, %v2242_v4  ;;  %v2246_v61 = vsel %vm385_vm7, %v2242_v4, %v2236_v32  ;;  %v6013_v50 = vld [vmem:[#allocation2 + $0x3c8] sm:$0xff]  ;;  %v4339_v55 = vcombine.low %v5906_v3, %v5906_v3  ;;  %v6063_v3 = vld [vmem:[#allocation2 + $0x418] sm:$0xff] }
 0x558   :  { %2278 = vst [vmem:[#allocation2 + $0x3e8] sm:$0xf] %v2274_v33  ;;  %v2269_v62 = vmul.f32 %v2252_v29, %v2246_v61  ;;  %v2272_v45 = vmul.f32 %v2264_v13, %v2243_v47  ;;  %2714 = vmatprep.subr.bf16.mxu0 %v6013_v50  ;;  %v6055_v29 = vld [vmem:[#allocation2 + $0x408] sm:$0xff]  ;;  %v2360_v8 = vrot.slane %v4334_v16, %v4838_v23 }
 0x559   :  { %v2275_v25 = vpack.c.bf16 %v2271_v59, %v2271_v59  ;;  %v2290_v48 = vpop.permute.xlu0 %2289  ;;  %v4335_v11 = vld [vmem:[%s6562_s0 + $0x7] ss:$8 sm:$0xf] }
 0x55a   :  { %v2273_v31 = vpack.c.bf16 %v2269_v62, %v2269_v62  ;;  %v2276_v46 = vpack.c.bf16 %v2272_v45, %v2272_v45  ;;  %v2292_v21 = vpop.permute.xlu1 %2291  ;;  %v6026_v26 = vld [vmem:[#allocation2 + $0x3d0] sm:$0xff] }
 0x55b   :  { %2279 = vst [vmem:[#allocation2 + $0x3f0] sm:$0xf] %v2275_v25  ;;  %v2299_v24 = vsel %vm441_vm8, %v2290_v48, %v2292_v21  ;;  %v6019_v9 = vld [vmem:[#allocation2 + $0x3c0] sm:$0xff]  ;;  %v6021_v53 = vld [vmem:[#allocation2 + $0x3d8] sm:$0xff] }
 0x55c   :  { %2277 = vst [vmem:[#allocation2 + $0x3e0] sm:$0xf] %v2273_v31  ;;  %2280 = vst [vmem:[#allocation2 + $0x3f8] sm:$0xf] %v2276_v46  ;;  %v2323_v34 = vmul.f32 %v2306_v51, %v2299_v24  ;;  %2715 = vmatpush1.bf16.msra.mxu0 %v6019_v9  ;;  %2837 = vmatprep.subr.bf16.mxu1 %v6021_v53  ;;  %v6075_v51 = vld [vmem:[#allocation2 + $0x400] sm:$0xff]  ;;  %v6078_v31 = vld [vmem:[#allocation2 + $0x410] sm:$0xff]  ;;  %v2398_v46 = vrot.slane %v4335_v11, %v4829_v20 }
 0x55d   :  { %v2294_v63 = vpop.permute.xlu0 %2293  ;;  %2838 = vmatpush1.bf16.msra.mxu1 %v6026_v26 }
 0x55e   :  { %v2327_v15 = vpack.c.bf16 %v2323_v34, %v2323_v34  ;;  %v2298_v58 = vsel %vm441_vm8, %v2292_v21, %v2294_v63  ;;  %v2296_v5 = vpop.permute.xlu1 %2295 }
 0x55f   :  { %v2324_v1 = vmul.f32 %v2310_v37, %v2298_v58  ;;  %v2297_v10 = vsel %vm441_vm8, %v2294_v63, %v2296_v5  ;;  %v2300_v39 = vsel %vm441_vm8, %v2296_v5, %v2290_v48  ;;  %v6040_v35 = vld [vmem:[#allocation2 + $0x3e8] sm:$0xff]  ;;  %v6667_v37 = vmov 0  }
 0x560   :  { %2331 = vst [vmem:[#allocation2 + $0x420] sm:$0xf] %v2327_v15  ;;  %v2325_v6 = vmul.f32 %v2314_v40, %v2297_v10  ;;  %v2326_v54 = vmul.f32 %v2318_v7, %v2300_v39  ;;  %2716 = vmatprep.subr.bf16.mxu0 %v6040_v35  ;;  %v2402_v5 = vrot.slane %v4335_v11, %v4835_v22 }
 0x561   :  { %v2328_v17 = vpack.c.bf16 %v2324_v1, %v2324_v1  ;;  %v2336_v14 = vpop.permute.xlu0 %2335  ;;  %v2406_v39 = vrot.slane %v4335_v11, %v4838_v23 }
 0x562   :  { %v2329_v38 = vpack.c.bf16 %v2325_v6, %v2325_v6  ;;  %v2330_v28 = vpack.c.bf16 %v2326_v54, %v2326_v54  ;;  %v2338_v32 = vpop.permute.xlu1 %2337  ;;  %v6057_v13 = vld [vmem:[#allocation2 + $0x3f0] sm:$0xff]  ;;  %v2410_v6 = vrot.slane %v4335_v11, %v6666_v36 }
 0x563   :  { %2332 = vst [vmem:[#allocation2 + $0x428] sm:$0xf] %v2328_v17  ;;  %v2345_v41 = vsel %vm489_vm9, %v2336_v14, %v2338_v32  ;;  %v6046_v43 = vld [vmem:[#allocation2 + $0x3e0] sm:$0xff]  ;;  %v6048_v44 = vld [vmem:[#allocation2 + $0x3f8] sm:$0xff] }
 0x564   :  { %2333 = vst [vmem:[#allocation2 + $0x430] sm:$0xf] %v2329_v38  ;;  %2334 = vst [vmem:[#allocation2 + $0x438] sm:$0xf] %v2330_v28  ;;  %v2369_v60 = vmul.f32 %v2352_v18, %v2345_v41  ;;  %2717 = vmatpush1.bf16.msra.mxu0 %v6046_v43  ;;  %2839 = vmatprep.subr.bf16.mxu1 %v6048_v44 }
 0x565   :  { %v2340_v33 = vpop.permute.xlu0 %2339  ;;  %2727 = vmatprep.subr.bf16.mxu0 %v6055_v29  ;;  %2840 = vmatpush1.bf16.msra.mxu1 %v6057_v13  ;;  %v4336_v18 = vld [vmem:[%s6562_s0 + $0x20] ss:$8 sm:$0xf] }
 0x566   :  { %v2373_v4 = vpack.c.bf16 %v2369_v60, %v2369_v60  ;;  %v2344_v59 = vsel %vm489_vm9, %v2338_v32, %v2340_v33  ;;  %2850 = vmatprep.subr.bf16.mxu1 %v6063_v3  ;;  %v2342_v47 = vpop.permute.xlu1 %2341  ;;  %v2444_v60 = vrot.slane %v4336_v18, %v4829_v20 }
 0x567   :  { %v2370_v61 = vmul.f32 %v2356_v49, %v2344_v59  ;;  %v2343_v62 = vsel %vm489_vm9, %v2340_v33, %v2342_v47  ;;  %v2346_v45 = vsel %vm489_vm9, %v2342_v47, %v2336_v14  ;;  %2719 = vmatmul.mubr.bf16.vlgmr.msra.gmra.mrb[12].mxu0 %v4339_v55  ;;  %v6089_v15 = vld [vmem:[#allocation2 + $0x420] sm:$0xff] }
 0x568   :  { %2377 = vst [vmem:[#allocation2 + $0x440] sm:$0xf] %v2373_v4  ;;  %v2371_v25 = vmul.f32 %v2360_v8, %v2343_v62  ;;  %v2372_v48 = vmul.f32 %v2364_v12, %v2346_v45  ;;  %2728 = vmatpush1.bf16.msra.mxu0 %v6075_v51  ;;  %2842 = vmatmul.mubr.bf16.vlgmr.msra.gmra.mrb[12].mxu1 %v4339_v55 }
 0x569   :  { %v2374_v21 = vpack.c.bf16 %v2370_v61, %v2370_v61  ;;  %v2382_v24 = vpop.permute.xlu0 %2381  ;;  %2851 = vmatpush1.bf16.msra.mxu1 %v6078_v31  ;;  %2759 = vmatprep.mubr.bf16.mxu0 %v6667_v37  ;;  %v2448_v45 = vrot.slane %v4336_v18, %v4835_v22 }
 0x56a   :  { %v2375_v34 = vpack.c.bf16 %v2371_v25, %v2371_v25  ;;  %v2376_v40 = vpack.c.bf16 %v2372_v48, %v2372_v48  ;;  %v2384_v7 = vpop.permute.xlu1 %2383  ;;  %v6083_v63 = vld [vmem:[#allocation2 + $0x428] sm:$0xff]  ;;  %2882 = vmatprep.mubr.bf16.mxu1 %v6667_v37 }
 0x56b   :  { %2378 = vst [vmem:[#allocation2 + $0x448] sm:$0xf] %v2374_v21  ;;  %v2391_v16 = vsel %vm537_vm10, %v2382_v24, %v2384_v7  ;;  %2729 = vmatprep.subr.bf16.mxu0 %v6083_v63  ;;  %v6091_v58 = vld [vmem:[#allocation2 + $0x438] sm:$0xff]  ;;  %v6094_v1 = vld [vmem:[#allocation2 + $0x430] sm:$0xff]  ;;  %v2456_v21 = vrot.slane %v4336_v18, %v6666_v36 }
 0x56c   :  { %2379 = vst [vmem:[#allocation2 + $0x450] sm:$0xf] %v2375_v34  ;;  %2380 = vst [vmem:[#allocation2 + $0x458] sm:$0xf] %v2376_v40  ;;  %v2415_v10 = vmul.f32 %v2398_v46, %v2391_v16  ;;  %2730 = vmatpush1.bf16.msra.mxu0 %v6089_v15  ;;  %2852 = vmatprep.subr.bf16.mxu1 %v6091_v58  ;;  %v2452_v46 = vrot.slane %v4336_v18, %v4838_v23 }
 0x56d   :  { %v2386_v54 = vpop.permute.xlu0 %2385  ;;  %2853 = vmatpush1.bf16.msra.mxu1 %v6094_v1 }
 0x56e   :  { %v2419_v17 = vpack.c.bf16 %v2415_v10, %v2415_v10  ;;  %v2390_v14 = vsel %vm537_vm10, %v2384_v7, %v2386_v54  ;;  %v2388_v38 = vpop.permute.xlu1 %2387  ;;  %v4478_v7 = vmov 1983009808  }
 0x56f   :  { %v2416_v28 = vmul.f32 %v2402_v5, %v2390_v14  ;;  %v2389_v32 = vsel %vm537_vm10, %v2386_v54, %v2388_v38  ;;  %v2392_v41 = vsel %vm537_vm10, %v2388_v38, %v2382_v24  ;;  %v6116_v61 = vld [vmem:[#allocation2 + $0x440] sm:$0xff]  ;;  %v3469_v16 = vunpack.c.l.s4 %v4478_v7 }
 0x570   :  { %2423 = vst [vmem:[#allocation2 + $0x460] sm:$0xf] %v2419_v17  ;;  %v2417_v49 = vmul.f32 %v2406_v39, %v2389_v32  ;;  %v2418_v55 = vmul.f32 %v2410_v6, %v2392_v41  ;;  %v3285_v7 = vld [vmem:[#allocation2 + $0x20] sm:$0xff] }
 0x571   :  { %v2420_v8 = vpack.c.bf16 %v2416_v28, %v2416_v28  ;;  %v2428_v12 = vpop.permute.xlu0 %2427  ;;  %v3470_v28 = vunpack.c.0.s8 %v3469_v16  ;;  %v3290_v16 = vld [vmem:[#allocation2 + $0x48] sm:$0xff] }
 0x572   :  { %v2421_v33 = vpack.c.bf16 %v2417_v49, %v2417_v49  ;;  %v2422_v11 = vpack.c.bf16 %v2418_v55, %v2418_v55  ;;  %v2430_v4 = vpop.permute.xlu1 %2429  ;;  %v6111_v59 = vld [vmem:[#allocation2 + $0x448] sm:$0xff]  ;;  %v6668_v55 = vld [vmem:[#allocation5_spill] sm:$0xff] }
 0x573   :  { %2424 = vst [vmem:[#allocation2 + $0x468] sm:$0xf] %v2420_v8  ;;  %v2437_v47 = vsel %vm585_vm11, %v2428_v12, %v2430_v4  ;;  %2731 = vmatprep.subr.bf16.mxu0 %v6111_v59  ;;  %v6118_v62 = vld [vmem:[#allocation2 + $0x458] sm:$0xff]  ;;  %v6121_v25 = vld [vmem:[#allocation2 + $0x450] sm:$0xff]  ;;  %v6152_v8 = vld [vmem:[%s6566_s6] sm:$0xff] }
 0x574   :  { %2425 = vst [vmem:[#allocation2 + $0x470] sm:$0xf] %v2421_v33  ;;  %2426 = vst [vmem:[#allocation2 + $0x478] sm:$0xf] %v2422_v11  ;;  %v2461_v48 = vmul.f32 %v2444_v60, %v2437_v47  ;;  %2732 = vmatpush1.bf16.msra.mxu0 %v6116_v61  ;;  %2854 = vmatprep.subr.bf16.mxu1 %v6118_v62  ;;  %v6147_v60 = vsub.s32 %v3470_v28, %v6668_v55  ;;  %v3282_v11 = vld [vmem:[#allocation2 + $0x8] sm:$0xff]  ;;  %v3295_v28 = vld [vmem:[#allocation2 + $0x70] sm:$0xff] }
 0x575   :  { %v2432_v24 = vpop.permute.xlu0 %2431  ;;  %2855 = vmatpush1.bf16.msra.mxu1 %v6121_v25  ;;  %v3300_v55 = vld [vmem:[#allocation2 + $0x98] sm:$0xff] }
 0x576   :  { %v2465_v37 = vpack.c.bf16 %v2461_v48, %v2461_v48  ;;  %v2436_v34 = vsel %vm585_vm11, %v2430_v4, %v2432_v24  ;;  %v2434_v40 = vpop.permute.xlu1 %2433  ;;  %v3284_v4 = vld [vmem:[#allocation2 + $0x18] sm:$0xff]  ;;  %v6161_v47 = vrot.slane %v6152_v8, %v6147_v60 }
 0x577   :  { %v2462_v5 = vmul.f32 %v2448_v45, %v2436_v34  ;;  %v2435_v10 = vsel %vm585_vm11, %v2432_v24, %v2434_v40  ;;  %v2438_v39 = vsel %vm585_vm11, %v2434_v40, %v2428_v12  ;;  %v6137_v32 = vld [vmem:[#allocation2 + $0x460] sm:$0xff]  ;;  %v4436_v12 = vld [vmem:[%s6565_s5 + $0x10] ss:$0 sps:$4 sm:$0xff]   ;;  %v3286_v34 = vld [vmem:[#allocation2 + $0x28] sm:$0xff] }
 0x578   :  { %2469 = vst [vmem:[#allocation2 + $0x480] sm:$0xf] %v2465_v37  ;;  %v2463_v6 = vmul.f32 %v2452_v46, %v2435_v10  ;;  %v2464_v54 = vmul.f32 %v2456_v21, %v2438_v39  ;;  %v3281_v21 = vld [vmem:[#allocation2] sm:$0xff]  ;;  %v3283_v24 = vld [vmem:[#allocation2 + $0x10] sm:$0xff]  ;;  %v3482_v37 = vcombine.high %v6161_v47, %v6161_v47  ;;  %v3288_v40 = vld [vmem:[#allocation2 + $0x38] sm:$0xff] }
 0x579   :  { %v2466_v18 = vpack.c.bf16 %v2462_v5, %v2462_v5  ;;  %v3287_v5 = vld [vmem:[#allocation2 + $0x30] sm:$0xff]  ;;  %v3292_v10 = vld [vmem:[#allocation2 + $0x58] sm:$0xff]  ;;  %v3289_v39 = vld [vmem:[#allocation2 + $0x40] sm:$0xff] }
 0x57a   :  { %v2467_v17 = vpack.c.bf16 %v2463_v6, %v2463_v6  ;;  %v2468_v14 = vpack.c.bf16 %v2464_v54, %v2464_v54  ;;  %v6134_v38 = vld [vmem:[#allocation2 + $0x468] sm:$0xff]  ;;  %v3291_v54 = vld [vmem:[#allocation2 + $0x50] sm:$0xff] }
 0x57b   :  { %2470 = vst [vmem:[#allocation2 + $0x488] sm:$0xf] %v2466_v18  ;;  %2733 = vmatprep.subr.bf16.mxu0 %v6134_v38  ;;  %v6139_v41 = vld [vmem:[#allocation2 + $0x478] sm:$0xff]  ;;  %v6141_v49 = vld [vmem:[#allocation2 + $0x470] sm:$0xff]  ;;  %v3294_v6 = vld [vmem:[#allocation2 + $0x68] sm:$0xff] }
 0x57c   :  { %2471 = vst [vmem:[#allocation2 + $0x490] sm:$0xf] %v2467_v17  ;;  %2472 = vst [vmem:[#allocation2 + $0x498] sm:$0xf] %v2468_v14  ;;  %2734 = vmatpush1.bf16.msra.mxu0 %v6137_v32  ;;  %2856 = vmatprep.subr.bf16.mxu1 %v6139_v41  ;;  %v3296_v18 = vld [vmem:[#allocation2 + $0x78] sm:$0xff]  ;;  %v3293_v17 = vld [vmem:[#allocation2 + $0x60] sm:$0xff] }
 0x57d   :  { %2857 = vmatpush1.bf16.msra.mxu1 %v6141_v49  ;;  %v3298_v14 = vld [vmem:[#allocation2 + $0x88] sm:$0xff] }
 0x57f   :  { %v6164_v45 = vld [vmem:[#allocation2 + $0x480] sm:$0xff] }
 0x582   :  { %v6157_v33 = vld [vmem:[#allocation2 + $0x488] sm:$0xff] }
 0x583   :  { %2735 = vmatprep.subr.bf16.mxu0 %v6157_v33  ;;  %v6166_v48 = vld [vmem:[#allocation2 + $0x498] sm:$0xff]  ;;  %v6168_v46 = vld [vmem:[#allocation2 + $0x490] sm:$0xff] }
 0x584   :  { %2736 = vmatpush1.bf16.msra.mxu0 %v6164_v45  ;;  %2858 = vmatprep.subr.bf16.mxu1 %v6166_v48 }
 0x585   :  { %2859 = vmatpush1.bf16.msra.mxu1 %v6168_v46  ;;  %3501 = vmatprep.subr.bf16.mxu0 %v3282_v11  ;;  %v3297_v11 = vld [vmem:[#allocation2 + $0x80] sm:$0xff] }
 0x586   :  { %3624 = vmatprep.subr.bf16.mxu1 %v3284_v4  ;;  %v3304_v4 = vld [vmem:[#allocation2 + $0xb8] sm:$0xff] }
 0x587   :  { %4342 = vmatmul.mubr.msk.bf16.vlgmr.msra.gmra.mrb[12].mxu0 %vm2641_vm12, %v4436_v12 }
 0x588   :  { %4343 = vmatmul.mubr.msk.bf16.vlgmr.msra.gmra.mrb[12].mxu1 %vm2641_vm12, %v4436_v12  ;;  %3502 = vmatpush1.bf16.msra.mxu0 %v3281_v21  ;;  %v3302_v12 = vld [vmem:[#allocation2 + $0xa8] sm:$0xff]  ;;  %v3299_v21 = vld [vmem:[#allocation2 + $0x90] sm:$0xff] }
 0x589   :  { %3503 = vmatprep.subr.bf16.mxu0 %v3286_v34  ;;  %3625 = vmatpush1.bf16.msra.mxu1 %v3283_v24  ;;  %v3301_v24 = vld [vmem:[#allocation2 + $0xa0] sm:$0xff]  ;;  %v3306_v34 = vld [vmem:[#allocation2 + $0xc8] sm:$0xff] }
 0x58a   :  { %3626 = vmatprep.subr.bf16.mxu1 %v3288_v40  ;;  %3533 = vmatprep.mubr.bf16.mxu0 %v3482_v37  ;;  %v3308_v40 = vld [vmem:[#allocation2 + $0xd8] sm:$0xff] }
 0x58b   :  { %3656 = vmatprep.mubr.bf16.mxu1 %v3482_v37  ;;  %v3303_v37 = vld [vmem:[#allocation2 + $0xb0] sm:$0xff] }
 0x58c   :  { %3504 = vmatpush1.bf16.msra.mxu0 %v3285_v7  ;;  %v3305_v7 = vld [vmem:[#allocation2 + $0xc0] sm:$0xff] }
 0x58d   :  { %3505 = vmatprep.subr.bf16.mxu0 %v3290_v16  ;;  %3627 = vmatpush1.bf16.msra.mxu1 %v3287_v5  ;;  %v3310_v16 = vld [vmem:[#allocation2 + $0xe8] sm:$0xff]  ;;  %v3307_v5 = vld [vmem:[#allocation2 + $0xd0] sm:$0xff] }
 0x58e   :  { %3628 = vmatprep.subr.bf16.mxu1 %v3292_v10  ;;  %v3312_v10 = vld [vmem:[#allocation2 + $0xf8] sm:$0xff] }
 0x590   :  { %3506 = vmatpush1.bf16.msra.mxu0 %v3289_v39  ;;  %v3309_v39 = vld [vmem:[#allocation2 + $0xe0] sm:$0xff] }
 0x591   :  { %3507 = vmatprep.subr.bf16.mxu0 %v3294_v6  ;;  %3629 = vmatpush1.bf16.msra.mxu1 %v3291_v54  ;;  %v3314_v6 = vld [vmem:[#allocation2 + $0x108] sm:$0xff]  ;;  %v3311_v54 = vld [vmem:[#allocation2 + $0xf0] sm:$0xff] }
 0x592   :  { %3630 = vmatprep.subr.bf16.mxu1 %v3296_v18  ;;  %v3316_v18 = vld [vmem:[#allocation2 + $0x118] sm:$0xff] }
 0x594   :  { %3508 = vmatpush1.bf16.msra.mxu0 %v3293_v17  ;;  %v3313_v17 = vld [vmem:[#allocation2 + $0x100] sm:$0xff] }
 0x595   :  { %3509 = vmatprep.subr.bf16.mxu0 %v3298_v14  ;;  %3631 = vmatpush1.bf16.msra.mxu1 %v3295_v28  ;;  %v3318_v14 = vld [vmem:[#allocation2 + $0x128] sm:$0xff]  ;;  %v3315_v28 = vld [vmem:[#allocation2 + $0x110] sm:$0xff] }
 0x596   :  { %3632 = vmatprep.subr.bf16.mxu1 %v3300_v55  ;;  %v3320_v55 = vld [vmem:[#allocation2 + $0x138] sm:$0xff] }
 0x598   :  { %3510 = vmatpush1.bf16.msra.mxu0 %v3297_v11  ;;  %v3322_v11 = vld [vmem:[#allocation2 + $0x148] sm:$0xff] }
 0x599   :  { %3633 = vmatpush1.bf16.msra.mxu1 %v3299_v21  ;;  %3511 = vmatprep.subr.bf16.mxu0 %v3302_v12  ;;  %v3317_v12 = vld [vmem:[#allocation2 + $0x120] sm:$0xff]  ;;  %v3324_v21 = vld [vmem:[#allocation2 + $0x158] sm:$0xff] }
 0x59a   :  { %3634 = vmatprep.subr.bf16.mxu1 %v3304_v4  ;;  %v3319_v4 = vld [vmem:[#allocation2 + $0x130] sm:$0xff] }
 0x59c   :  { %3512 = vmatpush1.bf16.msra.mxu0 %v3301_v24  ;;  %v3321_v24 = vld [vmem:[#allocation2 + $0x140] sm:$0xff] }
 0x59d   :  { %3513 = vmatprep.subr.bf16.mxu0 %v3306_v34  ;;  %3635 = vmatpush1.bf16.msra.mxu1 %v3303_v37  ;;  %v3326_v37 = vld [vmem:[#allocation2 + $0x168] sm:$0xff]  ;;  %v3323_v34 = vld [vmem:[#allocation2 + $0x150] sm:$0xff] }
 0x59e   :  { %3636 = vmatprep.subr.bf16.mxu1 %v3308_v40  ;;  %v3328_v40 = vld [vmem:[#allocation2 + $0x178] sm:$0xff] }
 0x5a0   :  { %3514 = vmatpush1.bf16.msra.mxu0 %v3305_v7  ;;  %v3325_v7 = vld [vmem:[#allocation2 + $0x160] sm:$0xff] }
 0x5a1   :  { %3515 = vmatprep.subr.bf16.mxu0 %v3310_v16  ;;  %3637 = vmatpush1.bf16.msra.mxu1 %v3307_v5  ;;  %v3330_v16 = vld [vmem:[#allocation2 + $0x188] sm:$0xff]  ;;  %v3327_v5 = vld [vmem:[#allocation2 + $0x170] sm:$0xff] }
 0x5a2   :  { %3638 = vmatprep.subr.bf16.mxu1 %v3312_v10  ;;  %v3332_v10 = vld [vmem:[#allocation2 + $0x198] sm:$0xff] }
 0x5a4   :  { %3516 = vmatpush1.bf16.msra.mxu0 %v3309_v39  ;;  %v3329_v39 = vld [vmem:[#allocation2 + $0x180] sm:$0xff] }
 0x5a5   :  { %3517 = vmatprep.subr.bf16.mxu0 %v3314_v6  ;;  %3639 = vmatpush1.bf16.msra.mxu1 %v3311_v54  ;;  %v3334_v6 = vld [vmem:[#allocation2 + $0x1a8] sm:$0xff]  ;;  %v3331_v54 = vld [vmem:[#allocation2 + $0x190] sm:$0xff] }
 0x5a6   :  { %3640 = vmatprep.subr.bf16.mxu1 %v3316_v18  ;;  %v3336_v18 = vld [vmem:[#allocation2 + $0x1b8] sm:$0xff] }
 0x5a8   :  { %3518 = vmatpush1.bf16.msra.mxu0 %v3313_v17  ;;  %v3333_v17 = vld [vmem:[#allocation2 + $0x1a0] sm:$0xff] }
 0x5a9   :  { %3519 = vmatprep.subr.bf16.mxu0 %v3318_v14  ;;  %3641 = vmatpush1.bf16.msra.mxu1 %v3315_v28  ;;  %v3338_v14 = vld [vmem:[#allocation2 + $0x1c8] sm:$0xff]  ;;  %v3335_v28 = vld [vmem:[#allocation2 + $0x1b0] sm:$0xff] }
 0x5aa   :  { %3642 = vmatprep.subr.bf16.mxu1 %v3320_v55  ;;  %v3340_v55 = vld [vmem:[#allocation2 + $0x1d8] sm:$0xff] }
 0x5ac   :  { %3520 = vmatpush1.bf16.msra.mxu0 %v3317_v12  ;;  %v3467_v12 = vcombine.high %v6152_v8, %v6152_v8 }
 0x5ad   :  { %3521 = vmatprep.subr.bf16.mxu0 %v3322_v11  ;;  %3643 = vmatpush1.bf16.msra.mxu1 %v3319_v4  ;;  %v3337_v11 = vld [vmem:[#allocation2 + $0x1c0] sm:$0xff]  ;;  %v3342_v4 = vld [vmem:[#allocation2 + $0x1e8] sm:$0xff] }
 0x5ae   :  { %3644 = vmatprep.subr.bf16.mxu1 %v3324_v21  ;;  %v3339_v21 = vld [vmem:[#allocation2 + $0x1d0] sm:$0xff] }
 0x5b0   :  { %3522 = vmatpush1.bf16.msra.mxu0 %v3321_v24  ;;  %v3344_v24 = vld [vmem:[#allocation2 + $0x1f8] sm:$0xff] }
 0x5b1   :  { %3523 = vmatprep.subr.bf16.mxu0 %v3326_v37  ;;  %3645 = vmatpush1.bf16.msra.mxu1 %v3323_v34  ;;  %v6178_v37 = vrot.slane %v3467_v12, %v6147_v60  ;;  %v3341_v34 = vld [vmem:[#allocation2 + $0x1e0] sm:$0xff]  ;;  %v3347_v60 = vld [vmem:[#allocation2 + $0x210] sm:$0xff] }
 0x5b2   :  { %3646 = vmatprep.subr.bf16.mxu1 %v3328_v40  ;;  %v3346_v40 = vld [vmem:[#allocation2 + $0x208] sm:$0xff]  ;;  %v3357_v12 = vld [vmem:[#allocation2 + $0x260] sm:$0xff] }
 0x5b3   :  { %v3483_v8 = vcombine.high %v6178_v37, %v6178_v37 }
 0x5b4   :  { %3524 = vmatpush1.bf16.msra.mxu0 %v3325_v7  ;;  %v3343_v7 = vld [vmem:[#allocation2 + $0x1f0] sm:$0xff] }
 0x5b5   :  { %3525 = vmatprep.subr.bf16.mxu0 %v3330_v16  ;;  %3647 = vmatpush1.bf16.msra.mxu1 %v3327_v5  ;;  %v3348_v16 = vld [vmem:[#allocation2 + $0x218] sm:$0xff]  ;;  %v3345_v5 = vld [vmem:[#allocation2 + $0x200] sm:$0xff] }
 0x5b6   :  { %3648 = vmatprep.subr.bf16.mxu1 %v3332_v10  ;;  %v3350_v10 = vld [vmem:[#allocation2 + $0x228] sm:$0xff] }
 0x5b8   :  { %3526 = vmatpush1.bf16.msra.mxu0 %v3329_v39  ;;  %v3352_v39 = vld [vmem:[#allocation2 + $0x238] sm:$0xff] }
 0x5b9   :  { %3527 = vmatprep.subr.bf16.mxu0 %v3334_v6  ;;  %3649 = vmatpush1.bf16.msra.mxu1 %v3331_v54  ;;  %v3349_v6 = vld [vmem:[#allocation2 + $0x220] sm:$0xff]  ;;  %v3354_v54 = vld [vmem:[#allocation2 + $0x248] sm:$0xff] }
 0x5ba   :  { %3650 = vmatprep.subr.bf16.mxu1 %v3336_v18  ;;  %v3351_v18 = vld [vmem:[#allocation2 + $0x230] sm:$0xff] }
 0x5bc   :  { %3528 = vmatpush1.bf16.msra.mxu0 %v3333_v17  ;;  %v3356_v17 = vld [vmem:[#allocation2 + $0x258] sm:$0xff] }
 0x5bd   :  { %3529 = vmatprep.subr.bf16.mxu0 %v3338_v14  ;;  %3651 = vmatpush1.bf16.msra.mxu1 %v3335_v28  ;;  %v3353_v14 = vld [vmem:[#allocation2 + $0x240] sm:$0xff]  ;;  %v3358_v28 = vld [vmem:[#allocation2 + $0x268] sm:$0xff] }
 0x5be   :  { %3652 = vmatprep.subr.bf16.mxu1 %v3340_v55  ;;  %v3355_v55 = vld [vmem:[#allocation2 + $0x250] sm:$0xff] }
 0x5c0   :  { %3530 = vmatpush1.bf16.msra.mxu0 %v3337_v11  ;;  %v3362_v11 = vld [vmem:[#allocation2 + $0x288] sm:$0xff] }
 0x5c1   :  { %3531 = vmatprep.subr.bf16.mxu0 %v3342_v4  ;;  %3653 = vmatpush1.bf16.msra.mxu1 %v3339_v21  ;;  %v3359_v4 = vld [vmem:[#allocation2 + $0x270] sm:$0xff]  ;;  %v3364_v21 = vld [vmem:[#allocation2 + $0x298] sm:$0xff] }
 0x5c2   :  { %3654 = vmatprep.subr.bf16.mxu1 %v3344_v24  ;;  %v3361_v24 = vld [vmem:[#allocation2 + $0x280] sm:$0xff] }
 0x5c4   :  { %3532 = vmatpush1.bf16.msra.mxu0 %v3341_v34  ;;  %v3366_v34 = vld [vmem:[#allocation2 + $0x2a8] sm:$0xff] }
 0x5c5   :  { %3542 = vmatprep.subr.bf16.mxu0 %v3346_v40  ;;  %3655 = vmatpush1.bf16.msra.mxu1 %v3343_v7  ;;  %v3363_v40 = vld [vmem:[#allocation2 + $0x290] sm:$0xff]  ;;  %v3368_v7 = vld [vmem:[#allocation2 + $0x2b8] sm:$0xff] }
 0x5c6   :  { %3665 = vmatprep.subr.bf16.mxu1 %v3348_v16  ;;  %v3365_v16 = vld [vmem:[#allocation2 + $0x2a0] sm:$0xff] }
 0x5c7   :  { %3534 = vmatmul.mubr.bf16.vlgmr.msra.gmra.mrb[16].mxu0 %v6161_v47 }
 0x5c8   :  { %3543 = vmatpush1.bf16.msra.mxu0 %v3345_v5  ;;  %3657 = vmatmul.mubr.bf16.vlgmr.msra.gmra.mrb[16].mxu1 %v6161_v47  ;;  %v3360_v47 = vld [vmem:[#allocation2 + $0x278] sm:$0xff]  ;;  %v3367_v5 = vld [vmem:[#allocation2 + $0x2b0] sm:$0xff] }
 0x5c9   :  { %3544 = vmatprep.subr.bf16.mxu0 %v3350_v10  ;;  %3666 = vmatpush1.bf16.msra.mxu1 %v3347_v60  ;;  %v3372_v10 = vld [vmem:[#allocation2 + $0x2d8] sm:$0xff]  ;;  %v3369_v60 = vld [vmem:[#allocation2 + $0x2c0] sm:$0xff] }
 0x5ca   :  { %3667 = vmatprep.subr.bf16.mxu1 %v3352_v39  ;;  %3574 = vmatprep.mubr.bf16.mxu0 %v3483_v8  ;;  %v3374_v39 = vld [vmem:[#allocation2 + $0x2e8] sm:$0xff] }
 0x5cb   :  { %3697 = vmatprep.mubr.bf16.mxu1 %v3483_v8  ;;  %v3370_v8 = vld [vmem:[#allocation2 + $0x2c8] sm:$0xff] }
 0x5cc   :  { %3545 = vmatpush1.bf16.msra.mxu0 %v3349_v6  ;;  %v3371_v6 = vld [vmem:[#allocation2 + $0x2d0] sm:$0xff] }
 0x5cd   :  { %3546 = vmatprep.subr.bf16.mxu0 %v3354_v54  ;;  %3668 = vmatpush1.bf16.msra.mxu1 %v3351_v18  ;;  %v3376_v54 = vld [vmem:[#allocation2 + $0x2f8] sm:$0xff]  ;;  %v3373_v18 = vld [vmem:[#allocation2 + $0x2e0] sm:$0xff] }
 0x5ce   :  { %3669 = vmatprep.subr.bf16.mxu1 %v3356_v17  ;;  %v3378_v17 = vld [vmem:[#allocation2 + $0x308] sm:$0xff] }
 0x5d0   :  { %3547 = vmatpush1.bf16.msra.mxu0 %v3353_v14  ;;  %v3375_v14 = vld [vmem:[#allocation2 + $0x2f0] sm:$0xff] }
 0x5d1   :  { %3548 = vmatprep.subr.bf16.mxu0 %v3358_v28  ;;  %3670 = vmatpush1.bf16.msra.mxu1 %v3355_v55  ;;  %v3380_v28 = vld [vmem:[#allocation2 + $0x318] sm:$0xff]  ;;  %v3377_v55 = vld [vmem:[#allocation2 + $0x300] sm:$0xff] }
 0x5d2   :  { %3671 = vmatprep.subr.bf16.mxu1 %v3360_v47  ;;  %v3382_v47 = vld [vmem:[#allocation2 + $0x328] sm:$0xff] }
 0x5d4   :  { %3549 = vmatpush1.bf16.msra.mxu0 %v3357_v12  ;;  %v3379_v12 = vld [vmem:[#allocation2 + $0x310] sm:$0xff] }
 0x5d5   :  { %3550 = vmatprep.subr.bf16.mxu0 %v3362_v11  ;;  %3672 = vmatpush1.bf16.msra.mxu1 %v3359_v4  ;;  %v3384_v11 = vld [vmem:[#allocation2 + $0x338] sm:$0xff]  ;;  %v3381_v4 = vld [vmem:[#allocation2 + $0x320] sm:$0xff] }
 0x5d6   :  { %3673 = vmatprep.subr.bf16.mxu1 %v3364_v21  ;;  %v3386_v21 = vld [vmem:[#allocation2 + $0x348] sm:$0xff] }
 0x5d8   :  { %3551 = vmatpush1.bf16.msra.mxu0 %v3361_v24  ;;  %v3383_v24 = vld [vmem:[#allocation2 + $0x330] sm:$0xff] }
 0x5d9   :  { %3552 = vmatprep.subr.bf16.mxu0 %v3366_v34  ;;  %3674 = vmatpush1.bf16.msra.mxu1 %v3363_v40  ;;  %v3388_v34 = vld [vmem:[#allocation2 + $0x358] sm:$0xff]  ;;  %v3385_v40 = vld [vmem:[#allocation2 + $0x340] sm:$0xff] }
 0x5da   :  { %3675 = vmatprep.subr.bf16.mxu1 %v3368_v7  ;;  %v3390_v7 = vld [vmem:[#allocation2 + $0x368] sm:$0xff] }
 0x5dc   :  { %3553 = vmatpush1.bf16.msra.mxu0 %v3365_v16  ;;  %v3387_v16 = vld [vmem:[#allocation2 + $0x350] sm:$0xff] }
 0x5dd   :  { %3554 = vmatprep.subr.bf16.mxu0 %v3370_v8  ;;  %3676 = vmatpush1.bf16.msra.mxu1 %v3367_v5  ;;  %v3392_v8 = vld [vmem:[#allocation2 + $0x378] sm:$0xff]  ;;  %v3389_v5 = vld [vmem:[#allocation2 + $0x360] sm:$0xff] }
 0x5de   :  { %3677 = vmatprep.subr.bf16.mxu1 %v3372_v10  ;;  %v3391_v10 = vld [vmem:[#allocation2 + $0x370] sm:$0xff] }
 0x5e0   :  { %3555 = vmatpush1.bf16.msra.mxu0 %v3369_v60 }
 0x5e1   :  { %3556 = vmatprep.subr.bf16.mxu0 %v3374_v39  ;;  %3678 = vmatpush1.bf16.msra.mxu1 %v3371_v6 }
 0x5e2   :  { %3679 = vmatprep.subr.bf16.mxu1 %v3376_v54 }
 0x5e4   :  { %3557 = vmatpush1.bf16.msra.mxu0 %v3373_v18 }
 0x5e5   :  { %3558 = vmatprep.subr.bf16.mxu0 %v3378_v17  ;;  %3680 = vmatpush1.bf16.msra.mxu1 %v3375_v14 }
 0x5e6   :  { %3681 = vmatprep.subr.bf16.mxu1 %v3380_v28 }
 0x5e8   :  { %3559 = vmatpush1.bf16.msra.mxu0 %v3377_v55 }
 0x5e9   :  { %3560 = vmatprep.subr.bf16.mxu0 %v3382_v47  ;;  %3682 = vmatpush1.bf16.msra.mxu1 %v3379_v12 }
 0x5ea   :  { %3683 = vmatprep.subr.bf16.mxu1 %v3384_v11 }
 0x5ec   :  { %3561 = vmatpush1.bf16.msra.mxu0 %v3381_v4 }
 0x5ed   :  { %3562 = vmatprep.subr.bf16.mxu0 %v3386_v21  ;;  %3684 = vmatpush1.bf16.msra.mxu1 %v3383_v24 }
 0x5ee   :  { %3685 = vmatprep.subr.bf16.mxu1 %v3388_v34 }
 0x5f0   :  { %3563 = vmatpush1.bf16.msra.mxu0 %v3385_v40  ;;  %v4345_v40 = vld [vmem:[%s6562_s0 + $0x2] ss:$8 sm:$0xf] }
 0x5f1   :  { %3564 = vmatprep.subr.bf16.mxu0 %v3390_v7  ;;  %3686 = vmatpush1.bf16.msra.mxu1 %v3387_v16 }
 0x5f2   :  { %3687 = vmatprep.subr.bf16.mxu1 %v3392_v8 }
 0x5f4   :  { %3565 = vmatpush1.bf16.msra.mxu0 %v3389_v5 }
 0x5f5   :  { %3566 = vmatprep.subr.bf16.mxu0 %v5959_v30  ;;  %3688 = vmatpush1.bf16.msra.mxu1 %v3391_v10 }
 0x5f6   :  { %3689 = vmatprep.subr.bf16.mxu1 %v5967_v2 }
 0x5f8   :  { %3567 = vmatpush1.bf16.msra.mxu0 %v5965_v27 }
 0x5f9   :  { %3568 = vmatprep.subr.bf16.mxu0 %v5986_v0  ;;  %3690 = vmatpush1.bf16.msra.mxu1 %v5972_v42 }
 0x5fa   :  { %3691 = vmatprep.subr.bf16.mxu1 %v5994_v57 }
 0x5fc   :  { %3569 = vmatpush1.bf16.msra.mxu0 %v5992_v52 }
 0x5fd   :  { %3570 = vmatprep.subr.bf16.mxu0 %v6013_v50  ;;  %3692 = vmatpush1.bf16.msra.mxu1 %v5999_v56 }
 0x5fe   :  { %3693 = vmatprep.subr.bf16.mxu1 %v6021_v53 }
 0x600   :  { %3571 = vmatpush1.bf16.msra.mxu0 %v6019_v9 }
 0x601   :  { %3572 = vmatprep.subr.bf16.mxu0 %v6040_v35  ;;  %3694 = vmatpush1.bf16.msra.mxu1 %v6026_v26 }
 0x602   :  { %3695 = vmatprep.subr.bf16.mxu1 %v6048_v44 }
 0x604   :  { %3573 = vmatpush1.bf16.msra.mxu0 %v6046_v43 }
 0x605   :  { %3583 = vmatprep.subr.bf16.mxu0 %v6055_v29  ;;  %3696 = vmatpush1.bf16.msra.mxu1 %v6057_v13 }
 0x606   :  { %3706 = vmatprep.subr.bf16.mxu1 %v6063_v3 }
 0x607   :  { %3575 = vmatmul.mubr.bf16.vlgmr.msra.gmra.mrb[16].mxu0 %v6178_v37 }
 0x608   :  { %3584 = vmatpush1.bf16.msra.mxu0 %v6075_v51  ;;  %3698 = vmatmul.mubr.bf16.vlgmr.msra.gmra.mrb[16].mxu1 %v6178_v37 }
 0x609   :  { %3585 = vmatprep.subr.bf16.mxu0 %v6083_v63  ;;  %3707 = vmatpush1.bf16.msra.mxu1 %v6078_v31  ;;  %v6257_v63 = vld.sshfl [vmem:[%s6566_s6 + $0x8] sm:$0x33 pattern:$0x76325410] }
 0x60a   :  { %3708 = vmatprep.subr.bf16.mxu1 %v6091_v58  ;;  %v2915_v58 = vld [vmem:[%s6562_s0] ss:$8 sm:$0xf] }
 0x60c   :  { %3586 = vmatpush1.bf16.msra.mxu0 %v6089_v15  ;;  %v3491_v15 = vcombine.high %v6257_v63, %v6257_v63 }
 0x60d   :  { %3587 = vmatprep.subr.bf16.mxu0 %v6111_v59  ;;  %3709 = vmatpush1.bf16.msra.mxu1 %v6094_v1  ;;  %v2924_v1 = vrot.slane %v2915_v58, %v4835_v22 }
 0x60e   :  { %3710 = vmatprep.subr.bf16.mxu1 %v6118_v62  ;;  %4352 = vmatprep.mubr.msk.bf16.mxu0 %vm3497_vm1, %v3491_v15 }
 0x60f   :  { %4353 = vmatprep.mubr.msk.bf16.mxu1 %vm3497_vm1, %v3491_v15 }
 0x610   :  { %3588 = vmatpush1.bf16.msra.mxu0 %v6116_v61 }
 0x611   :  { %3589 = vmatprep.subr.bf16.mxu0 %v6134_v38  ;;  %3711 = vmatpush1.bf16.msra.mxu1 %v6121_v25  ;;  %v2928_v25 = vrot.slane %v2915_v58, %v4838_v23 }
 0x612   :  { %3712 = vmatprep.subr.bf16.mxu1 %v6139_v41  ;;  %v2932_v41 = vrot.slane %v2915_v58, %v6666_v36 }
 0x614   :  { %3590 = vmatpush1.bf16.msra.mxu0 %v6137_v32  ;;  %v2920_v32 = vrot.slane %v2915_v58, %v4829_v20 }
 0x615   :  { %3591 = vmatprep.subr.bf16.mxu0 %v6157_v33  ;;  %3713 = vmatpush1.bf16.msra.mxu1 %v6141_v49  ;;  %v4344_v33 = vld [vmem:[%s6562_s0 + $0x1] ss:$8 sm:$0xf] }
 0x616   :  { %3714 = vmatprep.subr.bf16.mxu1 %v6166_v48  ;;  %v2970_v18 = vrot.slane %v4344_v33, %v4835_v22  ;;  %v2974_v11 = vrot.slane %v4344_v33, %v4838_v23  ;;  %v2966_v21 = vrot.slane %v4344_v33, %v4829_v20  ;;  %v2978_v24 = vrot.slane %v4344_v33, %v6666_v36 }
 0x618   :  { %3592 = vmatpush1.bf16.msra.mxu0 %v6164_v45 }
 0x619   :  { %3715 = vmatpush1.bf16.msra.mxu1 %v6168_v46 }
 0x65a   :  { %v2761_v30 = vpop.f32.mrb[12].mxu0 }
 0x65b   :  { %vm2891_vm13 = vcmp.gt.f32.partialorder %v2761_v30, 0.0  ;;  %v2895_v27 = vmul.f32 0.2, %v2761_v30  ;;  %v2763_v2 = vpop.f32.mrb[13].mxu0  ;;  %v2884_v42 = vpop.f32.mrb[12].mxu1 }
 0x65c   :  { %vm2892_vm14 = vcmp.gt.f32.partialorder %v2763_v2, 0.0  ;;  %v2896_v0 = vmul.f32 0.2, %v2763_v2  ;;  %vm2893_vm15 = vcmp.gt.f32.partialorder %v2884_v42, 0.0  ;;  %v2897_v52 = vmul.f32 0.2, %v2884_v42 }
 0x65d   :  { %v2899_v57 = vsel %vm2891_vm13, %v2761_v30, %v2895_v27  ;;  %v2765_v56 = vpop.f32.mrb[14].mxu0  ;;  %v2886_v50 = vpop.f32.mrb[13].mxu1 }
 0x65e   :  { %v3087_v9 = vpack.c.bf16 %v2899_v57, %v2899_v57  ;;  %v2900_v53 = vsel %vm2892_vm14, %v2763_v2, %v2896_v0  ;;  %v2901_v26 = vsel %vm2893_vm15, %v2884_v42, %v2897_v52  ;;  %vm2894_vm0 = vcmp.gt.f32.partialorder %v2886_v50, 0.0  ;;  %v2766_v35 = vpop.f32.mrb[15].mxu0  ;;  %v2888_v43 = vpop.f32.mrb[14].mxu1  ;;  %2903 = vrot.lane.b32.xlu0 %v2899_v57, %s4467_s9 }
 0x65f   :  { %v3088_v44 = vpack.c.bf16 %v2900_v53, %v2900_v53  ;;  %v3089_v29 = vpack.c.bf16 %v2901_v26, %v2901_v26  ;;  %v2898_v13 = vmul.f32 0.2, %v2886_v50  ;;  %v2889_v3 = vpop.f32.mrb[15].mxu1  ;;  %2905 = vrot.lane.b32.xlu1 %v2900_v53, %s4467_s9  ;;  %v3016_v0 = vrot.slane %v4345_v40, %v4835_v22 }
 0x660   :  { %3091 = vst [vmem:[#allocation2 + $0x520] sm:$0xf] %v3087_v9  ;;  %v3020_v43 = vrot.slane %v4345_v40, %v4838_v23  ;;  %v3024_v3 = vrot.slane %v4345_v40, %v6666_v36 }
 0x661   :  { %3092 = vst [vmem:[#allocation2 + $0x528] sm:$0xf] %v3088_v44  ;;  %3093 = vst [vmem:[#allocation2 + $0x530] sm:$0xf] %v3089_v29  ;;  %v2902_v51 = vsel %vm2894_vm0, %v2886_v50, %v2898_v13  ;;  %v3012_v13 = vrot.slane %v4345_v40, %v4829_v20 }
 0x662   :  { %v3090_v31 = vpack.c.bf16 %v2902_v51, %v2902_v51  ;;  %2907 = vrot.lane.b32.xlu0 %v2901_v26, %s4467_s9 }
 0x663   :  { %2909 = vrot.lane.b32.xlu1 %v2902_v51, %s4467_s9 }
 0x664   :  { %3094 = vst [vmem:[#allocation2 + $0x538] sm:$0xf] %v3090_v31  ;;  %v4346_v31 = vld [vmem:[%s6562_s0 + $0x3] ss:$8 sm:$0xf] }
 0x666   :  { %2949 = vrot.lane.b32.xlu0 %v2899_v57, %s4469_s10 }
 0x667   :  { %2951 = vrot.lane.b32.xlu1 %v2900_v53, %s4469_s10 }
 0x66a   :  { %2953 = vrot.lane.b32.xlu0 %v2901_v26, %s4469_s10 }
 0x66b   :  { %2955 = vrot.lane.b32.xlu1 %v2902_v51, %s4469_s10 }
 0x66e   :  { %2995 = vrot.lane.b32.xlu0 %v2899_v57, %s4472_s11 }
 0x66f   :  { %2997 = vrot.lane.b32.xlu1 %v2900_v53, %s4472_s11 }
 0x672   :  { %2999 = vrot.lane.b32.xlu0 %v2901_v26, %s4472_s11 }
 0x673   :  { %3001 = vrot.lane.b32.xlu1 %v2902_v51, %s4472_s11 }
 0x676   :  { %3041 = vrot.lane.b32.xlu0 %v2899_v57, %s4473_s12 }
 0x677   :  { %3043 = vrot.lane.b32.xlu1 %v2900_v53, %s4473_s12 }
 0x67a   :  { %3045 = vrot.lane.b32.xlu0 %v2901_v26, %s4473_s12 }
 0x67b   :  { %3047 = vrot.lane.b32.xlu1 %v2902_v51, %s4473_s12 }
 0x67e   :  { %3095 = vrot.lane.b32.xlu0 %v2899_v57, %s4474_s13 }
 0x67f   :  { %3097 = vrot.lane.b32.xlu1 %v2900_v53, %s4474_s13 }
 0x682   :  { %3099 = vrot.lane.b32.xlu0 %v2901_v26, %s4474_s13 }
 0x683   :  { %3101 = vrot.lane.b32.xlu1 %v2902_v51, %s4474_s13 }
 0x686   :  { %3141 = vrot.lane.b32.xlu0 %v2899_v57, %s4475_s14 }
 0x687   :  { %3143 = vrot.lane.b32.xlu1 %v2900_v53, %s4475_s14 }
 0x68a   :  { %3145 = vrot.lane.b32.xlu0 %v2901_v26, %s4475_s14 }
 0x68b   :  { %3147 = vrot.lane.b32.xlu1 %v2902_v51, %s4475_s14 }
 0x68e   :  { %3187 = vrot.lane.b32.xlu0 %v2899_v57, %s4476_s15 }
 0x68f   :  { %3189 = vrot.lane.b32.xlu1 %v2900_v53, %s4476_s15 }
 0x692   :  { %3191 = vrot.lane.b32.xlu0 %v2901_v26, %s4476_s15 }
 0x693   :  { %3193 = vrot.lane.b32.xlu1 %v2902_v51, %s4476_s15 }
 0x696   :  { %3233 = vrot.lane.b32.xlu0 %v2899_v57, %s4477_s16 }
 0x697   :  { %3235 = vrot.lane.b32.xlu1 %v2900_v53, %s4477_s16 }
 0x69a   :  { %3237 = vrot.lane.b32.xlu0 %v2901_v26, %s4477_s16 }
 0x69b   :  { %3239 = vrot.lane.b32.xlu1 %v2902_v51, %s4477_s16 }
 0x6d0   :  { %v2904_v59 = vpop.permute.xlu0 %2903 }
 0x6d1   :  { %v2906_v61 = vpop.permute.xlu1 %2905 }
 0x6d2   :  { %v2913_v62 = vsel %vm242_vm4, %v2904_v59, %v2906_v61 }
 0x6d3   :  { %v2938_v38 = vmul.f32 %v2924_v1, %v2913_v62 }
 0x6d4   :  { %v2908_v49 = vpop.permute.xlu0 %2907 }
 0x6d5   :  { %v2942_v45 = vpack.c.bf16 %v2938_v38, %v2938_v38  ;;  %v2912_v48 = vsel %vm242_vm4, %v2906_v61, %v2908_v49  ;;  %v2910_v46 = vpop.permute.xlu1 %2909 }
 0x6d6   :  { %v2939_v37 = vmul.f32 %v2928_v25, %v2912_v48  ;;  %v2911_v60 = vsel %vm242_vm4, %v2908_v49, %v2910_v46  ;;  %v2914_v39 = vsel %vm242_vm4, %v2910_v46, %v2904_v59 }
 0x6d7   :  { %2946 = vst [vmem:[#allocation2 + $0x4a8] sm:$0xf] %v2942_v45  ;;  %v2937_v6 = vmul.f32 %v2920_v32, %v2914_v39  ;;  %v2940_v54 = vmul.f32 %v2932_v41, %v2911_v60  ;;  %v3062_v41 = vrot.slane %v4346_v31, %v4835_v22 }
 0x6d8   :  { %v2943_v17 = vpack.c.bf16 %v2939_v37, %v2939_v37  ;;  %v2950_v14 = vpop.permute.xlu0 %2949 }
 0x6d9   :  { %v2941_v28 = vpack.c.bf16 %v2937_v6, %v2937_v6  ;;  %v2944_v55 = vpack.c.bf16 %v2940_v54, %v2940_v54  ;;  %v2952_v47 = vpop.permute.xlu1 %2951  ;;  %v3066_v6 = vrot.slane %v4346_v31, %v4838_v23 }
 0x6da   :  { %2947 = vst [vmem:[#allocation2 + $0x4b0] sm:$0xf] %v2943_v17  ;;  %v2959_v12 = vsel %vm289_vm5, %v2950_v14, %v2952_v47  ;;  %v3058_v17 = vrot.slane %v4346_v31, %v4829_v20 }
 0x6db   :  { %2945 = vst [vmem:[#allocation2 + $0x4a0] sm:$0xf] %v2941_v28  ;;  %2948 = vst [vmem:[#allocation2 + $0x4b8] sm:$0xf] %v2944_v55  ;;  %v2984_v4 = vmul.f32 %v2970_v18, %v2959_v12 }
 0x6dc   :  { %v2954_v34 = vpop.permute.xlu0 %2953  ;;  %v4347_v55 = vld [vmem:[%s6562_s0 + $0x5] ss:$8 sm:$0xf] }
 0x6dd   :  { %v2988_v7 = vpack.c.bf16 %v2984_v4, %v2984_v4  ;;  %v2958_v16 = vsel %vm289_vm5, %v2952_v47, %v2954_v34  ;;  %v2956_v8 = vpop.permute.xlu1 %2955 }
 0x6de   :  { %v2985_v5 = vmul.f32 %v2974_v11, %v2958_v16  ;;  %v2957_v10 = vsel %vm289_vm5, %v2954_v34, %v2956_v8  ;;  %v2960_v30 = vsel %vm289_vm5, %v2956_v8, %v2950_v14  ;;  %v3430_v27 = vld [vmem:[#allocation2 + $0x4a8] sm:$0xff]  ;;  %v3070_v14 = vrot.slane %v4346_v31, %v6666_v36 }
 0x6df   :  { %2992 = vst [vmem:[#allocation2 + $0x4c8] sm:$0xf] %v2988_v7  ;;  %v2983_v2 = vmul.f32 %v2966_v21, %v2960_v30  ;;  %v2986_v42 = vmul.f32 %v2978_v24, %v2957_v10  ;;  %3593 = vmatprep.subr.bf16.mxu0 %v3430_v27  ;;  %v3112_v16 = vrot.slane %v4347_v55, %v4829_v20 }
 0x6e0   :  { %v2989_v52 = vpack.c.bf16 %v2985_v5, %v2985_v5  ;;  %v2996_v57 = vpop.permute.xlu0 %2995 }
 0x6e1   :  { %v2987_v56 = vpack.c.bf16 %v2983_v2, %v2983_v2  ;;  %v2990_v50 = vpack.c.bf16 %v2986_v42, %v2986_v42  ;;  %v2998_v9 = vpop.permute.xlu1 %2997  ;;  %v3431_v29 = vld [vmem:[#allocation2 + $0x4b0] sm:$0xff] }
 0x6e2   :  { %2993 = vst [vmem:[#allocation2 + $0x4d0] sm:$0xf] %v2989_v52  ;;  %v3005_v53 = vsel %vm337_vm6, %v2996_v57, %v2998_v9  ;;  %v3429_v26 = vld [vmem:[#allocation2 + $0x4a0] sm:$0xff]  ;;  %v3432_v35 = vld [vmem:[#allocation2 + $0x4b8] sm:$0xff]  ;;  %v3116_v52 = vrot.slane %v4347_v55, %v4835_v22 }
 0x6e3   :  { %2991 = vst [vmem:[#allocation2 + $0x4c0] sm:$0xf] %v2987_v56  ;;  %2994 = vst [vmem:[#allocation2 + $0x4d8] sm:$0xf] %v2990_v50  ;;  %v3030_v44 = vmul.f32 %v3016_v0, %v3005_v53  ;;  %3594 = vmatpush1.bf16.msra.mxu0 %v3429_v26  ;;  %3716 = vmatprep.subr.bf16.mxu1 %v3432_v35  ;;  %v3120_v50 = vrot.slane %v4347_v55, %v4838_v23 }
 0x6e4   :  { %v3000_v51 = vpop.permute.xlu0 %2999  ;;  %3717 = vmatpush1.bf16.msra.mxu1 %v3431_v29  ;;  %v4348_v26 = vld [vmem:[%s6562_s0 + $0x6] ss:$8 sm:$0xf] }
 0x6e5   :  { %v3034_v15 = vpack.c.bf16 %v3030_v44, %v3030_v44  ;;  %v3004_v58 = vsel %vm337_vm6, %v2998_v9, %v3000_v51  ;;  %v3002_v1 = vpop.permute.xlu1 %3001  ;;  %v3124_v9 = vrot.slane %v4347_v55, %v6666_v36 }
 0x6e6   :  { %v3031_v59 = vmul.f32 %v3020_v43, %v3004_v58  ;;  %v3003_v61 = vsel %vm337_vm6, %v3000_v51, %v3002_v1  ;;  %v3006_v62 = vsel %vm337_vm6, %v3002_v1, %v2996_v57  ;;  %v3434_v25 = vld [vmem:[#allocation2 + $0x4c8] sm:$0xff]  ;;  %v3158_v58 = vrot.slane %v4348_v26, %v4829_v20 }
 0x6e7   :  { %3038 = vst [vmem:[#allocation2 + $0x4e8] sm:$0xf] %v3034_v15  ;;  %v3029_v38 = vmul.f32 %v3012_v13, %v3006_v62  ;;  %v3032_v32 = vmul.f32 %v3024_v3, %v3003_v61  ;;  %3595 = vmatprep.subr.bf16.mxu0 %v3434_v25 }
 0x6e8   :  { %v3035_v49 = vpack.c.bf16 %v3031_v59, %v3031_v59  ;;  %v3042_v33 = vpop.permute.xlu0 %3041 }
 0x6e9   :  { %v3033_v45 = vpack.c.bf16 %v3029_v38, %v3029_v38  ;;  %v3036_v48 = vpack.c.bf16 %v3032_v32, %v3032_v32  ;;  %v3044_v46 = vpop.permute.xlu1 %3043  ;;  %v3435_v18 = vld [vmem:[#allocation2 + $0x4d0] sm:$0xff] }
 0x6ea   :  { %3039 = vst [vmem:[#allocation2 + $0x4f0] sm:$0xf] %v3035_v49  ;;  %v3051_v37 = vsel %vm385_vm7, %v3042_v33, %v3044_v46  ;;  %v3433_v60 = vld [vmem:[#allocation2 + $0x4c0] sm:$0xff]  ;;  %v3436_v39 = vld [vmem:[#allocation2 + $0x4d8] sm:$0xff]  ;;  %v3162_v49 = vrot.slane %v4348_v26, %v4835_v22 }
 0x6eb   :  { %3037 = vst [vmem:[#allocation2 + $0x4e0] sm:$0xf] %v3033_v45  ;;  %3040 = vst [vmem:[#allocation2 + $0x4f8] sm:$0xf] %v3036_v48  ;;  %v3076_v54 = vmul.f32 %v3062_v41, %v3051_v37  ;;  %3596 = vmatpush1.bf16.msra.mxu0 %v3433_v60  ;;  %3718 = vmatprep.subr.bf16.mxu1 %v3436_v39  ;;  %v3446_v45 = vld [vmem:[#allocation2 + $0x528] sm:$0xff]  ;;  %v3170_v37 = vrot.slane %v4348_v26, %v6666_v36  ;;  %v3448_v39 = vld [vmem:[#allocation2 + $0x538] sm:$0xff] }
 0x6ec   :  { %v3046_v28 = vpop.permute.xlu0 %3045  ;;  %3719 = vmatpush1.bf16.msra.mxu1 %v3435_v18 }
 0x6ed   :  { %v3080_v47 = vpack.c.bf16 %v3076_v54, %v3076_v54  ;;  %v3050_v12 = vsel %vm385_vm7, %v3044_v46, %v3046_v28  ;;  %v3048_v11 = vpop.permute.xlu1 %3047  ;;  %v3166_v46 = vrot.slane %v4348_v26, %v4838_v23 }
 0x6ee   :  { %v3077_v4 = vmul.f32 %v3066_v6, %v3050_v12  ;;  %v3049_v21 = vsel %vm385_vm7, %v3046_v28, %v3048_v11  ;;  %v3052_v24 = vsel %vm385_vm7, %v3048_v11, %v3042_v33  ;;  %v3438_v34 = vld [vmem:[#allocation2 + $0x4e8] sm:$0xff] }
 0x6ef   :  { %3084 = vst [vmem:[#allocation2 + $0x508] sm:$0xf] %v3080_v47  ;;  %v3075_v40 = vmul.f32 %v3058_v17, %v3052_v24  ;;  %v3078_v7 = vmul.f32 %v3070_v14, %v3049_v21  ;;  %3597 = vmatprep.subr.bf16.mxu0 %v3438_v34  ;;  %v4349_v6 = vld [vmem:[%s6562_s0 + $0x7] ss:$8 sm:$0xf] }
 0x6f0   :  { %v3081_v8 = vpack.c.bf16 %v3077_v4, %v3077_v4  ;;  %v3096_v5 = vpop.permute.xlu0 %3095  ;;  %v3445_v47 = vld [vmem:[#allocation2 + $0x520] sm:$0xff]  ;;  %v3447_v4 = vld [vmem:[#allocation2 + $0x530] sm:$0xff]  ;;  %v3204_v21 = vrot.slane %v4349_v6, %v4829_v20 }
 0x6f1   :  { %v3079_v10 = vpack.c.bf16 %v3075_v40, %v3075_v40  ;;  %v3082_v30 = vpack.c.bf16 %v3078_v7, %v3078_v7  ;;  %v3098_v27 = vpop.permute.xlu1 %3097  ;;  %v3439_v56 = vld [vmem:[#allocation2 + $0x4f0] sm:$0xff] }
 0x6f2   :  { %3085 = vst [vmem:[#allocation2 + $0x510] sm:$0xf] %v3081_v8  ;;  %v3105_v2 = vsel %vm441_vm8, %v3096_v5, %v3098_v27  ;;  %v3437_v42 = vld [vmem:[#allocation2 + $0x4e0] sm:$0xff]  ;;  %v3440_v0 = vld [vmem:[#allocation2 + $0x4f8] sm:$0xff] }
 0x6f3   :  { %3083 = vst [vmem:[#allocation2 + $0x500] sm:$0xf] %v3079_v10  ;;  %3086 = vst [vmem:[#allocation2 + $0x518] sm:$0xf] %v3082_v30  ;;  %v3129_v57 = vmul.f32 %v3112_v16, %v3105_v2  ;;  %3598 = vmatpush1.bf16.msra.mxu0 %v3437_v42  ;;  %3720 = vmatprep.subr.bf16.mxu1 %v3440_v0  ;;  %v3212_v0 = vrot.slane %v4349_v6, %v4838_v23 }
 0x6f4   :  { %v3100_v53 = vpop.permute.xlu0 %3099  ;;  %3721 = vmatpush1.bf16.msra.mxu1 %v3439_v56  ;;  %v4350_v56 = vld [vmem:[%s6562_s0 + $0x20] ss:$8 sm:$0xf] }
 0x6f5   :  { %v3133_v35 = vpack.c.bf16 %v3129_v57, %v3129_v57  ;;  %v3104_v43 = vsel %vm441_vm8, %v3098_v27, %v3100_v53  ;;  %v3102_v44 = vpop.permute.xlu1 %3101  ;;  %v3208_v27 = vrot.slane %v4349_v6, %v4835_v22 }
 0x6f6   :  { %v3130_v29 = vmul.f32 %v3116_v52, %v3104_v43  ;;  %v3103_v13 = vsel %vm441_vm8, %v3100_v53, %v3102_v44  ;;  %v3106_v3 = vsel %vm441_vm8, %v3102_v44, %v3096_v5  ;;  %v3442_v51 = vld [vmem:[#allocation2 + $0x508] sm:$0xff]  ;;  %v3216_v52 = vrot.slane %v4349_v6, %v6666_v36 }
 0x6f7   :  { %3137 = vst [vmem:[#allocation2 + $0x540] sm:$0xf] %v3133_v35  ;;  %v3131_v31 = vmul.f32 %v3120_v50, %v3103_v13  ;;  %v3132_v15 = vmul.f32 %v3124_v9, %v3106_v3  ;;  %3599 = vmatprep.subr.bf16.mxu0 %v3442_v51  ;;  %v3250_v13 = vrot.slane %v4350_v56, %v4829_v20 }
 0x6f8   :  { %v3134_v1 = vpack.c.bf16 %v3130_v29, %v3130_v29  ;;  %v3142_v59 = vpop.permute.xlu0 %3141 }
 0x6f9   :  { %v3135_v61 = vpack.c.bf16 %v3131_v31, %v3131_v31  ;;  %v3136_v62 = vpack.c.bf16 %v3132_v15, %v3132_v15  ;;  %v3144_v25 = vpop.permute.xlu1 %3143  ;;  %v3443_v48 = vld [vmem:[#allocation2 + $0x510] sm:$0xff] }
 0x6fa   :  { %3138 = vst [vmem:[#allocation2 + $0x548] sm:$0xf] %v3134_v1  ;;  %v3151_v38 = vsel %vm489_vm9, %v3142_v59, %v3144_v25  ;;  %v3441_v32 = vld [vmem:[#allocation2 + $0x500] sm:$0xff]  ;;  %v3444_v41 = vld [vmem:[#allocation2 + $0x518] sm:$0xff] }
 0x6fb   :  { %3139 = vst [vmem:[#allocation2 + $0x550] sm:$0xf] %v3135_v61  ;;  %3140 = vst [vmem:[#allocation2 + $0x558] sm:$0xf] %v3136_v62  ;;  %v3175_v33 = vmul.f32 %v3158_v58, %v3151_v38  ;;  %3600 = vmatpush1.bf16.msra.mxu0 %v3441_v32  ;;  %3722 = vmatprep.subr.bf16.mxu1 %v3444_v41  ;;  %v3258_v41 = vrot.slane %v4350_v56, %v4838_v23 }
 0x6fc   :  { %v3146_v60 = vpop.permute.xlu0 %3145  ;;  %3601 = vmatprep.subr.bf16.mxu0 %v3446_v45  ;;  %3723 = vmatpush1.bf16.msra.mxu1 %v3443_v48 }
 0x6fd   :  { %v3179_v54 = vpack.c.bf16 %v3175_v33, %v3175_v33  ;;  %v3150_v18 = vsel %vm489_vm9, %v3144_v25, %v3146_v60  ;;  %3724 = vmatprep.subr.bf16.mxu1 %v3448_v39  ;;  %v3148_v17 = vpop.permute.xlu1 %3147  ;;  %v3254_v25 = vrot.slane %v4350_v56, %v4835_v22 }
 0x6fe   :  { %v3176_v14 = vmul.f32 %v3162_v49, %v3150_v18  ;;  %v3149_v28 = vsel %vm489_vm9, %v3146_v60, %v3148_v17  ;;  %v3152_v55 = vsel %vm489_vm9, %v3148_v17, %v3142_v59  ;;  %v3449_v10 = vld [vmem:[#allocation2 + $0x540] sm:$0xff]  ;;  %v3262_v49 = vrot.slane %v4350_v56, %v6666_v36 }
 0x6ff   :  { %3183 = vst [vmem:[#allocation2 + $0x560] sm:$0xf] %v3179_v54  ;;  %v3177_v12 = vmul.f32 %v3166_v46, %v3149_v28  ;;  %v3178_v11 = vmul.f32 %v3170_v37, %v3152_v55  ;;  %3602 = vmatpush1.bf16.msra.mxu0 %v3445_v47 }
 0x700   :  { %v3180_v24 = vpack.c.bf16 %v3176_v14, %v3176_v14  ;;  %v3188_v34 = vpop.permute.xlu0 %3187  ;;  %3725 = vmatpush1.bf16.msra.mxu1 %v3447_v4 }
 0x701   :  { %v3181_v40 = vpack.c.bf16 %v3177_v12, %v3177_v12  ;;  %v3182_v7 = vpack.c.bf16 %v3178_v11, %v3178_v11  ;;  %v3190_v16 = vpop.permute.xlu1 %3189  ;;  %v3450_v8 = vld [vmem:[#allocation2 + $0x548] sm:$0xff] }
 0x702   :  { %3184 = vst [vmem:[#allocation2 + $0x568] sm:$0xf] %v3180_v24  ;;  %v3197_v5 = vsel %vm537_vm10, %v3188_v34, %v3190_v16  ;;  %3603 = vmatprep.subr.bf16.mxu0 %v3450_v8  ;;  %v3452_v30 = vld [vmem:[#allocation2 + $0x558] sm:$0xff]  ;;  %v3451_v2 = vld [vmem:[#allocation2 + $0x550] sm:$0xff] }
 0x703   :  { %3185 = vst [vmem:[#allocation2 + $0x570] sm:$0xf] %v3181_v40  ;;  %3186 = vst [vmem:[#allocation2 + $0x578] sm:$0xf] %v3182_v7  ;;  %v3221_v42 = vmul.f32 %v3204_v21, %v3197_v5  ;;  %3604 = vmatpush1.bf16.msra.mxu0 %v3449_v10  ;;  %3726 = vmatprep.subr.bf16.mxu1 %v3452_v30 }
 0x704   :  { %v3192_v57 = vpop.permute.xlu0 %3191  ;;  %3727 = vmatpush1.bf16.msra.mxu1 %v3451_v2 }
 0x705   :  { %v3225_v50 = vpack.c.bf16 %v3221_v42, %v3221_v42  ;;  %v3196_v9 = vsel %vm537_vm10, %v3190_v16, %v3192_v57  ;;  %v3194_v53 = vpop.permute.xlu1 %3193 }
 0x706   :  { %v3222_v26 = vmul.f32 %v3208_v27, %v3196_v9  ;;  %v3195_v35 = vsel %vm537_vm10, %v3192_v57, %v3194_v53  ;;  %v3198_v43 = vsel %vm537_vm10, %v3194_v53, %v3188_v34  ;;  %v3453_v61 = vld [vmem:[#allocation2 + $0x560] sm:$0xff]  ;;  %v6669_v57 = vld [vmem:[#allocation4_spill] sm:$0xff] }
 0x707   :  { %3229 = vst [vmem:[#allocation2 + $0x580] sm:$0xf] %v3225_v50  ;;  %v3223_v44 = vmul.f32 %v3212_v0, %v3195_v35  ;;  %v3224_v29 = vmul.f32 %v3216_v52, %v3198_v43  ;;  %v4440_v27 = vld [vmem:[%s6560_s1] sm:$0xff] }
 0x708   :  { %v3226_v3 = vpack.c.bf16 %v3222_v26, %v3222_v26  ;;  %v3234_v51 = vpop.permute.xlu0 %3233  ;;  %v6670_v26 = vld [vmem:[#allocation3_spill] sm:$0xff] }
 0x709   :  { %v3227_v31 = vpack.c.bf16 %v3223_v44, %v3223_v44  ;;  %v3228_v15 = vpack.c.bf16 %v3224_v29, %v3224_v29  ;;  %v3236_v58 = vpop.permute.xlu1 %3235  ;;  %v3454_v1 = vld [vmem:[#allocation2 + $0x568] sm:$0xff] }
 0x70a   :  { %3230 = vst [vmem:[#allocation2 + $0x588] sm:$0xf] %v3226_v3  ;;  %v3243_v59 = vsel %vm585_vm11, %v3234_v51, %v3236_v58  ;;  %3605 = vmatprep.subr.bf16.mxu0 %v3454_v1  ;;  %v3456_v62 = vld [vmem:[#allocation2 + $0x578] sm:$0xff]  ;;  %v3455_v38 = vld [vmem:[#allocation2 + $0x570] sm:$0xff]  ;;  %v4133_v29 = vld [vmem:[#allocation2 + $0x8] sm:$0xff] }
 0x70b   :  { %3231 = vst [vmem:[#allocation2 + $0x590] sm:$0xf] %v3227_v31  ;;  %3232 = vst [vmem:[#allocation2 + $0x598] sm:$0xf] %v3228_v15  ;;  %v3267_v32 = vmul.f32 %v3250_v13, %v3243_v59  ;;  %3606 = vmatpush1.bf16.msra.mxu0 %v3453_v61  ;;  %3728 = vmatprep.subr.bf16.mxu1 %v3456_v62  ;;  %v4132_v3 = vld [vmem:[#allocation2] sm:$0xff]  ;;  %v4134_v31 = vld [vmem:[#allocation2 + $0x10] sm:$0xff] }
 0x70c   :  { %v3238_v33 = vpop.permute.xlu0 %3237  ;;  %3729 = vmatpush1.bf16.msra.mxu1 %v3455_v38  ;;  %v6426_v15 = vld.sshfl [vmem:[%s6567_s7] sm:$0x33 pattern:$0x76325410] }
 0x70d   :  { %v3271_v45 = vpack.c.bf16 %v3267_v32, %v3267_v32  ;;  %v3242_v48 = vsel %vm585_vm11, %v3236_v58, %v3238_v33  ;;  %v3240_v46 = vpop.permute.xlu1 %3239  ;;  %v4180_v58 = vcombine.high %v6426_v15, %v6426_v15  ;;  %v3767_v1 = vld [vmem:[%s6562_s0] ss:$8 sm:$0xf] }
 0x70e   :  { %v3268_v37 = vmul.f32 %v3254_v25, %v3242_v48  ;;  %v3241_v60 = vsel %vm585_vm11, %v3238_v33, %v3240_v46  ;;  %v3244_v39 = vsel %vm585_vm11, %v3240_v46, %v3234_v51  ;;  %v3457_v55 = vld [vmem:[#allocation2 + $0x580] sm:$0xff]  ;;  %v4135_v51 = vld [vmem:[#allocation2 + $0x18] sm:$0xff]  ;;  %v3776_v59 = vrot.slane %v3767_v1, %v4835_v22 }
 0x70f   :  { %3275 = vst [vmem:[#allocation2 + $0x5a0] sm:$0xf] %v3271_v45  ;;  %v3269_v6 = vmul.f32 %v3258_v41, %v3241_v60  ;;  %v3270_v54 = vmul.f32 %v3262_v49, %v3244_v39  ;;  %v3780_v38 = vrot.slane %v3767_v1, %v4838_v23  ;;  %v3772_v41 = vrot.slane %v3767_v1, %v4829_v20  ;;  %v4354_v45 = vld [vmem:[%s6562_s0 + $0x1] ss:$8 sm:$0xf] }
 0x710   :  { %v3272_v18 = vpack.c.bf16 %v3268_v37, %v3268_v37  ;;  %v3784_v49 = vrot.slane %v3767_v1, %v6666_v36 }
 0x711   :  { %v3273_v17 = vpack.c.bf16 %v3269_v6, %v3269_v6  ;;  %v3274_v14 = vpack.c.bf16 %v3270_v54, %v3270_v54  ;;  %v3458_v28 = vld [vmem:[#allocation2 + $0x588] sm:$0xff] }
 0x712   :  { %3276 = vst [vmem:[#allocation2 + $0x5a8] sm:$0xf] %v3272_v18  ;;  %3607 = vmatprep.subr.bf16.mxu0 %v3458_v28  ;;  %v3460_v47 = vld [vmem:[#allocation2 + $0x598] sm:$0xff]  ;;  %v3459_v12 = vld [vmem:[#allocation2 + $0x590] sm:$0xff] }
 0x713   :  { %3277 = vst [vmem:[#allocation2 + $0x5b0] sm:$0xf] %v3273_v17  ;;  %3278 = vst [vmem:[#allocation2 + $0x5b8] sm:$0xf] %v3274_v14  ;;  %3608 = vmatpush1.bf16.msra.mxu0 %v3457_v55  ;;  %3730 = vmatprep.subr.bf16.mxu1 %v3460_v47  ;;  %v3822_v17 = vrot.slane %v4354_v45, %v4835_v22 }
 0x714   :  { %3731 = vmatpush1.bf16.msra.mxu1 %v3459_v12 }
 0x716   :  { %v3461_v4 = vld [vmem:[#allocation2 + $0x5a0] sm:$0xff] }
 0x719   :  { %v3462_v11 = vld [vmem:[#allocation2 + $0x5a8] sm:$0xff] }
 0x71a   :  { %3609 = vmatprep.subr.bf16.mxu0 %v3462_v11  ;;  %v3464_v21 = vld [vmem:[#allocation2 + $0x5b8] sm:$0xff]  ;;  %v3463_v24 = vld [vmem:[#allocation2 + $0x5b0] sm:$0xff] }
 0x71b   :  { %3610 = vmatpush1.bf16.msra.mxu0 %v3461_v4  ;;  %3732 = vmatprep.subr.bf16.mxu1 %v3464_v21  ;;  %v3826_v4 = vrot.slane %v4354_v45, %v4838_v23 }
 0x71c   :  { %3733 = vmatpush1.bf16.msra.mxu1 %v3463_v24  ;;  %4185 = vmatprep.subr.bf16.mxu0 %v4133_v29  ;;  %v3818_v24 = vrot.slane %v4354_v45, %v4829_v20 }
 0x71d   :  { %4226 = vmatprep.subr.bf16.mxu1 %v4135_v51 }
 0x71e   :  { %3616 = vmatmul.mubr.bf16.vlgmr.msra.gmra.mrb[16].mxu0 %v6257_v63 }
 0x71f   :  { %3739 = vmatmul.mubr.bf16.vlgmr.msra.gmra.mrb[16].mxu1 %v6257_v63  ;;  %v4441_v63 = vld [vmem:[%s6560_s1 + $0x8] sm:$0xff]  ;;  %4186 = vmatpush1.bf16.msra.mxu0 %v4132_v3 }
 0x720   :  { %4227 = vmatpush1.bf16.msra.mxu1 %v4134_v31  ;;  %4362 = vmatprep.mubr.msk.bf16.mxu0 %vm672_vm3, %v4180_v58  ;;  %v4356_v31 = vld [vmem:[%s6562_s0 + $0x3] ss:$8 sm:$0xf] }
 0x721   :  { %4363 = vmatprep.mubr.msk.bf16.mxu1 %vm672_vm3, %v4180_v58 }
 0x7f1   :  { %v3617_v34 = vpop.f32.mrb[16].mxu0 }
 0x7f2   :  { %v3747_v40 = vmul.f32 0.2, %v3617_v34  ;;  %v3619_v7 = vpop.f32.mrb[17].mxu0  ;;  %v3740_v16 = vpop.f32.mrb[16].mxu1  ;;  %v3830_v34 = vrot.slane %v4354_v45, %v6666_v36 }
 0x7f3   :  { %v3748_v8 = vmul.f32 0.2, %v3619_v7  ;;  %v3749_v5 = vmul.f32 0.2, %v3740_v16  ;;  %v3621_v10 = vpop.f32.mrb[18].mxu0  ;;  %v3742_v30 = vpop.f32.mrb[17].mxu1 }
 0x7f4   :  { %v3751_v2 = vadd.f32 %v4440_v27, %v3747_v40  ;;  %v3750_v42 = vmul.f32 0.2, %v3742_v30  ;;  %v3622_v0 = vpop.f32.mrb[19].mxu0  ;;  %v3744_v52 = vpop.f32.mrb[18].mxu1 }
 0x7f5   :  { %v3752_v56 = vadd.f32 %v3748_v8, %v6669_v57  ;;  %v3753_v50 = vadd.f32 %v4441_v63, %v3749_v5  ;;  %v3745_v9 = vpop.f32.mrb[19].mxu1  ;;  %v4355_v7 = vld [vmem:[%s6562_s0 + $0x2] ss:$8 sm:$0xf] }
 0x7f6   :  { %v3939_v53 = vpack.c.bf16 %v3751_v2, %v3751_v2  ;;  %v3754_v35 = vadd.f32 %v3750_v42, %v6670_v26  ;;  %3755 = vrot.lane.b32.xlu0 %v3751_v2, %s4467_s9  ;;  %v3868_v52 = vrot.slane %v4355_v7, %v4835_v22  ;;  %v3876_v3 = vrot.slane %v4355_v7, %v6666_v36 }
 0x7f7   :  { %v3940_v43 = vpack.c.bf16 %v3752_v56, %v3752_v56  ;;  %v3941_v44 = vpack.c.bf16 %v3753_v50, %v3753_v50  ;;  %3757 = vrot.lane.b32.xlu1 %v3752_v56, %s4467_s9 }
 0x7f8   :  { %3943 = vst [vmem:[#allocation2 + $0xa0] sm:$0x3] %v3939_v53  ;;  %v3942_v13 = vpack.c.bf16 %v3754_v35, %v3754_v35 }
 0x7f9   :  { %3944 = vst [vmem:[#allocation2 + $0xa8] sm:$0x3] %v3940_v43  ;;  %3945 = vst [vmem:[#allocation2 + $0xb0] sm:$0x3] %v3941_v44  ;;  %v3872_v43 = vrot.slane %v4355_v7, %v4838_v23 }
 0x7fa   :  { %3946 = vst [vmem:[#allocation2 + $0xb8] sm:$0x3] %v3942_v13  ;;  %3759 = vrot.lane.b32.xlu0 %v3753_v50, %s4467_s9  ;;  %v3864_v13 = vrot.slane %v4355_v7, %v4829_v20 }
 0x7fb   :  { %3761 = vrot.lane.b32.xlu1 %v3754_v35, %s4467_s9 }
 0x7fe   :  { %3801 = vrot.lane.b32.xlu0 %v3751_v2, %s4469_s10 }
 0x7ff   :  { %3803 = vrot.lane.b32.xlu1 %v3752_v56, %s4469_s10 }
 0x802   :  { %3805 = vrot.lane.b32.xlu0 %v3753_v50, %s4469_s10 }
 0x803   :  { %3807 = vrot.lane.b32.xlu1 %v3754_v35, %s4469_s10 }
 0x806   :  { %3847 = vrot.lane.b32.xlu0 %v3751_v2, %s4472_s11 }
 0x807   :  { %3849 = vrot.lane.b32.xlu1 %v3752_v56, %s4472_s11 }
 0x80a   :  { %3851 = vrot.lane.b32.xlu0 %v3753_v50, %s4472_s11 }
 0x80b   :  { %3853 = vrot.lane.b32.xlu1 %v3754_v35, %s4472_s11 }
 0x80e   :  { %3893 = vrot.lane.b32.xlu0 %v3751_v2, %s4473_s12 }
 0x80f   :  { %3895 = vrot.lane.b32.xlu1 %v3752_v56, %s4473_s12 }
 0x812   :  { %3897 = vrot.lane.b32.xlu0 %v3753_v50, %s4473_s12 }
 0x813   :  { %3899 = vrot.lane.b32.xlu1 %v3754_v35, %s4473_s12 }
 0x816   :  { %3947 = vrot.lane.b32.xlu0 %v3751_v2, %s4474_s13 }
 0x817   :  { %3949 = vrot.lane.b32.xlu1 %v3752_v56, %s4474_s13 }
 0x81a   :  { %3951 = vrot.lane.b32.xlu0 %v3753_v50, %s4474_s13 }
 0x81b   :  { %3953 = vrot.lane.b32.xlu1 %v3754_v35, %s4474_s13 }
 0x81e   :  { %3993 = vrot.lane.b32.xlu0 %v3751_v2, %s4475_s14 }
 0x81f   :  { %3995 = vrot.lane.b32.xlu1 %v3752_v56, %s4475_s14 }
 0x822   :  { %3997 = vrot.lane.b32.xlu0 %v3753_v50, %s4475_s14 }
 0x823   :  { %3999 = vrot.lane.b32.xlu1 %v3754_v35, %s4475_s14 }
 0x826   :  { %4039 = vrot.lane.b32.xlu0 %v3751_v2, %s4476_s15 }
 0x827   :  { %4041 = vrot.lane.b32.xlu1 %v3752_v56, %s4476_s15 }
 0x82a   :  { %4043 = vrot.lane.b32.xlu0 %v3753_v50, %s4476_s15 }
 0x82b   :  { %4045 = vrot.lane.b32.xlu1 %v3754_v35, %s4476_s15 }
 0x82e   :  { %4085 = vrot.lane.b32.xlu0 %v3751_v2, %s4477_s16 }
 0x82f   :  { %4087 = vrot.lane.b32.xlu1 %v3752_v56, %s4477_s16 }
 0x832   :  { %4089 = vrot.lane.b32.xlu0 %v3753_v50, %s4477_s16 }
 0x833   :  { %4091 = vrot.lane.b32.xlu1 %v3754_v35, %s4477_s16 }
 0x868   :  { %v3756_v61 = vpop.permute.xlu0 %3755 }
 0x869   :  { %v3758_v62 = vpop.permute.xlu1 %3757 }
 0x86a   :  { %v3765_v25 = vsel %vm242_vm4, %v3756_v61, %v3758_v62 }
 0x86b   :  { %v3790_v32 = vmul.f32 %v3776_v59, %v3765_v25 }
 0x86c   :  { %v3760_v33 = vpop.permute.xlu0 %3759 }
 0x86d   :  { %v3794_v48 = vpack.c.bf16 %v3790_v32, %v3790_v32  ;;  %v3764_v46 = vsel %vm242_vm4, %v3758_v62, %v3760_v33  ;;  %v3762_v37 = vpop.permute.xlu1 %3761 }
 0x86e   :  { %v3791_v60 = vmul.f32 %v3780_v38, %v3764_v46  ;;  %v3763_v39 = vsel %vm242_vm4, %v3760_v33, %v3762_v37  ;;  %v3766_v6 = vsel %vm242_vm4, %v3762_v37, %v3756_v61 }
 0x86f   :  { %3798 = vst [vmem:[#allocation2 + $0x28] sm:$0x3] %v3794_v48  ;;  %v3789_v54 = vmul.f32 %v3772_v41, %v3766_v6  ;;  %v3792_v18 = vmul.f32 %v3784_v49, %v3763_v39  ;;  %v3914_v49 = vrot.slane %v4356_v31, %v4835_v22 }
 0x870   :  { %v3795_v14 = vpack.c.bf16 %v3791_v60, %v3791_v60  ;;  %v3802_v28 = vpop.permute.xlu0 %3801 }
 0x871   :  { %v3793_v55 = vpack.c.bf16 %v3789_v54, %v3789_v54  ;;  %v3796_v47 = vpack.c.bf16 %v3792_v18, %v3792_v18  ;;  %v3804_v12 = vpop.permute.xlu1 %3803  ;;  %v3918_v54 = vrot.slane %v4356_v31, %v4838_v23 }
 0x872   :  { %3799 = vst [vmem:[#allocation2 + $0x30] sm:$0x3] %v3795_v14  ;;  %v3811_v11 = vsel %vm289_vm5, %v3802_v28, %v3804_v12  ;;  %v3910_v14 = vrot.slane %v4356_v31, %v4829_v20 }
 0x873   :  { %3797 = vst [vmem:[#allocation2 + $0x20] sm:$0x3] %v3793_v55  ;;  %3800 = vst [vmem:[#allocation2 + $0x38] sm:$0x3] %v3796_v47  ;;  %v3836_v21 = vmul.f32 %v3822_v17, %v3811_v11 }
 0x874   :  { %v3806_v40 = vpop.permute.xlu0 %3805  ;;  %v4357_v47 = vld [vmem:[%s6562_s0 + $0x5] ss:$8 sm:$0xf] }
 0x875   :  { %v3840_v16 = vpack.c.bf16 %v3836_v21, %v3836_v21  ;;  %v3810_v8 = vsel %vm289_vm5, %v3804_v12, %v3806_v40  ;;  %v3808_v5 = vpop.permute.xlu1 %3807 }
 0x876   :  { %v3837_v10 = vmul.f32 %v3826_v4, %v3810_v8  ;;  %v3809_v30 = vsel %vm289_vm5, %v3806_v40, %v3808_v5  ;;  %v3812_v27 = vsel %vm289_vm5, %v3808_v5, %v3802_v28  ;;  %v4137_v2 = vld [vmem:[#allocation2 + $0x28] sm:$0xff]  ;;  %v3922_v28 = vrot.slane %v4356_v31, %v6666_v36 }
 0x877   :  { %3844 = vst [vmem:[#allocation2 + $0x48] sm:$0x3] %v3840_v16  ;;  %v3835_v42 = vmul.f32 %v3818_v24, %v3812_v27  ;;  %v3838_v0 = vmul.f32 %v3830_v34, %v3809_v30  ;;  %4187 = vmatprep.subr.bf16.mxu0 %v4137_v2  ;;  %v3964_v8 = vrot.slane %v4357_v47, %v4829_v20 }
 0x878   :  { %v3841_v57 = vpack.c.bf16 %v3837_v10, %v3837_v10  ;;  %v3848_v56 = vpop.permute.xlu0 %3847 }
 0x879   :  { %v3839_v63 = vpack.c.bf16 %v3835_v42, %v3835_v42  ;;  %v3842_v50 = vpack.c.bf16 %v3838_v0, %v3838_v0  ;;  %v3850_v9 = vpop.permute.xlu1 %3849  ;;  %v4138_v29 = vld [vmem:[#allocation2 + $0x30] sm:$0xff] }
 0x87a   :  { %3845 = vst [vmem:[#allocation2 + $0x50] sm:$0x3] %v3841_v57  ;;  %v3857_v53 = vsel %vm337_vm6, %v3848_v56, %v3850_v9  ;;  %v4136_v26 = vld [vmem:[#allocation2 + $0x20] sm:$0xff]  ;;  %v4139_v35 = vld [vmem:[#allocation2 + $0x38] sm:$0xff]  ;;  %v3968_v57 = vrot.slane %v4357_v47, %v4835_v22 }
 0x87b   :  { %3843 = vst [vmem:[#allocation2 + $0x40] sm:$0x3] %v3839_v63  ;;  %3846 = vst [vmem:[#allocation2 + $0x58] sm:$0x3] %v3842_v50  ;;  %v3882_v44 = vmul.f32 %v3868_v52, %v3857_v53  ;;  %4188 = vmatpush1.bf16.msra.mxu0 %v4136_v26  ;;  %4228 = vmatprep.subr.bf16.mxu1 %v4139_v35  ;;  %v3972_v50 = vrot.slane %v4357_v47, %v4838_v23 }
 0x87c   :  { %v3852_v51 = vpop.permute.xlu0 %3851  ;;  %4229 = vmatpush1.bf16.msra.mxu1 %v4138_v29  ;;  %v4358_v26 = vld [vmem:[%s6562_s0 + $0x6] ss:$8 sm:$0xf] }
 0x87d   :  { %v3886_v58 = vpack.c.bf16 %v3882_v44, %v3882_v44  ;;  %v3856_v1 = vsel %vm337_vm6, %v3850_v9, %v3852_v51  ;;  %v3854_v59 = vpop.permute.xlu1 %3853  ;;  %v3976_v9 = vrot.slane %v4357_v47, %v6666_v36 }
 0x87e   :  { %v3883_v61 = vmul.f32 %v3872_v43, %v3856_v1  ;;  %v3855_v62 = vsel %vm337_vm6, %v3852_v51, %v3854_v59  ;;  %v3858_v25 = vsel %vm337_vm6, %v3854_v59, %v3848_v56  ;;  %v4141_v38 = vld [vmem:[#allocation2 + $0x48] sm:$0xff]  ;;  %v4010_v1 = vrot.slane %v4358_v26, %v4829_v20 }
 0x87f   :  { %3890 = vst [vmem:[#allocation2 + $0x68] sm:$0x3] %v3886_v58  ;;  %v3881_v32 = vmul.f32 %v3864_v13, %v3858_v25  ;;  %v3884_v41 = vmul.f32 %v3876_v3, %v3855_v62  ;;  %4189 = vmatprep.subr.bf16.mxu0 %v4141_v38 }
 0x880   :  { %v3887_v33 = vpack.c.bf16 %v3883_v61, %v3883_v61  ;;  %v3894_v45 = vpop.permute.xlu0 %3893 }
 0x881   :  { %v3885_v48 = vpack.c.bf16 %v3881_v32, %v3881_v32  ;;  %v3888_v46 = vpack.c.bf16 %v3884_v41, %v3884_v41  ;;  %v3896_v37 = vpop.permute.xlu1 %3895  ;;  %v4142_v17 = vld [vmem:[#allocation2 + $0x50] sm:$0xff] }
 0x882   :  { %3891 = vst [vmem:[#allocation2 + $0x70] sm:$0x3] %v3887_v33  ;;  %v3903_v60 = vsel %vm385_vm7, %v3894_v45, %v3896_v37  ;;  %v4140_v39 = vld [vmem:[#allocation2 + $0x40] sm:$0xff]  ;;  %v4143_v6 = vld [vmem:[#allocation2 + $0x58] sm:$0xff]  ;;  %v4014_v33 = vrot.slane %v4358_v26, %v4835_v22 }
 0x883   :  { %3889 = vst [vmem:[#allocation2 + $0x60] sm:$0x3] %v3885_v48  ;;  %3892 = vst [vmem:[#allocation2 + $0x78] sm:$0x3] %v3888_v46  ;;  %v3928_v18 = vmul.f32 %v3914_v49, %v3903_v60  ;;  %4190 = vmatpush1.bf16.msra.mxu0 %v4140_v39  ;;  %4230 = vmatprep.subr.bf16.mxu1 %v4143_v6  ;;  %v4153_v48 = vld [vmem:[#allocation2 + $0xa8] sm:$0xff]  ;;  %v4022_v60 = vrot.slane %v4358_v26, %v6666_v36  ;;  %v4155_v6 = vld [vmem:[#allocation2 + $0xb8] sm:$0xff] }
 0x884   :  { %v3898_v55 = vpop.permute.xlu0 %3897  ;;  %4231 = vmatpush1.bf16.msra.mxu1 %v4142_v17 }
 0x885   :  { %v3932_v12 = vpack.c.bf16 %v3928_v18, %v3928_v18  ;;  %v3902_v11 = vsel %vm385_vm7, %v3896_v37, %v3898_v55  ;;  %v3900_v4 = vpop.permute.xlu1 %3899  ;;  %v4018_v37 = vrot.slane %v4358_v26, %v4838_v23 }
 0x886   :  { %v3929_v21 = vmul.f32 %v3918_v54, %v3902_v11  ;;  %v3901_v24 = vsel %vm385_vm7, %v3898_v55, %v3900_v4  ;;  %v3904_v34 = vsel %vm385_vm7, %v3900_v4, %v3894_v45  ;;  %v4145_v40 = vld [vmem:[#allocation2 + $0x68] sm:$0xff] }
 0x887   :  { %3936 = vst [vmem:[#allocation2 + $0x88] sm:$0x3] %v3932_v12  ;;  %v3927_v7 = vmul.f32 %v3910_v14, %v3904_v34  ;;  %v3930_v16 = vmul.f32 %v3922_v28, %v3901_v24  ;;  %4191 = vmatprep.subr.bf16.mxu0 %v4145_v40  ;;  %v4359_v54 = vld [vmem:[%s6562_s0 + $0x7] ss:$8 sm:$0xf] }
 0x888   :  { %v3933_v5 = vpack.c.bf16 %v3929_v21, %v3929_v21  ;;  %v3948_v10 = vpop.permute.xlu0 %3947  ;;  %v4152_v12 = vld [vmem:[#allocation2 + $0xa0] sm:$0xff]  ;;  %v4154_v21 = vld [vmem:[#allocation2 + $0xb0] sm:$0xff]  ;;  %v4056_v24 = vrot.slane %v4359_v54, %v4829_v20 }
 0x889   :  { %v3931_v30 = vpack.c.bf16 %v3927_v7, %v3927_v7  ;;  %v3934_v27 = vpack.c.bf16 %v3930_v16, %v3930_v16  ;;  %v3950_v2 = vpop.permute.xlu1 %3949  ;;  %v4146_v63 = vld [vmem:[#allocation2 + $0x70] sm:$0xff] }
 0x88a   :  { %3937 = vst [vmem:[#allocation2 + $0x90] sm:$0x3] %v3933_v5  ;;  %v3957_v42 = vsel %vm441_vm8, %v3948_v10, %v3950_v2  ;;  %v4144_v0 = vld [vmem:[#allocation2 + $0x60] sm:$0xff]  ;;  %v4147_v52 = vld [vmem:[#allocation2 + $0x78] sm:$0xff] }
 0x88b   :  { %3935 = vst [vmem:[#allocation2 + $0x80] sm:$0x3] %v3931_v30  ;;  %3938 = vst [vmem:[#allocation2 + $0x98] sm:$0x3] %v3934_v27  ;;  %v3981_v56 = vmul.f32 %v3964_v8, %v3957_v42  ;;  %4192 = vmatpush1.bf16.msra.mxu0 %v4144_v0  ;;  %4232 = vmatprep.subr.bf16.mxu1 %v4147_v52  ;;  %v4064_v52 = vrot.slane %v4359_v54, %v4838_v23 }
 0x88c   :  { %v3952_v53 = vpop.permute.xlu0 %3951  ;;  %4233 = vmatpush1.bf16.msra.mxu1 %v4146_v63  ;;  %v4360_v63 = vld [vmem:[%s6562_s0 + $0x20] ss:$8 sm:$0xf] }
 0x88d   :  { %v3985_v35 = vpack.c.bf16 %v3981_v56, %v3981_v56  ;;  %v3956_v43 = vsel %vm441_vm8, %v3950_v2, %v3952_v53  ;;  %v3954_v44 = vpop.permute.xlu1 %3953  ;;  %v4060_v2 = vrot.slane %v4359_v54, %v4835_v22 }
 0x88e   :  { %v3982_v29 = vmul.f32 %v3968_v57, %v3956_v43  ;;  %v3955_v13 = vsel %vm441_vm8, %v3952_v53, %v3954_v44  ;;  %v3958_v3 = vsel %vm441_vm8, %v3954_v44, %v3948_v10  ;;  %v4149_v51 = vld [vmem:[#allocation2 + $0x88] sm:$0xff]  ;;  %v4068_v57 = vrot.slane %v4359_v54, %v6666_v36 }
 0x88f   :  { %3989 = vst [vmem:[#allocation2 + $0xc0] sm:$0x3] %v3985_v35  ;;  %v3983_v31 = vmul.f32 %v3972_v50, %v3955_v13  ;;  %v3984_v58 = vmul.f32 %v3976_v9, %v3958_v3  ;;  %4193 = vmatprep.subr.bf16.mxu0 %v4149_v51  ;;  %v4102_v13 = vrot.slane %v4360_v63, %v4829_v20 }
 0x890   :  { %v3986_v59 = vpack.c.bf16 %v3982_v29, %v3982_v29  ;;  %v3994_v61 = vpop.permute.xlu0 %3993  ;;  %v4110_v20 = vrot.slane %v4360_v63, %v4838_v23 }
 0x891   :  { %v3987_v62 = vpack.c.bf16 %v3983_v31, %v3983_v31  ;;  %v3988_v25 = vpack.c.bf16 %v3984_v58, %v3984_v58  ;;  %v3996_v38 = vpop.permute.xlu1 %3995  ;;  %v4150_v46 = vld [vmem:[#allocation2 + $0x90] sm:$0xff] }
 0x892   :  { %3990 = vst [vmem:[#allocation2 + $0xc8] sm:$0x3] %v3986_v59  ;;  %v4003_v32 = vsel %vm489_vm9, %v3994_v61, %v3996_v38  ;;  %v4148_v41 = vld [vmem:[#allocation2 + $0x80] sm:$0xff]  ;;  %v4151_v49 = vld [vmem:[#allocation2 + $0x98] sm:$0xff] }
 0x893   :  { %3991 = vst [vmem:[#allocation2 + $0xd0] sm:$0x3] %v3987_v62  ;;  %3992 = vst [vmem:[#allocation2 + $0xd8] sm:$0x3] %v3988_v25  ;;  %v4027_v45 = vmul.f32 %v4010_v1, %v4003_v32  ;;  %4194 = vmatpush1.bf16.msra.mxu0 %v4148_v41  ;;  %4234 = vmatprep.subr.bf16.mxu1 %v4151_v49  ;;  %v4114_v49 = vrot.slane %v4360_v63, %v6666_v36 }
 0x894   :  { %v3998_v39 = vpop.permute.xlu0 %3997  ;;  %4195 = vmatprep.subr.bf16.mxu0 %v4153_v48  ;;  %4235 = vmatpush1.bf16.msra.mxu1 %v4150_v46 }
 0x895   :  { %v4031_v18 = vpack.c.bf16 %v4027_v45, %v4027_v45  ;;  %v4002_v17 = vsel %vm489_vm9, %v3996_v38, %v3998_v39  ;;  %4236 = vmatprep.subr.bf16.mxu1 %v4155_v6  ;;  %v4000_v14 = vpop.permute.xlu1 %3999  ;;  %v4106_v38 = vrot.slane %v4360_v63, %v4835_v22 }
 0x896   :  { %v4028_v28 = vmul.f32 %v4014_v33, %v4002_v17  ;;  %v4001_v55 = vsel %vm489_vm9, %v3998_v39, %v4000_v14  ;;  %v4004_v47 = vsel %vm489_vm9, %v4000_v14, %v3994_v61  ;;  %v4156_v30 = vld [vmem:[#allocation2 + $0xc0] sm:$0xff] }
 0x897   :  { %4035 = vst [vmem:[#allocation2 + $0xe0] sm:$0x3] %v4031_v18  ;;  %v4029_v11 = vmul.f32 %v4018_v37, %v4001_v55  ;;  %v4030_v4 = vmul.f32 %v4022_v60, %v4004_v47  ;;  %4196 = vmatpush1.bf16.msra.mxu0 %v4152_v12 }
 0x898   :  { %v4032_v34 = vpack.c.bf16 %v4028_v28, %v4028_v28  ;;  %v4040_v40 = vpop.permute.xlu0 %4039  ;;  %4237 = vmatpush1.bf16.msra.mxu1 %v4154_v21 }
 0x899   :  { %v4033_v7 = vpack.c.bf16 %v4029_v11, %v4029_v11  ;;  %v4034_v16 = vpack.c.bf16 %v4030_v4, %v4030_v4  ;;  %v4042_v8 = vpop.permute.xlu1 %4041  ;;  %v4157_v5 = vld [vmem:[#allocation2 + $0xc8] sm:$0xff] }
 0x89a   :  { %4036 = vst [vmem:[#allocation2 + $0xe8] sm:$0x3] %v4032_v34  ;;  %v4049_v10 = vsel %vm537_vm10, %v4040_v40, %v4042_v8  ;;  %4197 = vmatprep.subr.bf16.mxu0 %v4157_v5  ;;  %v4159_v27 = vld [vmem:[#allocation2 + $0xd8] sm:$0xff]  ;;  %v4158_v42 = vld [vmem:[#allocation2 + $0xd0] sm:$0xff] }
 0x89b   :  { %4037 = vst [vmem:[#allocation2 + $0xf0] sm:$0x3] %v4033_v7  ;;  %4038 = vst [vmem:[#allocation2 + $0xf8] sm:$0x3] %v4034_v16  ;;  %v4073_v0 = vmul.f32 %v4056_v24, %v4049_v10  ;;  %4198 = vmatpush1.bf16.msra.mxu0 %v4156_v30  ;;  %4238 = vmatprep.subr.bf16.mxu1 %v4159_v27 }
 0x89c   :  { %v4044_v56 = vpop.permute.xlu0 %4043  ;;  %4239 = vmatpush1.bf16.msra.mxu1 %v4158_v42 }
 0x89d   :  { %v4077_v50 = vpack.c.bf16 %v4073_v0, %v4073_v0  ;;  %v4048_v9 = vsel %vm537_vm10, %v4042_v8, %v4044_v56  ;;  %v4046_v53 = vpop.permute.xlu1 %4045 }
 0x89e   :  { %v4074_v26 = vmul.f32 %v4060_v2, %v4048_v9  ;;  %v4047_v35 = vsel %vm537_vm10, %v4044_v56, %v4046_v53  ;;  %v4050_v43 = vsel %vm537_vm10, %v4046_v53, %v4040_v40  ;;  %v4160_v62 = vld [vmem:[#allocation2 + $0xe0] sm:$0xff] }
 0x89f   :  { %4081 = vst [vmem:[#allocation2 + $0x100] sm:$0x3] %v4077_v50  ;;  %v4075_v44 = vmul.f32 %v4064_v52, %v4047_v35  ;;  %v4076_v29 = vmul.f32 %v4068_v57, %v4050_v43 }
 0x8a0   :  { %v4078_v3 = vpack.c.bf16 %v4074_v26, %v4074_v26  ;;  %v4086_v51 = vpop.permute.xlu0 %4085 }
 0x8a1   :  { %v4079_v31 = vpack.c.bf16 %v4075_v44, %v4075_v44  ;;  %v4080_v58 = vpack.c.bf16 %v4076_v29, %v4076_v29  ;;  %v4088_v1 = vpop.permute.xlu1 %4087  ;;  %v4161_v59 = vld [vmem:[#allocation2 + $0xe8] sm:$0xff] }
 0x8a2   :  { %4082 = vst [vmem:[#allocation2 + $0x108] sm:$0x3] %v4078_v3  ;;  %v4095_v61 = vsel %vm585_vm11, %v4086_v51, %v4088_v1  ;;  %4199 = vmatprep.subr.bf16.mxu0 %v4161_v59  ;;  %v4163_v25 = vld [vmem:[#allocation2 + $0xf8] sm:$0xff]  ;;  %v4162_v32 = vld [vmem:[#allocation2 + $0xf0] sm:$0xff] }
 0x8a3   :  { %4083 = vst [vmem:[#allocation2 + $0x110] sm:$0x3] %v4079_v31  ;;  %4084 = vst [vmem:[#allocation2 + $0x118] sm:$0x3] %v4080_v58  ;;  %v4119_v41 = vmul.f32 %v4102_v13, %v4095_v61  ;;  %4200 = vmatpush1.bf16.msra.mxu0 %v4160_v62  ;;  %4240 = vmatprep.subr.bf16.mxu1 %v4163_v25 }
 0x8a4   :  { %v4090_v33 = vpop.permute.xlu0 %4089  ;;  %4241 = vmatpush1.bf16.msra.mxu1 %v4162_v32 }
 0x8a5   :  { %v4123_v45 = vpack.c.bf16 %v4119_v41, %v4119_v41  ;;  %v4094_v48 = vsel %vm585_vm11, %v4088_v1, %v4090_v33  ;;  %v4092_v46 = vpop.permute.xlu1 %4091 }
 0x8a6   :  { %v4120_v37 = vmul.f32 %v4106_v38, %v4094_v48  ;;  %v4093_v22 = vsel %vm585_vm11, %v4090_v33, %v4092_v46  ;;  %v4096_v60 = vsel %vm585_vm11, %v4092_v46, %v4086_v51  ;;  %v4164_v17 = vld [vmem:[#allocation2 + $0x100] sm:$0xff] }
 0x8a7   :  { %4127 = vst [vmem:[#allocation2 + $0x120] sm:$0x3] %v4123_v45  ;;  %v4121_v39 = vmul.f32 %v4110_v20, %v4093_v22  ;;  %v4122_v6 = vmul.f32 %v4114_v49, %v4096_v60 }
 0x8a8   :  { %v4124_v23 = vpack.c.bf16 %v4120_v37, %v4120_v37 }
 0x8a9   :  { %v4125_v54 = vpack.c.bf16 %v4121_v39, %v4121_v39  ;;  %v4126_v36 = vpack.c.bf16 %v4122_v6, %v4122_v6  ;;  %v4165_v18 = vld [vmem:[#allocation2 + $0x108] sm:$0xff] }
 0x8aa   :  { %4128 = vst [vmem:[#allocation2 + $0x128] sm:$0x3] %v4124_v23  ;;  %4201 = vmatprep.subr.bf16.mxu0 %v4165_v18  ;;  %v4167_v14 = vld [vmem:[#allocation2 + $0x118] sm:$0xff]  ;;  %v4166_v28 = vld [vmem:[#allocation2 + $0x110] sm:$0xff] }
 0x8ab   :  { %4129 = vst [vmem:[#allocation2 + $0x130] sm:$0x3] %v4125_v54  ;;  %4130 = vst [vmem:[#allocation2 + $0x138] sm:$0x3] %v4126_v36  ;;  %4202 = vmatpush1.bf16.msra.mxu0 %v4164_v17  ;;  %4242 = vmatprep.subr.bf16.mxu1 %v4167_v14 }
 0x8ac   :  { %4243 = vmatpush1.bf16.msra.mxu1 %v4166_v28 }
 0x8ae   :  { %v4168_v19 = vld [vmem:[#allocation2 + $0x120] sm:$0xff] }
 0x8b1   :  { %v4169_v55 = vld [vmem:[#allocation2 + $0x128] sm:$0xff] }
 0x8b2   :  { %4203 = vmatprep.subr.bf16.mxu0 %v4169_v55  ;;  %v4171_v47 = vld [vmem:[#allocation2 + $0x138] sm:$0xff]  ;;  %v4170_v12 = vld [vmem:[#allocation2 + $0x130] sm:$0xff] }
 0x8b3   :  { %4204 = vmatpush1.bf16.msra.mxu0 %v4168_v19  ;;  %4244 = vmatprep.subr.bf16.mxu1 %v4171_v47 }
 0x8b4   :  { %4245 = vmatpush1.bf16.msra.mxu1 %v4170_v12 }
 0x8b6   :  { %4218 = vmatmul.mubr.bf16.vlgmr.msra.gmra.mrb[20].mxu0 %v6426_v15 }
 0x8b7   :  { %4259 = vmatmul.mubr.bf16.vlgmr.msra.gmra.mrb[20].mxu1 %v6426_v15 }
 0x989   :  { %v4219_v11 = vpop.f32.mrb[20].mxu0 }
 0x98a   :  { %vm4267_vm3 = vcmp.gt.f32.partialorder %v4219_v11, 0.0  ;;  %v4271_v4 = vmul.f32 0.2, %v4219_v11  ;;  %v4221_v21 = vpop.f32.mrb[21].mxu0  ;;  %v4260_v24 = vpop.f32.mrb[20].mxu1 }
 0x98b   :  { %vm4268_vm4 = vcmp.gt.f32.partialorder %v4221_v21, 0.0  ;;  %v4272_v34 = vmul.f32 0.2, %v4221_v21  ;;  %vm4269_vm5 = vcmp.gt.f32.partialorder %v4260_v24, 0.0  ;;  %v4273_v40 = vmul.f32 0.2, %v4260_v24 }
 0x98c   :  { %v4275_v7 = vsel %vm4267_vm3, %v4219_v11, %v4271_v4  ;;  %v4223_v16 = vpop.f32.mrb[22].mxu0  ;;  %v4262_v8 = vpop.f32.mrb[21].mxu1 }
 0x98d   :  { %v4276_v5 = vsel %vm4268_vm4, %v4221_v21, %v4272_v34  ;;  %v4277_v10 = vsel %vm4269_vm5, %v4260_v24, %v4273_v40  ;;  %vm4270_vm6 = vcmp.gt.f32.partialorder %v4262_v8, 0.0  ;;  %v4274_v30 = vmul.f32 0.2, %v4262_v8  ;;  %v4224_v27 = vpop.f32.mrb[23].mxu0  ;;  %v4264_v2 = vpop.f32.mrb[22].mxu1 }
 0x98e   :  { %v4283_v42 = vcombine.low %v4275_v7, %v4276_v5  ;;  %v4265_v15 = vpop.f32.mrb[23].mxu1 }
 0x98f   :  { %v4278_v0 = vsel %vm4270_vm6, %v4262_v8, %v4274_v30 }
 0x990   :  { %4287 = vst [vmem:[%s6568_s8] sm:$0xff] %v4283_v42  ;;  %v4284_v52 = vcombine.low %v4277_v10, %v4278_v0 }
 0x992   :  { %4288 = vst [vmem:[%s6568_s8 + $0x8] sm:$0xff] %v4284_v52 }

</bundles_post_ra>
